<compile_context>
chip_gen: v7x
topology: tpu7x:2x2x1
jax: 0.10.0
libtpu: 0.0.40
codegen_flags: <defaults>
</compile_context>

<pallas_src>
import functools

import jax
import jax.numpy as jnp
from jax.experimental import pallas as pl
from jax.experimental.pallas import tpu as pltpu


Z_DIM = 100
K_PAD = 128                  # 100 padded up to one full 128-lane group
H1, H2, H3 = 256, 512, 1024
OUT_DIM = 28 * 28            # 784
OUT_PAD = 7 * 128            # 896: lane-dense padding of 784

_HAS_BUFFERED = hasattr(pl, "Buffered")


def _round_up(x, m):
    return ((x + m - 1) // m) * m


# ---------------------------------------------------------------------------
# Kernel: the whole 4-layer MLP on one batch tile.  Weights/biases live in
# VMEM across all grid steps (constant index_map, single-buffered); only the
# z tile and the output tile stream through HBM.
# ---------------------------------------------------------------------------
def _generator_kernel(z_ref,
                      w1_ref, b1_ref, w2_ref, b2_ref,
                      w3_ref, b3_ref, w4_ref, b4_ref,
                      out_ref):
    # Linear(100->256) + ReLU   (K zero-padded to 128 -> identical result)
    h = jnp.dot(z_ref[...], w1_ref[...], preferred_element_type=jnp.float32)
    h = jnp.maximum(h + b1_ref[...].astype(jnp.float32), 0.0).astype(jnp.bfloat16)
    # Linear(256->512) + ReLU
    h = jnp.dot(h, w2_ref[...], preferred_element_type=jnp.float32)
    h = jnp.maximum(h + b2_ref[...].astype(jnp.float32), 0.0).astype(jnp.bfloat16)
    # Linear(512->1024) + ReLU
    h = jnp.dot(h, w3_ref[...], preferred_element_type=jnp.float32)
    h = jnp.maximum(h + b3_ref[...].astype(jnp.float32), 0.0).astype(jnp.bfloat16)
    # Linear(1024->784, padded to 896) + Tanh; store bf16 (halves writeback)
    h = jnp.dot(h, w4_ref[...], preferred_element_type=jnp.float32)
    out_ref[...] = jnp.tanh(h + b4_ref[...].astype(jnp.float32)).astype(jnp.bfloat16)


# Explicit (non-late-binding) index maps.
def _batch_idx(i):
    return (i, 0)


def _const_idx(i):
    return (0, 0)


def _const_spec(shape):
    """Grid-invariant (VMEM-resident) operand; single-buffered if supported."""
    if _HAS_BUFFERED:
        try:
            return pl.BlockSpec(shape, _const_idx, pipeline_mode=pl.Buffered(1))
        except TypeError:   # older BlockSpec signature without pipeline_mode
            pass
    return pl.BlockSpec(shape, _const_idx)


# ---------------------------------------------------------------------------
# One-time parameter prep (hoisted out of the per-call forward path).
# ---------------------------------------------------------------------------
def prepare_params(params):
    """Pad + cast weights/biases to MXU-native bf16 once, at init time."""
    (w1, b1), (w2, b2), (w3, b3), (w4, b4) = params
    w1p = jnp.pad(w1, ((0, K_PAD - Z_DIM), (0, 0))).astype(jnp.bfloat16)
    w2b = w2.astype(jnp.bfloat16)
    w3b = w3.astype(jnp.bfloat16)
    w4p = jnp.pad(w4, ((0, 0), (0, OUT_PAD - OUT_DIM))).astype(jnp.bfloat16)
    b1b = b1.reshape(1, H1).astype(jnp.bfloat16)
    b2b = b2.reshape(1, H2).astype(jnp.bfloat16)
    b3b = b3.reshape(1, H3).astype(jnp.bfloat16)
    b4p = jnp.pad(b4, (0, OUT_PAD - OUT_DIM)).reshape(1, OUT_PAD).astype(jnp.bfloat16)
    # TODO(synk): for latency-critical small-batch serving, quantize weights to
    # int8 (v5e/v6e MXU) / fp8 (v7x) or prefetch them cross-call (P10-style)
    # to hide the one-shot ~3.1 MiB weight DMA.
    return (w1p, b1b, w2b, b2b, w3b, b3b, w4p, b4p)


# ---------------------------------------------------------------------------
# Batch-tile selection (per-generation gating + v7x megacore awareness).
# ---------------------------------------------------------------------------
def _default_tb_max():
    """v5e keeps TB<=256 (MXU already amortizes step overhead); newer: 512."""
    try:
        kind = jax.devices()[0].device_kind.lower()
    except Exception:
        return 512
    if "v5 lite" in kind or "v5e" in kind or "v5lite" in kind:
        return 256
    return 512


def _choose_tile(batch, tb_max):
    # bf16 sublane packing is 16 rows -> round batch padding to 16 (not 8).
    b_round = _round_up(max(batch, 1), 16)
    if b_round <= 16:
        tb = 16
    else:
        # Aim for >= 2 grid tiles so the "parallel" batch axis gives both
        # TensorCores work on v7x (no effect on single-TC v5e/v6e).
        tb = min(tb_max, _round_up(pl.cdiv(b_round, 2), 16))
    b_total = _round_up(b_round, tb)
    return tb, b_total, b_total // tb


# ---------------------------------------------------------------------------
# Forward pass.
# ---------------------------------------------------------------------------
@functools.partial(jax.jit, static_argnames=("tb_max", "return_padded"))
def _forward_impl(z, prep, tb_max, return_padded):
    B = z.shape[0]
    TB, B_total, n_tiles = _choose_tile(B, tb_max)

    # Per-call input prep (small): pad batch + K, cast z to bf16.
    zp = jnp.pad(z, ((0, B_total - B), (0, K_PAD - Z_DIM))).astype(jnp.bfloat16)

    in_specs = [
        pl.BlockSpec((TB, K_PAD), _batch_idx),       # z tile (batch-streamed)
        _const_spec((K_PAD, H1)),   _const_spec((1, H1)),
        _const_spec((H1, H2)),      _const_spec((1, H2)),
        _const_spec((H2, H3)),      _const_spec((1, H3)),
        _const_spec((H3, OUT_PAD)), _const_spec((1, OUT_PAD)),
    ]
    out_spec = pl.BlockSpec((TB, OUT_PAD), _batch_idx)

    flops = 2 * B_total * (K_PAD * H1 + H1 * H2 + H2 * H3 + H3 * OUT_PAD)
    weight_bytes = 2 * (K_PAD * H1 + H1 * H2 + H2 * H3 + H3 * OUT_PAD
                        + H1 + H2 + H3 + OUT_PAD)
    bytes_accessed = weight_bytes + B_total * (K_PAD + OUT_PAD) * 2
    cost = pl.CostEstimate(flops=flops,
                           transcendentals=B_total * OUT_PAD,
                           bytes_accessed=bytes_accessed)

    flat = pl.pallas_call(
        _generator_kernel,
        out_shape=jax.ShapeDtypeStruct((B_total, OUT_PAD), jnp.bfloat16),
        grid=(n_tiles,),
        in_specs=in_specs,
        out_specs=out_spec,
        compiler_params=pltpu.CompilerParams(
            dimension_semantics=("parallel",),
            vmem_limit_bytes=32 << 20,
        ),
        cost_estimate=cost,
    )(zp, *prep)

    if return_padded:
        # Lane-padded bf16 slab (B_total, 896): lets the consumer fuse the
        # slice/upcast instead of paying an extra HBM pass here.
        return flat
    # Module semantics: f32 (B, 1, 28, 28).  Slice + upcast + reshape fuse
    # into a single pass under jit.
    return flat[:B, :OUT_DIM].astype(jnp.float32).reshape(B, 1, 28, 28)


def generator_forward(z, prepared_params, *, tb_max=None, return_padded=False):
    """z: (B, 100) f32, prepared_params from prepare_params()."""
    if tb_max is None:
        tb_max = _default_tb_max()
    return _forward_impl(z, prepared_params, tb_max=tb_max,
                         return_padded=return_padded)


def init_params(key):
    """Deterministic synthetic parameters (shapes from the PyTorch __init__)."""
    dims = [(Z_DIM, H1), (H1, H2), (H2, H3), (H3, OUT_DIM)]
    params = []
    for fan_in, fan_out in dims:
        kw, kb, key = jax.random.split(key, 3)
        bound = 1.0 / jnp.sqrt(fan_in)
        w = jax.random.uniform(kw, (fan_in, fan_out), jnp.float32, -bound, bound)
        b = jax.random.uniform(kb, (fan_out,), jnp.float32, -bound, bound)
        params.append((w, b))
    return params


if __name__ == "__main__":
    key = jax.random.PRNGKey(0)
    k_z, k_p = jax.random.split(key)

    B = 2
    z = jax.random.normal(k_z, (B, Z_DIM), dtype=jnp.float32)
    params = init_params(k_p)
    prep = prepare_params(params)        # one-time weight pad/cast (hoisted)

    img = generator_forward(z, prep)
    img = jax.block_until_ready(img)

    assert img.shape == (B, 1, 28, 28), img.shape
    assert img.dtype == jnp.float32
    # Tanh output must lie in [-1, 1]
    assert bool(jnp.all(jnp.abs(img) <= 1.0 + 1e-6))

    # Reference 1: original f32 math (module semantics); loose tol for bf16
    # weights/activations/output.
    def ref_forward_f32(z, params):
        h = z
        for i, (w, b) in enumerate(params):
            h = h @ w + b
            h = jnp.maximum(h, 0.0) if i < 3 else jnp.tanh(h)
        return h.reshape(z.shape[0], 1, 28, 28)

    ref32 = ref_forward_f32(z, params)
    assert bool(jnp.allclose(img, ref32, atol=6e-2, rtol=0.0)), \
        float(jnp.max(jnp.abs(img - ref32)))

    # Reference 2: plain-JAX with the same bf16 casts (incl. bf16 output) the
    # kernel uses; tighter tolerance.
    def ref_forward_matched(z, params):
        h = z.astype(jnp.bfloat16)
        for i, (w, b) in enumerate(params):
            acc = jnp.dot(h, w.astype(jnp.bfloat16),
                          preferred_element_type=jnp.float32)
            acc = acc + b.astype(jnp.bfloat16).astype(jnp.float32)
            if i < 3:
                h = jnp.maximum(acc, 0.0).astype(jnp.bfloat16)
            else:
                h = jnp.tanh(acc).astype(jnp.bfloat16).astype(jnp.float32)
        return h.reshape(z.shape[0], 1, 28, 28)

    refm = ref_forward_matched(z, params)
    assert bool(jnp.allclose(img, refm, atol=1e-2, rtol=0.0)), \
        float(jnp.max(jnp.abs(img - refm)))

    print("KERNEL_OK")
</pallas_src>

<mosaic_0001>
module attributes {stable_mosaic.version = 11 : i64} {
  func.func @_generator_kernel(%arg0: i32, %arg1: memref<16x128xbf16, #tpu.memory_space<vmem>>, %arg2: memref<128x256xbf16, #tpu.memory_space<vmem>>, %arg3: memref<1x256xbf16, #tpu.memory_space<vmem>>, %arg4: memref<256x512xbf16, #tpu.memory_space<vmem>>, %arg5: memref<1x512xbf16, #tpu.memory_space<vmem>>, %arg6: memref<512x1024xbf16, #tpu.memory_space<vmem>>, %arg7: memref<1x1024xbf16, #tpu.memory_space<vmem>>, %arg8: memref<1024x896xbf16, #tpu.memory_space<vmem>>, %arg9: memref<1x896xbf16, #tpu.memory_space<vmem>>, %arg10: memref<16x896xbf16, #tpu.memory_space<vmem>>) attributes {dimension_semantics = [#tpu.dimension_semantics<parallel>], iteration_bounds = array<i64: 1>, scalar_prefetch = 0 : i64, scratch_operands = 0 : i64, tpu.core_type = #tpu.core_type<tc>, window_params = [{transform_indices = @transform_0, window_bounds = array<i64: 16, 128>}, {pipeline_mode = #tpu.pipeline_mode<synchronous>, transform_indices = @transform_1, window_bounds = array<i64: 128, 256>}, {pipeline_mode = #tpu.pipeline_mode<synchronous>, transform_indices = @transform_2, window_bounds = array<i64: 1, 256>}, {pipeline_mode = #tpu.pipeline_mode<synchronous>, transform_indices = @transform_3, window_bounds = array<i64: 256, 512>}, {pipeline_mode = #tpu.pipeline_mode<synchronous>, transform_indices = @transform_4, window_bounds = array<i64: 1, 512>}, {pipeline_mode = #tpu.pipeline_mode<synchronous>, transform_indices = @transform_5, window_bounds = array<i64: 512, 1024>}, {pipeline_mode = #tpu.pipeline_mode<synchronous>, transform_indices = @transform_6, window_bounds = array<i64: 1, 1024>}, {pipeline_mode = #tpu.pipeline_mode<synchronous>, transform_indices = @transform_7, window_bounds = array<i64: 1024, 896>}, {pipeline_mode = #tpu.pipeline_mode<synchronous>, transform_indices = @transform_8, window_bounds = array<i64: 1, 896>}, {transform_indices = @transform_9, window_bounds = array<i64: 16, 896>}]} {
    %c0 = arith.constant 0 : index
    %c0_0 = arith.constant 0 : index
    %0 = vector.load %arg1[%c0, %c0_0] : memref<16x128xbf16, #tpu.memory_space<vmem>>, vector<16x128xbf16>
    %c0_1 = arith.constant 0 : index
    %c0_2 = arith.constant 0 : index
    %1 = vector.load %arg2[%c0_1, %c0_2] : memref<128x256xbf16, #tpu.memory_space<vmem>>, vector<128x256xbf16>
    %cst = arith.constant dense<0.000000e+00> : vector<16x256xf32>
    %2 = tpu.matmul %0, %1, %cst {dimension_numbers = #tpu.dot_dimension_numbers<[1], [0], [0], [1], [0, 0, 1, 1], [], []>} : vector<16x128xbf16>, vector<128x256xbf16>, vector<16x256xf32> -> vector<16x256xf32>
    %c0_3 = arith.constant 0 : index
    %c0_4 = arith.constant 0 : index
    %3 = vector.load %arg3[%c0_3, %c0_4] : memref<1x256xbf16, #tpu.memory_space<vmem>>, vector<1x256xbf16>
    %4 = arith.extf %3 : vector<1x256xbf16> to vector<1x256xf32>
    %5 = vector.broadcast %4 : vector<1x256xf32> to vector<16x256xf32>
    %6 = arith.addf %2, %5 : vector<16x256xf32>
    %cst_5 = arith.constant 0.000000e+00 : f32
    %7 = vector.broadcast %cst_5 : f32 to vector<16x256xf32>
    %8 = arith.maximumf %6, %7 : vector<16x256xf32>
    %9 = arith.truncf %8 : vector<16x256xf32> to vector<16x256xbf16>
    %c0_6 = arith.constant 0 : index
    %c0_7 = arith.constant 0 : index
    %10 = vector.load %arg4[%c0_6, %c0_7] : memref<256x512xbf16, #tpu.memory_space<vmem>>, vector<256x512xbf16>
    %cst_8 = arith.constant dense<0.000000e+00> : vector<16x512xf32>
    %11 = tpu.matmul %9, %10, %cst_8 {dimension_numbers = #tpu.dot_dimension_numbers<[1], [0], [0], [1], [0, 0, 1, 1], [], []>} : vector<16x256xbf16>, vector<256x512xbf16>, vector<16x512xf32> -> vector<16x512xf32>
    %c0_9 = arith.constant 0 : index
    %c0_10 = arith.constant 0 : index
    %12 = vector.load %arg5[%c0_9, %c0_10] : memref<1x512xbf16, #tpu.memory_space<vmem>>, vector<1x512xbf16>
    %13 = arith.extf %12 : vector<1x512xbf16> to vector<1x512xf32>
    %14 = vector.broadcast %13 : vector<1x512xf32> to vector<16x512xf32>
    %15 = arith.addf %11, %14 : vector<16x512xf32>
    %cst_11 = arith.constant 0.000000e+00 : f32
    %16 = vector.broadcast %cst_11 : f32 to vector<16x512xf32>
    %17 = arith.maximumf %15, %16 : vector<16x512xf32>
    %18 = arith.truncf %17 : vector<16x512xf32> to vector<16x512xbf16>
    %c0_12 = arith.constant 0 : index
    %c0_13 = arith.constant 0 : index
    %19 = vector.load %arg6[%c0_12, %c0_13] : memref<512x1024xbf16, #tpu.memory_space<vmem>>, vector<512x1024xbf16>
    %cst_14 = arith.constant dense<0.000000e+00> : vector<16x1024xf32>
    %20 = tpu.matmul %18, %19, %cst_14 {dimension_numbers = #tpu.dot_dimension_numbers<[1], [0], [0], [1], [0, 0, 1, 1], [], []>} : vector<16x512xbf16>, vector<512x1024xbf16>, vector<16x1024xf32> -> vector<16x1024xf32>
    %c0_15 = arith.constant 0 : index
    %c0_16 = arith.constant 0 : index
    %21 = vector.load %arg7[%c0_15, %c0_16] : memref<1x1024xbf16, #tpu.memory_space<vmem>>, vector<1x1024xbf16>
    %22 = arith.extf %21 : vector<1x1024xbf16> to vector<1x1024xf32>
    %23 = vector.broadcast %22 : vector<1x1024xf32> to vector<16x1024xf32>
    %24 = arith.addf %20, %23 : vector<16x1024xf32>
    %cst_17 = arith.constant 0.000000e+00 : f32
    %25 = vector.broadcast %cst_17 : f32 to vector<16x1024xf32>
    %26 = arith.maximumf %24, %25 : vector<16x1024xf32>
    %27 = arith.truncf %26 : vector<16x1024xf32> to vector<16x1024xbf16>
    %c0_18 = arith.constant 0 : index
    %c0_19 = arith.constant 0 : index
    %28 = vector.load %arg8[%c0_18, %c0_19] : memref<1024x896xbf16, #tpu.memory_space<vmem>>, vector<1024x896xbf16>
    %cst_20 = arith.constant dense<0.000000e+00> : vector<16x896xf32>
    %29 = tpu.matmul %27, %28, %cst_20 {dimension_numbers = #tpu.dot_dimension_numbers<[1], [0], [0], [1], [0, 0, 1, 1], [], []>} : vector<16x1024xbf16>, vector<1024x896xbf16>, vector<16x896xf32> -> vector<16x896xf32>
    %c0_21 = arith.constant 0 : index
    %c0_22 = arith.constant 0 : index
    %30 = vector.load %arg9[%c0_21, %c0_22] : memref<1x896xbf16, #tpu.memory_space<vmem>>, vector<1x896xbf16>
    %31 = arith.extf %30 : vector<1x896xbf16> to vector<1x896xf32>
    %32 = vector.broadcast %31 : vector<1x896xf32> to vector<16x896xf32>
    %33 = arith.addf %29, %32 : vector<16x896xf32>
    %34 = math.tanh %33 : vector<16x896xf32>
    %35 = arith.truncf %34 : vector<16x896xf32> to vector<16x896xbf16>
    %c0_23 = arith.constant 0 : index
    %c0_24 = arith.constant 0 : index
    %36 = vector.load %arg10[%c0_23, %c0_24] : memref<16x896xbf16, #tpu.memory_space<vmem>>, vector<16x896xbf16>
    tpu.vector_store %arg10[%c0_23, %c0_24], %35 {strides = array<i32>} : memref<16x896xbf16, #tpu.memory_space<vmem>>, vector<16x896xbf16>,
    return
  }
  func.func @transform_0(%arg0: i32) -> (i32, i32) {
    %c0_i32 = arith.constant 0 : i32
    %c0_i32_0 = arith.constant 0 : i32
    return %arg0, %c0_i32 : i32, i32
  }
  func.func @transform_1(%arg0: i32) -> (i32, i32) {
    %c0_i32 = arith.constant 0 : i32
    %c0_i32_0 = arith.constant 0 : i32
    %c0_i32_1 = arith.constant 0 : i32
    return %c0_i32, %c0_i32_0 : i32, i32
  }
  func.func @transform_2(%arg0: i32) -> (i32, i32) {
    %c0_i32 = arith.constant 0 : i32
    %c0_i32_0 = arith.constant 0 : i32
    %c0_i32_1 = arith.constant 0 : i32
    return %c0_i32, %c0_i32_0 : i32, i32
  }
  func.func @transform_3(%arg0: i32) -> (i32, i32) {
    %c0_i32 = arith.constant 0 : i32
    %c0_i32_0 = arith.constant 0 : i32
    %c0_i32_1 = arith.constant 0 : i32
    return %c0_i32, %c0_i32_0 : i32, i32
  }
  func.func @transform_4(%arg0: i32) -> (i32, i32) {
    %c0_i32 = arith.constant 0 : i32
    %c0_i32_0 = arith.constant 0 : i32
    %c0_i32_1 = arith.constant 0 : i32
    return %c0_i32, %c0_i32_0 : i32, i32
  }
  func.func @transform_5(%arg0: i32) -> (i32, i32) {
    %c0_i32 = arith.constant 0 : i32
    %c0_i32_0 = arith.constant 0 : i32
    %c0_i32_1 = arith.constant 0 : i32
    return %c0_i32, %c0_i32_0 : i32, i32
  }
  func.func @transform_6(%arg0: i32) -> (i32, i32) {
    %c0_i32 = arith.constant 0 : i32
    %c0_i32_0 = arith.constant 0 : i32
    %c0_i32_1 = arith.constant 0 : i32
    return %c0_i32, %c0_i32_0 : i32, i32
  }
  func.func @transform_7(%arg0: i32) -> (i32, i32) {
    %c0_i32 = arith.constant 0 : i32
    %c0_i32_0 = arith.constant 0 : i32
    %c0_i32_1 = arith.constant 0 : i32
    return %c0_i32, %c0_i32_0 : i32, i32
  }
  func.func @transform_8(%arg0: i32) -> (i32, i32) {
    %c0_i32 = arith.constant 0 : i32
    %c0_i32_0 = arith.constant 0 : i32
    %c0_i32_1 = arith.constant 0 : i32
    return %c0_i32, %c0_i32_0 : i32, i32
  }
  func.func @transform_9(%arg0: i32) -> (i32, i32) {
    %c0_i32 = arith.constant 0 : i32
    %c0_i32_0 = arith.constant 0 : i32
    return %arg0, %c0_i32 : i32, i32
  }
}

</mosaic_0001>

<bundles_post_ra>
// kernel: _forward_impl.1
= control target key start
LH: loop header
LB: loop body
LE: loop exit
PB: predicated region body
PF: predicated region fallthrough
CT: control target
= control target key end

     0   :  { %14 = vsyncpa [#allocation3], 0  ;;  %s8775_s0 = inlined_call_operand.vmem [shape: bf16[16,128], index: 0, kind: input, shape index: {}]   ;;  %s8776_s1 = inlined_call_operand.hbm [shape: bf16[128,256], index: 1, kind: input, shape index: {}]   ;;  %s8777_s2 = inlined_call_operand.hbm [shape: bf16[1,256], index: 2, kind: input, shape index: {}]   ;;  %s8778_s3 = inlined_call_operand.hbm [shape: bf16[256,512], index: 3, kind: input, shape index: {}]   ;;  %s8779_s4 = inlined_call_operand.hbm [shape: bf16[1,512], index: 4, kind: input, shape index: {}]   ;;  %s8780_s5 = inlined_call_operand.hbm [shape: bf16[512,1024], index: 5, kind: input, shape index: {}]   ;;  %s8781_s6 = inlined_call_operand.hbm [shape: bf16[1,1024], index: 6, kind: input, shape index: {}]   ;;  %s8782_s7 = inlined_call_operand.hbm [shape: bf16[1024,896], index: 7, kind: input, shape index: {}]   ;;  %s8783_s8 = inlined_call_operand.hbm [shape: bf16[1,896], index: 8, kind: input, shape index: {}]   ;;  %s8784_s9 = inlined_call_operand.vmem [shape: bf16[16,896], index: 9, kind: output, shape index: {}]  }
   0x1   :  { %15 = vsyncpa [#allocation5], 0 }
   0x2   :  { %16 = vsyncpa [#allocation8], 0 }
   0x3   :  { %17 = vsyncpa [#allocation11], 0 }
   0x4   :  { %18 = vsyncpa [#allocation14], 0  ;;  %s8410_s30 = smov [#allocation4]   ;;  %s8411_s11 = smov [#allocation7]  }
   0x5   :  { %s39_s10 = sshll.u32 %s8410_s30, 4  ;;  %s61_s12 = sshll.u32 %s8411_s11, 4  ;;  %s40_s10 = int_to_ptr.vmem [resolvable:$true] %s39_s10  ;;  %s62_s12 = int_to_ptr.vmem [resolvable:$true] %s61_s12 }
   0x6   :  { %s8224_s15 = scalar_lea.hbm %s8777_s2, 32 }
   0x7   :  { %p8225_p0 = scmp.ne.s32.totalorder %s8777_s2, %s8224_s15  ;;  %p8228_p1 = scmp.lt.u32.totalorder %s8224_s15, %s8777_s2 }
   0x9   :  { %p8230_p2 = pnand %p8228_p1, %p8225_p0 }
   0xb   :  { %8233 = shalt.err (!%p8230_p2)
}
   0xc   :  { %s8234_s20 = scalar_lea.vmem %s40_s10, 32  ;;  %p8239_p4 = scmp.lt.s32.totalorder %s40_s10, %s40_s10 }
   0xd   :  { %p8235_p3 = scmp.ne.s32.totalorder %s40_s10, %s8234_s20  ;;  %p8240_p5 = scmp.lt.s32.totalorder %s8234_s20, %s8234_s20 }
   0xf   :  { %p8241_p6 = por %p8240_p5, %p8239_p4 }
  0x11   :  { %p8242_p7 = pnand %p8241_p6, %p8235_p3 }
  0x13   :  { %8245 = shalt.err (!%p8242_p7)
}
  0x14   :  { %42 = dma.hbm_to_vmem [thread:$0]  %s8777_s2, 32, %s40_s10, [#allocation5]  }
  0x15   :  { %s8246_s25 = scalar_lea.hbm %s8779_s4, 64 }
  0x16   :  { %p8247_p8 = scmp.ne.s32.totalorder %s8779_s4, %s8246_s25  ;;  %p8250_p9 = scmp.lt.u32.totalorder %s8246_s25, %s8779_s4 }
  0x18   :  { %p8252_p10 = pnand %p8250_p9, %p8247_p8 }
  0x1a   :  { %8255 = shalt.err (!%p8252_p10)
}
  0x1b   :  { %s8256_s30 = scalar_lea.vmem %s62_s12, 64  ;;  %p8261_p12 = scmp.lt.s32.totalorder %s62_s12, %s62_s12 }
  0x1c   :  { %p8257_p11 = scmp.ne.s32.totalorder %s62_s12, %s8256_s30  ;;  %p8262_p13 = scmp.lt.s32.totalorder %s8256_s30, %s8256_s30 }
  0x1e   :  { %p8263_p0 = por %p8262_p13, %p8261_p12 }
  0x20   :  { %p8264_p1 = pnand %p8263_p0, %p8257_p11 }
  0x22   :  { %8267 = shalt.err (!%p8264_p1)
}
  0x23   :  { %64 = dma.hbm_to_vmem [thread:$0]  %s8779_s4, 64, %s62_s12, [#allocation8]  }
  0x24   :  { %s8412_s11 = smov [#allocation10]   ;;  %s8413_s14 = smov [#allocation2]  }
  0x25   :  { %s83_s13 = sshll.u32 %s8412_s11, 4  ;;  %s26_s15 = sshll.u32 %s8413_s14, 4  ;;  %s84_s13 = int_to_ptr.vmem [resolvable:$true] %s83_s13  ;;  %s8501_s15 = int_to_ptr.vmem [resolvable:$true] %s26_s15 }
  0x26   :  { %s8268_s18 = scalar_lea.hbm %s8781_s6, 128 }
  0x27   :  { %p8269_p2 = scmp.ne.s32.totalorder %s8781_s6, %s8268_s18  ;;  %p8272_p3 = scmp.lt.u32.totalorder %s8268_s18, %s8781_s6 }
  0x29   :  { %p8274_p4 = pnand %p8272_p3, %p8269_p2 }
  0x2b   :  { %8277 = shalt.err (!%p8274_p4)
}
  0x2c   :  { %s8278_s4 = scalar_lea.vmem %s84_s13, 128  ;;  %p8283_p6 = scmp.lt.s32.totalorder %s84_s13, %s84_s13 }
  0x2d   :  { %p8279_p5 = scmp.ne.s32.totalorder %s84_s13, %s8278_s4  ;;  %p8284_p7 = scmp.lt.s32.totalorder %s8278_s4, %s8278_s4 }
  0x2f   :  { %p8285_p8 = por %p8284_p7, %p8283_p6 }
  0x31   :  { %p8286_p9 = pnand %p8285_p8, %p8279_p5 }
  0x33   :  { %8289 = shalt.err (!%p8286_p9)
}
  0x34   :  { %86 = dma.hbm_to_vmem [thread:$0]  %s8781_s6, 128, %s84_s13, [#allocation11]  }
  0x35   :  { %s8290_s26 = scalar_lea.hbm %s8776_s1, 2048 }
  0x36   :  { %p8291_p10 = scmp.ne.s32.totalorder %s8776_s1, %s8290_s26  ;;  %p8294_p11 = scmp.lt.u32.totalorder %s8290_s26, %s8776_s1 }
  0x38   :  { %p8296_p12 = pnand %p8294_p11, %p8291_p10 }
  0x3a   :  { %8299 = shalt.err (!%p8296_p12)
}
  0x3b   :  { %s8300_s2 = scalar_lea.vmem %s8501_s15, 2048  ;;  %p8305_p0 = scmp.lt.s32.totalorder %s8501_s15, %s8501_s15 }
  0x3c   :  { %p8301_p13 = scmp.ne.s32.totalorder %s8501_s15, %s8300_s2  ;;  %p8306_p1 = scmp.lt.s32.totalorder %s8300_s2, %s8300_s2 }
  0x3e   :  { %p8307_p2 = por %p8306_p1, %p8305_p0 }
  0x40   :  { %p8308_p3 = pnand %p8307_p2, %p8301_p13 }
  0x42   :  { %8311 = shalt.err (!%p8308_p3)
}
  0x43   :  { %s8414_s6 = smov 128   ;;  %s8415_s10 = smov 8  }
  0x44   :  { %32 = dma.hbm_to_vmem [thread:$0]  %s8776_s1, 2048, %s8501_s15, [#allocation3], %s8414_s6, %s8414_s6, %s8415_s10  }
  0x45   :  { %s8416_s14 = smov [#allocation6]   ;;  %s8312_s19 = scalar_lea.hbm %s8778_s3, 8192 }
  0x46   :  { %s48_s16 = sshll.u32 %s8416_s14, 4  ;;  %p8313_p4 = scmp.ne.s32.totalorder %s8778_s3, %s8312_s19  ;;  %s49_s16 = int_to_ptr.vmem [resolvable:$true] %s48_s16 }
  0x47   :  { %p8316_p5 = scmp.lt.u32.totalorder %s8312_s19, %s8778_s3 }
  0x49   :  { %p8318_p6 = pnand %p8316_p5, %p8313_p4 }
  0x4b   :  { %8321 = shalt.err (!%p8318_p6)
}
  0x4c   :  { %s8322_s12 = scalar_lea.vmem %s49_s16, 8192  ;;  %p8327_p8 = scmp.lt.s32.totalorder %s49_s16, %s49_s16 }
  0x4d   :  { %p8323_p7 = scmp.ne.s32.totalorder %s49_s16, %s8322_s12  ;;  %p8328_p9 = scmp.lt.s32.totalorder %s8322_s12, %s8322_s12 }
  0x4f   :  { %p8329_p10 = por %p8328_p9, %p8327_p8 }
  0x51   :  { %p8330_p11 = pnand %p8329_p10, %p8323_p7 }
  0x53   :  { %8333 = shalt.err (!%p8330_p11)
}
  0x54   :  { %s8417_s1 = smov 256   ;;  %s8418_s15 = smov 16  }
  0x55   :  { %54 = dma.hbm_to_vmem [thread:$0]  %s8778_s3, 8192, %s49_s16, [#allocation5], %s8417_s1, %s8417_s1, %s8418_s15  }
  0x56   :  { %s8419_s25 = smov [#allocation9]   ;;  %s8334_s29 = scalar_lea.hbm %s8780_s5, 32768 }
  0x57   :  { %s70_s26 = sshll.u32 %s8419_s25, 4  ;;  %p8335_p12 = scmp.ne.s32.totalorder %s8780_s5, %s8334_s29  ;;  %s71_s26 = int_to_ptr.vmem [resolvable:$true] %s70_s26 }
  0x58   :  { %p8338_p13 = scmp.lt.u32.totalorder %s8334_s29, %s8780_s5 }
  0x5a   :  { %p8340_p0 = pnand %p8338_p13, %p8335_p12 }
  0x5c   :  { %8343 = shalt.err (!%p8340_p0)
}
  0x5d   :  { %s8344_s11 = scalar_lea.vmem %s71_s26, 32768  ;;  %p8349_p2 = scmp.lt.s32.totalorder %s71_s26, %s71_s26 }
  0x5e   :  { %p8345_p1 = scmp.ne.s32.totalorder %s71_s26, %s8344_s11  ;;  %p8350_p3 = scmp.lt.s32.totalorder %s8344_s11, %s8344_s11 }
  0x60   :  { %p8351_p4 = por %p8350_p3, %p8349_p2 }
  0x62   :  { %p8352_p5 = pnand %p8351_p4, %p8345_p1 }
  0x64   :  { %8355 = shalt.err (!%p8352_p5)
}
  0x65   :  { %s8420_s3 = smov 512   ;;  %s8421_s13 = smov 32  }
  0x66   :  { %76 = dma.hbm_to_vmem [thread:$0]  %s8780_s5, 32768, %s71_s26, [#allocation8], %s8420_s3, %s8420_s3, %s8421_s13  }
  0x67   :  { %s8422_s17 = smov [#allocation12]   ;;  %s8356_s21 = scalar_lea.hbm %s8782_s7, 57344 }
  0x68   :  { %s92_s18 = sshll.u32 %s8422_s17, 4  ;;  %p8357_p6 = scmp.ne.s32.totalorder %s8782_s7, %s8356_s21  ;;  %s93_s18 = int_to_ptr.vmem [resolvable:$true] %s92_s18 }
  0x69   :  { %p8360_p7 = scmp.lt.u32.totalorder %s8356_s21, %s8782_s7 }
  0x6b   :  { %p8362_p8 = pnand %p8360_p7, %p8357_p6 }
  0x6d   :  { %8365 = shalt.err (!%p8362_p8)
}
  0x6e   :  { %s8366_s15 = scalar_lea.vmem %s93_s18, 57344  ;;  %p8371_p10 = scmp.lt.s32.totalorder %s93_s18, %s93_s18 }
  0x6f   :  { %p8367_p9 = scmp.ne.s32.totalorder %s93_s18, %s8366_s15  ;;  %p8372_p11 = scmp.lt.s32.totalorder %s8366_s15, %s8366_s15 }
  0x71   :  { %p8373_p12 = por %p8372_p11, %p8371_p10 }
  0x73   :  { %p8374_p13 = pnand %p8373_p12, %p8367_p9 }
  0x75   :  { %8377 = shalt.err (!%p8374_p13)
}
  0x76   :  { %s8423_s5 = smov 448   ;;  %s8424_s23 = smov 28  }
  0x77   :  { %98 = dma.hbm_to_vmem [thread:$0]  %s8782_s7, 57344, %s93_s18, [#allocation11], %s8423_s5, %s8423_s5, %s8424_s23  }
  0x78   :  { %s8425_s26 = smov [#allocation13]   ;;  %s8378_s30 = scalar_lea.hbm %s8783_s8, 112 }
  0x79   :  { %s105_s27 = sshll.u32 %s8425_s26, 4  ;;  %p8379_p0 = scmp.ne.s32.totalorder %s8783_s8, %s8378_s30  ;;  %s106_s27 = int_to_ptr.vmem [resolvable:$true] %s105_s27 }
  0x7a   :  { %p8382_p1 = scmp.lt.u32.totalorder %s8378_s30, %s8783_s8 }
  0x7c   :  { %p8384_p2 = pnand %p8382_p1, %p8379_p0 }
  0x7e   :  { %8387 = shalt.err (!%p8384_p2)
}
  0x7f   :  { %s8388_s3 = scalar_lea.vmem %s106_s27, 112  ;;  %s8392_s7 = scalar_lea.vmem %s106_s27, 128 }
  0x80   :  { %p8389_p3 = scmp.ne.s32.totalorder %s106_s27, %s8388_s3  ;;  %p8393_p4 = scmp.lt.s32.totalorder %s106_s27, %s106_s27 }
  0x81   :  { %p8394_p5 = scmp.lt.s32.totalorder %s8392_s7, %s8388_s3 }
  0x83   :  { %p8395_p6 = por %p8394_p5, %p8393_p4 }
  0x85   :  { %p8396_p7 = pnand %p8395_p6, %p8389_p3 }
  0x87   :  { %8399 = shalt.err (!%p8396_p7)
}
  0x88   :  { %108 = dma.hbm_to_vmem [thread:$0]  %s8783_s8, 112, %s106_s27, [#allocation14]  }
  0x89   :  { %8400 = dma.done.wait [#allocation3], 2048  }
  0x8a   :  { %8401 = vsyncadd [#allocation3], 4294965248 }
  0x8b   :  { %8402 = dma.done.wait [#allocation5], 8224  }
  0x8c   :  { %8403 = vsyncadd [#allocation5], 4294959072 }
  0x8d   :  { %8404 = dma.done.wait [#allocation8], 32832  }
  0x8e   :  { %8405 = vsyncadd [#allocation8], 4294934464 }
  0x8f   :  { %8406 = dma.done.wait [#allocation11], 57472  }
  0x90   :  { %8407 = vsyncadd [#allocation11], 4294909824 }
  0x91   :  { %8408 = dma.done.wait [#allocation14], 112  }
  0x92   :  { %8409 = vsyncadd [#allocation14], 4294967184  ;;  %v8426_v0 = vmov 0   ;;  %v7435_v1 = vld [vmem:[#allocation2 + $0x4] ss:$8 sps:$4 sm:$0xff]  }
  0x93   :  { %291 = vmatprep.mubr.bf16.mxu0 %v8426_v0  ;;  %v7437_v2 = vld [vmem:[#allocation2] ss:$8 sps:$4 sm:$0xff]   ;;  %259 = vmatprep.subr.bf16.mxu0 %v7435_v1  ;;  %v7438_v3 = vld [vmem:[#allocation2 + $0x14] ss:$8 sps:$4 sm:$0xff]   ;;  %v7440_v4 = vld [vmem:[#allocation2 + $0x10] ss:$8 sps:$4 sm:$0xff]  }
  0x94   :  { %260 = vmatpush1.bf16.msra.mxu0 %v7437_v2  ;;  %v7441_v5 = vld [vmem:[#allocation2 + $0x24] ss:$8 sps:$4 sm:$0xff]   ;;  %v7443_v6 = vld [vmem:[#allocation2 + $0x20] ss:$8 sps:$4 sm:$0xff]   ;;  %v7444_v7 = vld [vmem:[#allocation2 + $0x34] ss:$8 sps:$4 sm:$0xff]  }
  0x95   :  { %261 = vmatprep.subr.bf16.mxu0 %v7438_v3  ;;  %v7446_v8 = vld [vmem:[#allocation2 + $0x30] ss:$8 sps:$4 sm:$0xff]   ;;  %v7447_v9 = vld [vmem:[#allocation2 + $0x44] ss:$8 sps:$4 sm:$0xff]   ;;  %v7449_v10 = vld [vmem:[#allocation2 + $0x40] ss:$8 sps:$4 sm:$0xff]  }
  0x96   :  { %v7450_v11 = vld [vmem:[#allocation2 + $0x54] ss:$8 sps:$4 sm:$0xff]   ;;  %v7452_v12 = vld [vmem:[#allocation2 + $0x50] ss:$8 sps:$4 sm:$0xff]   ;;  %v7453_v13 = vld [vmem:[#allocation2 + $0x64] ss:$8 sps:$4 sm:$0xff]  }
  0x97   :  { %v7455_v14 = vld [vmem:[#allocation2 + $0x60] ss:$8 sps:$4 sm:$0xff]   ;;  %v7456_v15 = vld [vmem:[#allocation2 + $0x74] ss:$8 sps:$4 sm:$0xff]   ;;  %v7458_v16 = vld [vmem:[#allocation2 + $0x70] ss:$8 sps:$4 sm:$0xff]  }
  0x98   :  { %262 = vmatpush1.bf16.msra.mxu0 %v7440_v4  ;;  %v7462_v17 = vld [vmem:[#allocation6 + $0x4] ss:$16 sps:$4 sm:$0xff]   ;;  %v7460_v19 = vld [vmem:[#allocation6] ss:$16 sps:$4 sm:$0xff]   ;;  %v7510_v50 = vld [vmem:[#allocation6 + $0xc] ss:$16 sps:$4 sm:$0xff]  }
  0x99   :  { %263 = vmatprep.subr.bf16.mxu0 %v7441_v5  ;;  %v7459_v18 = vld [vmem:[%s8775_s0] sm:$0xff]  }
  0x9a   :  { %v7465_v20 = vld [vmem:[#allocation6 + $0x24] ss:$16 sps:$4 sm:$0xff]   ;;  %v7463_v21 = vld [vmem:[#allocation6 + $0x20] ss:$16 sps:$4 sm:$0xff]  }
  0x9b   :  { %v7468_v22 = vld [vmem:[#allocation6 + $0x44] ss:$16 sps:$4 sm:$0xff]   ;;  %v7466_v23 = vld [vmem:[#allocation6 + $0x40] ss:$16 sps:$4 sm:$0xff]  }
  0x9c   :  { %264 = vmatpush1.bf16.msra.mxu0 %v7443_v6  ;;  %v7471_v24 = vld [vmem:[#allocation6 + $0x64] ss:$16 sps:$4 sm:$0xff]   ;;  %v7469_v25 = vld [vmem:[#allocation6 + $0x60] ss:$16 sps:$4 sm:$0xff]  }
  0x9d   :  { %265 = vmatprep.subr.bf16.mxu0 %v7444_v7  ;;  %v7474_v26 = vld [vmem:[#allocation6 + $0x84] ss:$16 sps:$4 sm:$0xff]   ;;  %v7472_v27 = vld [vmem:[#allocation6 + $0x80] ss:$16 sps:$4 sm:$0xff]  }
  0x9e   :  { %v7477_v28 = vld [vmem:[#allocation6 + $0xa4] ss:$16 sps:$4 sm:$0xff]   ;;  %v7475_v29 = vld [vmem:[#allocation6 + $0xa0] ss:$16 sps:$4 sm:$0xff]  }
  0x9f   :  { %v7480_v30 = vld [vmem:[#allocation6 + $0xc4] ss:$16 sps:$4 sm:$0xff]   ;;  %v7478_v31 = vld [vmem:[#allocation6 + $0xc0] ss:$16 sps:$4 sm:$0xff]  }
  0xa0   :  { %266 = vmatpush1.bf16.msra.mxu0 %v7446_v8  ;;  %v7483_v32 = vld [vmem:[#allocation6 + $0xe4] ss:$16 sps:$4 sm:$0xff]   ;;  %v7481_v33 = vld [vmem:[#allocation6 + $0xe0] ss:$16 sps:$4 sm:$0xff]  }
  0xa1   :  { %267 = vmatprep.subr.bf16.mxu0 %v7447_v9  ;;  %v7486_v34 = vld [vmem:[#allocation6 + $0x104] ss:$16 sps:$4 sm:$0xff]   ;;  %v7484_v35 = vld [vmem:[#allocation6 + $0x100] ss:$16 sps:$4 sm:$0xff]  }
  0xa2   :  { %v7489_v36 = vld [vmem:[#allocation6 + $0x124] ss:$16 sps:$4 sm:$0xff]   ;;  %v7487_v37 = vld [vmem:[#allocation6 + $0x120] ss:$16 sps:$4 sm:$0xff]  }
  0xa3   :  { %v7492_v38 = vld [vmem:[#allocation6 + $0x144] ss:$16 sps:$4 sm:$0xff]   ;;  %v7490_v39 = vld [vmem:[#allocation6 + $0x140] ss:$16 sps:$4 sm:$0xff]  }
  0xa4   :  { %268 = vmatpush1.bf16.msra.mxu0 %v7449_v10  ;;  %v7495_v40 = vld [vmem:[#allocation6 + $0x164] ss:$16 sps:$4 sm:$0xff]   ;;  %v7493_v41 = vld [vmem:[#allocation6 + $0x160] ss:$16 sps:$4 sm:$0xff]  }
  0xa5   :  { %269 = vmatprep.subr.bf16.mxu0 %v7450_v11  ;;  %v7498_v42 = vld [vmem:[#allocation6 + $0x184] ss:$16 sps:$4 sm:$0xff]   ;;  %v7496_v43 = vld [vmem:[#allocation6 + $0x180] ss:$16 sps:$4 sm:$0xff]  }
  0xa6   :  { %v7501_v44 = vld [vmem:[#allocation6 + $0x1a4] ss:$16 sps:$4 sm:$0xff]   ;;  %v7499_v45 = vld [vmem:[#allocation6 + $0x1a0] ss:$16 sps:$4 sm:$0xff]  }
  0xa7   :  { %v7504_v46 = vld [vmem:[#allocation6 + $0x1c4] ss:$16 sps:$4 sm:$0xff]   ;;  %v7502_v47 = vld [vmem:[#allocation6 + $0x1c0] ss:$16 sps:$4 sm:$0xff]  }
  0xa8   :  { %270 = vmatpush1.bf16.msra.mxu0 %v7452_v12  ;;  %v7507_v48 = vld [vmem:[#allocation6 + $0x1e4] ss:$16 sps:$4 sm:$0xff]   ;;  %v7505_v49 = vld [vmem:[#allocation6 + $0x1e0] ss:$16 sps:$4 sm:$0xff]  }
  0xa9   :  { %271 = vmatprep.subr.bf16.mxu0 %v7453_v13  ;;  %v829_v51 = vld [vmem:[#allocation9] sm:$0xff] }
  0xaa   :  { %v833_v52 = vld [vmem:[#allocation9 + $0x20] sm:$0xff] }
  0xab   :  { %v6531_v53 = vcombine.high %v829_v51, %v833_v52  ;;  %v6530_v54 = vcombine.low %v829_v51, %v833_v52  ;;  %v837_v55 = vld [vmem:[#allocation9 + $0x40] sm:$0xff] }
  0xac   :  { %272 = vmatpush1.bf16.msra.mxu0 %v7455_v14  ;;  %v841_v56 = vld [vmem:[#allocation9 + $0x60] sm:$0xff] }
  0xad   :  { %273 = vmatprep.subr.bf16.mxu0 %v7456_v15  ;;  %v6539_v57 = vcombine.high %v837_v55, %v841_v56  ;;  %2442 = vmatprep.subr.bf16.mxu1 %v6531_v53  ;;  %v6538_v58 = vcombine.low %v837_v55, %v841_v56  ;;  %v845_v59 = vld [vmem:[#allocation9 + $0x80] sm:$0xff] }
  0xae   :  { %2443 = vmatpush1.bf16.msra.mxu1 %v6530_v54  ;;  %v849_v60 = vld [vmem:[#allocation9 + $0xa0] sm:$0xff] }
  0xaf   :  { %2444 = vmatprep.subr.bf16.mxu1 %v6539_v57  ;;  %v6547_v61 = vcombine.high %v845_v59, %v849_v60  ;;  %v6546_v62 = vcombine.low %v845_v59, %v849_v60  ;;  %v853_v63 = vld [vmem:[#allocation9 + $0xc0] sm:$0xff] }
  0xb0   :  { %274 = vmatpush1.bf16.msra.mxu0 %v7458_v16  ;;  %v857_v0 = vld [vmem:[#allocation9 + $0xe0] sm:$0xff] }
  0xb1   :  { %731 = vmatprep.subr.bf16.mxu0 %v7462_v17  ;;  %v6555_v1 = vcombine.high %v853_v63, %v857_v0  ;;  %v6554_v2 = vcombine.low %v853_v63, %v857_v0  ;;  %v861_v3 = vld [vmem:[#allocation9 + $0x100] sm:$0xff] }
  0xb2   :  { %2445 = vmatpush1.bf16.msra.mxu1 %v6538_v58  ;;  %v865_v4 = vld [vmem:[#allocation9 + $0x120] sm:$0xff] }
  0xb3   :  { %292 = vmatmul.mubr.bf16.vlgmr.msra.gmra.mrb[0].mxu0 %v7459_v18  ;;  %2446 = vmatprep.subr.bf16.mxu1 %v6547_v61  ;;  %v6563_v5 = vcombine.high %v861_v3, %v865_v4  ;;  %v6562_v6 = vcombine.low %v861_v3, %v865_v4  ;;  %v869_v7 = vld [vmem:[#allocation9 + $0x140] sm:$0xff]  ;;  %v7513_v4 = vld [vmem:[#allocation6 + $0x2c] ss:$16 sps:$4 sm:$0xff]  }
  0xb4   :  { %732 = vmatpush1.bf16.msra.mxu0 %v7460_v19  ;;  %v873_v8 = vld [vmem:[#allocation9 + $0x160] sm:$0xff] }
  0xb5   :  { %733 = vmatprep.subr.bf16.mxu0 %v7465_v20  ;;  %v6571_v9 = vcombine.high %v869_v7, %v873_v8  ;;  %v6570_v10 = vcombine.low %v869_v7, %v873_v8  ;;  %v877_v11 = vld [vmem:[#allocation9 + $0x180] sm:$0xff]  ;;  %v7519_v8 = vld [vmem:[#allocation6 + $0x6c] ss:$16 sps:$4 sm:$0xff]  }
  0xb6   :  { %2447 = vmatpush1.bf16.msra.mxu1 %v6546_v62  ;;  %v881_v12 = vld [vmem:[#allocation9 + $0x1a0] sm:$0xff] }
  0xb7   :  { %2448 = vmatprep.subr.bf16.mxu1 %v6555_v1  ;;  %v6579_v13 = vcombine.high %v877_v11, %v881_v12  ;;  %v6578_v14 = vcombine.low %v877_v11, %v881_v12  ;;  %v885_v15 = vld [vmem:[#allocation9 + $0x1c0] sm:$0xff]  ;;  %v7525_v12 = vld [vmem:[#allocation6 + $0xac] ss:$16 sps:$4 sm:$0xff]  }
  0xb8   :  { %734 = vmatpush1.bf16.msra.mxu0 %v7463_v21  ;;  %v889_v16 = vld [vmem:[#allocation9 + $0x1e0] sm:$0xff] }
  0xb9   :  { %735 = vmatprep.subr.bf16.mxu0 %v7468_v22  ;;  %v6587_v17 = vcombine.high %v885_v15, %v889_v16  ;;  %v6586_v18 = vcombine.low %v885_v15, %v889_v16  ;;  %v893_v19 = vld [vmem:[#allocation9 + $0x200] sm:$0xff]  ;;  %v7531_v16 = vld [vmem:[#allocation6 + $0xec] ss:$16 sps:$4 sm:$0xff]  }
  0xba   :  { %2449 = vmatpush1.bf16.msra.mxu1 %v6554_v2  ;;  %v897_v20 = vld [vmem:[#allocation9 + $0x220] sm:$0xff] }
  0xbb   :  { %2450 = vmatprep.subr.bf16.mxu1 %v6563_v5  ;;  %v6595_v21 = vcombine.high %v893_v19, %v897_v20  ;;  %v6594_v22 = vcombine.low %v893_v19, %v897_v20  ;;  %v7508_v3 = vld [vmem:[#allocation6 + $0x8] ss:$16 sps:$4 sm:$0xff]   ;;  %v7537_v20 = vld [vmem:[#allocation6 + $0x12c] ss:$16 sps:$4 sm:$0xff]  }
  0xbc   :  { %736 = vmatpush1.bf16.msra.mxu0 %v7466_v23  ;;  %v901_v23 = vld [vmem:[#allocation9 + $0x240] sm:$0xff] }
  0xbd   :  { %737 = vmatprep.subr.bf16.mxu0 %v7471_v24  ;;  %v905_v24 = vld [vmem:[#allocation9 + $0x260] sm:$0xff] }
  0xbe   :  { %2451 = vmatpush1.bf16.msra.mxu1 %v6562_v6  ;;  %v7511_v5 = vld [vmem:[#allocation6 + $0x28] ss:$16 sps:$4 sm:$0xff]   ;;  %v7516_v6 = vld [vmem:[#allocation6 + $0x4c] ss:$16 sps:$4 sm:$0xff]  }
  0xbf   :  { %2452 = vmatprep.subr.bf16.mxu1 %v6571_v9  ;;  %v7514_v7 = vld [vmem:[#allocation6 + $0x48] ss:$16 sps:$4 sm:$0xff]  }
  0xc0   :  { %738 = vmatpush1.bf16.msra.mxu0 %v7469_v25  ;;  %v155_v25 = vlaneseq  ;;  %v7517_v9 = vld [vmem:[#allocation6 + $0x68] ss:$16 sps:$4 sm:$0xff]  }
  0xc1   :  { %739 = vmatprep.subr.bf16.mxu0 %v7474_v26  ;;  %v6603_v26 = vcombine.high %v901_v23, %v905_v24  ;;  %v7520_v11 = vld [vmem:[#allocation6 + $0x88] ss:$16 sps:$4 sm:$0xff]  }
  0xc2   :  { %2453 = vmatpush1.bf16.msra.mxu1 %v6570_v10  ;;  %v7522_v10 = vld [vmem:[#allocation6 + $0x8c] ss:$16 sps:$4 sm:$0xff]   ;;  %v7526_v15 = vld [vmem:[#allocation6 + $0xc8] ss:$16 sps:$4 sm:$0xff]  }
  0xc3   :  { %2454 = vmatprep.subr.bf16.mxu1 %v6579_v13  ;;  %v7523_v13 = vld [vmem:[#allocation6 + $0xa8] ss:$16 sps:$4 sm:$0xff]  }
  0xc4   :  { %740 = vmatpush1.bf16.msra.mxu0 %v7472_v27  ;;  %v6602_v27 = vcombine.low %v901_v23, %v905_v24  ;;  %v7532_v19 = vld [vmem:[#allocation6 + $0x108] ss:$16 sps:$4 sm:$0xff]   ;;  %v7543_v24 = vld [vmem:[#allocation6 + $0x16c] ss:$16 sps:$4 sm:$0xff]  }
  0xc5   :  { %741 = vmatprep.subr.bf16.mxu0 %v7477_v28  ;;  %v909_v28 = vld [vmem:[#allocation9 + $0x280] sm:$0xff] }
  0xc6   :  { %2455 = vmatpush1.bf16.msra.mxu1 %v6578_v14  ;;  %v7528_v14 = vld [vmem:[#allocation6 + $0xcc] ss:$16 sps:$4 sm:$0xff]   ;;  %v7538_v23 = vld [vmem:[#allocation6 + $0x148] ss:$16 sps:$4 sm:$0xff]  }
  0xc7   :  { %2456 = vmatprep.subr.bf16.mxu1 %v6587_v17  ;;  %v7529_v17 = vld [vmem:[#allocation6 + $0xe8] ss:$16 sps:$4 sm:$0xff]  }
  0xc8   :  { %742 = vmatpush1.bf16.msra.mxu0 %v7475_v29  ;;  %v913_v29 = vld [vmem:[#allocation9 + $0x2a0] sm:$0xff] }
  0xc9   :  { %743 = vmatprep.subr.bf16.mxu0 %v7480_v30  ;;  %v152_v30 = vld [vmem:[#allocation4] sm:$0x3] }
  0xca   :  { %2457 = vmatpush1.bf16.msra.mxu1 %v6586_v18  ;;  %v7534_v18 = vld [vmem:[#allocation6 + $0x10c] ss:$16 sps:$4 sm:$0xff]  }
  0xcb   :  { %2458 = vmatprep.subr.bf16.mxu1 %v6595_v21  ;;  %v7535_v21 = vld [vmem:[#allocation6 + $0x128] ss:$16 sps:$4 sm:$0xff]  }
  0xcc   :  { %744 = vmatpush1.bf16.msra.mxu0 %v7478_v31  ;;  %v8583_v31 = vshrl.u32 %v155_v25, 7  ;;  %v7541_v25 = vld [vmem:[#allocation6 + $0x168] ss:$16 sps:$4 sm:$0xff]  }
  0xcd   :  { %745 = vmatprep.subr.bf16.mxu0 %v7483_v32  ;;  %v6611_v32 = vcombine.high %v909_v28, %v913_v29 }
  0xce   :  { %2459 = vmatpush1.bf16.msra.mxu1 %v6594_v22  ;;  %v7540_v22 = vld [vmem:[#allocation6 + $0x14c] ss:$16 sps:$4 sm:$0xff]  }
  0xcf   :  { %2460 = vmatprep.subr.bf16.mxu1 %v6603_v26  ;;  %v7546_v26 = vld [vmem:[#allocation6 + $0x18c] ss:$16 sps:$4 sm:$0xff]  }
  0xd0   :  { %746 = vmatpush1.bf16.msra.mxu0 %v7481_v33  ;;  %v6610_v33 = vcombine.low %v909_v28, %v913_v29  ;;  %v7549_v28 = vld [vmem:[#allocation6 + $0x1ac] ss:$16 sps:$4 sm:$0xff]   ;;  %v7547_v29 = vld [vmem:[#allocation6 + $0x1a8] ss:$16 sps:$4 sm:$0xff]  }
  0xd1   :  { %747 = vmatprep.subr.bf16.mxu0 %v7486_v34  ;;  %v917_v34 = vld [vmem:[#allocation9 + $0x2c0] sm:$0xff] }
  0xd2   :  { %2461 = vmatpush1.bf16.msra.mxu1 %v6602_v27  ;;  %v7544_v27 = vld [vmem:[#allocation6 + $0x188] ss:$16 sps:$4 sm:$0xff]  }
  0xd3   :  { %2462 = vmatprep.subr.bf16.mxu1 %v6611_v32  ;;  %v7550_v32 = vld [vmem:[#allocation6 + $0x1c8] ss:$16 sps:$4 sm:$0xff]  }
  0xd4   :  { %748 = vmatpush1.bf16.msra.mxu0 %v7484_v35  ;;  %v921_v35 = vld [vmem:[#allocation9 + $0x2e0] sm:$0xff] }
  0xd5   :  { %749 = vmatprep.subr.bf16.mxu0 %v7489_v36  ;;  %v153_v36 = vunpack.c.l.bf16 %v152_v30  ;;  %v7552_v30 = vld [vmem:[#allocation6 + $0x1cc] ss:$16 sps:$4 sm:$0xff]  }
  0xd6   :  { %2463 = vmatpush1.bf16.msra.mxu1 %v6610_v33  ;;  %v7555_v33 = vld [vmem:[#allocation6 + $0x1ec] ss:$16 sps:$4 sm:$0xff]  }
  0xd8   :  { %750 = vmatpush1.bf16.msra.mxu0 %v7487_v37  ;;  %v8586_v37 = vsub.s32 0, %v8583_v31 }
  0xd9   :  { %751 = vmatprep.subr.bf16.mxu0 %v7492_v38  ;;  %v6619_v38 = vcombine.high %v917_v34, %v921_v35 }
  0xdb   :  { %2464 = vmatprep.subr.bf16.mxu1 %v6619_v38 }
  0xdc   :  { %752 = vmatpush1.bf16.msra.mxu0 %v7490_v39  ;;  %v8589_v39 = vsub.s32 2, %v8583_v31 }
  0xdd   :  { %753 = vmatprep.subr.bf16.mxu0 %v7495_v40  ;;  %v6618_v40 = vcombine.low %v917_v34, %v921_v35  ;;  %v830_v34 = vld [vmem:[#allocation9 + $0x8] sm:$0xff] }
  0xde   :  { %v834_v35 = vld [vmem:[#allocation9 + $0x28] sm:$0xff] }
  0xdf   :  { %2465 = vmatpush1.bf16.msra.mxu1 %v6618_v40  ;;  %v6533_v38 = vcombine.high %v830_v34, %v834_v35  ;;  %v838_v40 = vld [vmem:[#allocation9 + $0x48] sm:$0xff] }
  0xe0   :  { %754 = vmatpush1.bf16.msra.mxu0 %v7493_v41  ;;  %v925_v41 = vld [vmem:[#allocation9 + $0x300] sm:$0xff] }
  0xe1   :  { %755 = vmatprep.subr.bf16.mxu0 %v7498_v42  ;;  %v929_v42 = vld [vmem:[#allocation9 + $0x320] sm:$0xff] }
  0xe4   :  { %756 = vmatpush1.bf16.msra.mxu0 %v7496_v43  ;;  %v158_v43 = vrot.slane %v153_v36, %v8586_v37 }
  0xe5   :  { %757 = vmatprep.subr.bf16.mxu0 %v7501_v44  ;;  %v6627_v44 = vcombine.high %v925_v41, %v929_v42 }
  0xe7   :  { %2466 = vmatprep.subr.bf16.mxu1 %v6627_v44  ;;  %v846_v44 = vld [vmem:[#allocation9 + $0x88] sm:$0xff] }
  0xe8   :  { %758 = vmatpush1.bf16.msra.mxu0 %v7499_v45  ;;  %v162_v45 = vrot.slane %v153_v36, %v8589_v39  ;;  %v7553_v36 = vld [vmem:[#allocation6 + $0x1e8] ss:$16 sps:$4 sm:$0xff]  }
  0xe9   :  { %759 = vmatprep.subr.bf16.mxu0 %v7504_v46  ;;  %v6626_v46 = vcombine.low %v925_v41, %v929_v42  ;;  %v842_v41 = vld [vmem:[#allocation9 + $0x68] sm:$0xff]  ;;  %v6532_v42 = vcombine.low %v830_v34, %v834_v35 }
  0xea   :  { %v172_v51 = vrot.slane %v162_v45, %v8586_v37  ;;  %v850_v45 = vld [vmem:[#allocation9 + $0xa8] sm:$0xff] }
  0xeb   :  { %2467 = vmatpush1.bf16.msra.mxu1 %v6626_v46  ;;  %v6540_v46 = vcombine.low %v838_v40, %v842_v41 }
  0xec   :  { %760 = vmatpush1.bf16.msra.mxu0 %v7502_v47  ;;  %v933_v47 = vld [vmem:[#allocation9 + $0x340] sm:$0xff] }
  0xed   :  { %761 = vmatprep.subr.bf16.mxu0 %v7507_v48  ;;  %v937_v48 = vld [vmem:[#allocation9 + $0x360] sm:$0xff] }
  0xee   :  { %v6634_v52 = vcombine.low %v933_v47, %v937_v48 }
  0xf0   :  { %762 = vmatpush1.bf16.msra.mxu0 %v7505_v49  ;;  %v168_v49 = vrot.slane %v158_v43, %v8586_v37  ;;  %v6541_v43 = vcombine.high %v838_v40, %v842_v41 }
  0xf1   :  { %774 = vmatprep.subr.bf16.mxu0 %v7510_v50  ;;  %v6635_v50 = vcombine.high %v933_v47, %v937_v48  ;;  %v6549_v47 = vcombine.high %v846_v44, %v850_v45  ;;  %v854_v48 = vld [vmem:[#allocation9 + $0xc8] sm:$0xff] }
  0xf3   :  { %2468 = vmatprep.subr.bf16.mxu1 %v6635_v50  ;;  %v6548_v50 = vcombine.low %v846_v44, %v850_v45 }
  0xf4   :  { %2469 = vmatpush1.bf16.msra.mxu1 %v6634_v52  ;;  %v862_v52 = vld [vmem:[#allocation9 + $0x108] sm:$0xff] }
 0x186   :  { %v293_v53 = vpop.f32.mrb[0].mxu0 }
 0x187   :  { %v294_v54 = vadd.f32 %v293_v53, %v168_v49  ;;  %v295_v55 = vpop.f32.mrb[1].mxu0  ;;  %v866_v53 = vld [vmem:[#allocation9 + $0x128] sm:$0xff] }
 0x188   :  { %v296_v56 = vadd.f32 %v295_v55, %v172_v51  ;;  %v297_v57 = vpop.f32.mrb[2].mxu0  ;;  %v6565_v55 = vcombine.high %v862_v52, %v866_v53 }
 0x189   :  { %v298_v58 = vadd.f32 %v297_v57, %v168_v49  ;;  %v299_v59 = vpop.f32.mrb[3].mxu0  ;;  %v302_v61 = vmax.f32 %v294_v54, 0.0  ;;  %v858_v49 = vld [vmem:[#allocation9 + $0xe8] sm:$0xff] }
 0x18a   :  { %v300_v60 = vadd.f32 %v299_v59, %v172_v51  ;;  %v303_v63 = vmax.f32 %v296_v56, 0.0  ;;  %v6557_v51 = vcombine.high %v854_v48, %v858_v49  ;;  %v6556_v54 = vcombine.low %v854_v48, %v858_v49  ;;  %v870_v56 = vld [vmem:[#allocation9 + $0x148] sm:$0xff] }
 0x18b   :  { %v304_v62 = vmax.f32 %v298_v58, 0.0  ;;  %v874_v57 = vld [vmem:[#allocation9 + $0x168] sm:$0xff]  ;;  %v6564_v58 = vcombine.low %v862_v52, %v866_v53 }
 0x18c   :  { %v305_v0 = vmax.f32 %v300_v60, 0.0  ;;  %v6573_v59 = vcombine.high %v870_v56, %v874_v57  ;;  %v878_v60 = vld [vmem:[#allocation9 + $0x188] sm:$0xff] }
 0x18d   :  { %v8595_v1 = vpack.c.bf16 %v304_v62, %v302_v61  ;;  %v882_v61 = vld [vmem:[#allocation9 + $0x1a8] sm:$0xff]  ;;  %v6572_v62 = vcombine.low %v870_v56, %v874_v57  ;;  %v372_v56 = vld [vmem:[#allocation7] sm:$0xf] }
 0x18e   :  { %v307_v2 = vpack.c.bf16 %v305_v0, %v303_v63  ;;  %v6581_v63 = vcombine.high %v878_v60, %v882_v61  ;;  %v886_v0 = vld [vmem:[#allocation9 + $0x1c8] sm:$0xff]  ;;  %v8615_v57 = vunpack.c.l.bf16 %v372_v56 }
 0x18f   :  { %v1010_v56 = vld [vmem:[#allocation9 + $0x5a8] sm:$0xff] }
 0x190   :  { %763 = vmatprep.mubr.bf16.mxu0 %v307_v2 }
 0x191   :  { %764 = vmatmul.mubr.bf16.vlgmr.msra.gmra.mrb[4].mxu0 %v8595_v1 }
 0x192   :  { %775 = vmatpush1.bf16.msra.mxu0 %v7508_v3  ;;  %806 = vmatprep.mubr.bf16.mxu0 %v307_v2  ;;  %v941_v2 = vld [vmem:[#allocation9 + $0x380] sm:$0xff] }
 0x193   :  { %776 = vmatprep.subr.bf16.mxu0 %v7513_v4  ;;  %v945_v3 = vld [vmem:[#allocation9 + $0x3a0] sm:$0xff] }
 0x194   :  { %v6643_v4 = vcombine.high %v941_v2, %v945_v3 }
 0x196   :  { %777 = vmatpush1.bf16.msra.mxu0 %v7511_v5  ;;  %v6580_v5 = vcombine.low %v878_v60, %v882_v61  ;;  %2470 = vmatprep.subr.bf16.mxu1 %v6643_v4 }
 0x197   :  { %778 = vmatprep.subr.bf16.mxu0 %v7516_v6  ;;  %v6642_v6 = vcombine.low %v941_v2, %v945_v3 }
 0x199   :  { %2471 = vmatpush1.bf16.msra.mxu1 %v6642_v6 }
 0x19a   :  { %779 = vmatpush1.bf16.msra.mxu0 %v7514_v7 }
 0x19b   :  { %780 = vmatprep.subr.bf16.mxu0 %v7519_v8  ;;  %v894_v8 = vld [vmem:[#allocation9 + $0x208] sm:$0xff] }
 0x19e   :  { %781 = vmatpush1.bf16.msra.mxu0 %v7517_v9  ;;  %v898_v9 = vld [vmem:[#allocation9 + $0x228] sm:$0xff] }
 0x19f   :  { %782 = vmatprep.subr.bf16.mxu0 %v7522_v10  ;;  %v949_v10 = vld [vmem:[#allocation9 + $0x3c0] sm:$0xff] }
 0x1a2   :  { %783 = vmatpush1.bf16.msra.mxu0 %v7520_v11  ;;  %v953_v11 = vld [vmem:[#allocation9 + $0x3e0] sm:$0xff] }
 0x1a3   :  { %784 = vmatprep.subr.bf16.mxu0 %v7525_v12  ;;  %v6651_v12 = vcombine.high %v949_v10, %v953_v11 }
 0x1a5   :  { %2472 = vmatprep.subr.bf16.mxu1 %v6651_v12  ;;  %v966_v12 = vld [vmem:[#allocation9 + $0x448] sm:$0xff] }
 0x1a6   :  { %785 = vmatpush1.bf16.msra.mxu0 %v7523_v13 }
 0x1a7   :  { %786 = vmatprep.subr.bf16.mxu0 %v7528_v14  ;;  %v6650_v14 = vcombine.low %v949_v10, %v953_v11  ;;  %v969_v11 = vld [vmem:[#allocation9 + $0x460] sm:$0xff] }
 0x1a9   :  { %2473 = vmatpush1.bf16.msra.mxu1 %v6650_v14 }
 0x1aa   :  { %787 = vmatpush1.bf16.msra.mxu0 %v7526_v15  ;;  %v6597_v15 = vcombine.high %v894_v8, %v898_v9 }
 0x1ab   :  { %788 = vmatprep.subr.bf16.mxu0 %v7531_v16  ;;  %v902_v16 = vld [vmem:[#allocation9 + $0x248] sm:$0xff] }
 0x1ae   :  { %789 = vmatpush1.bf16.msra.mxu0 %v7529_v17  ;;  %v906_v17 = vld [vmem:[#allocation9 + $0x268] sm:$0xff] }
 0x1af   :  { %790 = vmatprep.subr.bf16.mxu0 %v7534_v18  ;;  %v8599_v18 = vld [vmem:[#allocation9 + $0x400] sm:$0xff] }
 0x1b2   :  { %791 = vmatpush1.bf16.msra.mxu0 %v7532_v19  ;;  %v8601_v19 = vld [vmem:[#allocation9 + $0x420] sm:$0xff] }
 0x1b3   :  { %792 = vmatprep.subr.bf16.mxu0 %v7537_v20  ;;  %v8603_v20 = vld [vmem:[#allocation9 + $0x408] sm:$0xff] }
 0x1b6   :  { %793 = vmatpush1.bf16.msra.mxu0 %v7535_v21  ;;  %v6659_v21 = vcombine.high %v8599_v18, %v8601_v19 }
 0x1b7   :  { %794 = vmatprep.subr.bf16.mxu0 %v7540_v22  ;;  %v8607_v22 = vld [vmem:[#allocation9 + $0x428] sm:$0xff] }
 0x1b8   :  { %2485 = vmatprep.subr.bf16.mxu1 %v6659_v21  ;;  %v973_v21 = vld [vmem:[#allocation9 + $0x480] sm:$0xff] }
 0x1ba   :  { %795 = vmatpush1.bf16.msra.mxu0 %v7538_v23  ;;  %v6596_v23 = vcombine.low %v894_v8, %v898_v9  ;;  %v965_v8 = vld [vmem:[#allocation9 + $0x440] sm:$0xff] }
 0x1bb   :  { %796 = vmatprep.subr.bf16.mxu0 %v7543_v24  ;;  %v6658_v24 = vcombine.low %v8599_v18, %v8601_v19 }
 0x1be   :  { %797 = vmatpush1.bf16.msra.mxu0 %v7541_v25  ;;  %v6660_v25 = vcombine.low %v8603_v20, %v8607_v22 }
 0x1bf   :  { %798 = vmatprep.subr.bf16.mxu0 %v7546_v26  ;;  %v6605_v26 = vcombine.high %v902_v16, %v906_v17 }
 0x1c2   :  { %799 = vmatpush1.bf16.msra.mxu0 %v7544_v27  ;;  %v910_v27 = vld [vmem:[#allocation9 + $0x288] sm:$0xff] }
 0x1c3   :  { %800 = vmatprep.subr.bf16.mxu0 %v7549_v28  ;;  %v914_v28 = vld [vmem:[#allocation9 + $0x2a8] sm:$0xff] }
 0x1c4   :  { %v6612_v34 = vcombine.low %v910_v27, %v914_v28 }
 0x1c6   :  { %801 = vmatpush1.bf16.msra.mxu0 %v7547_v29  ;;  %v6604_v29 = vcombine.low %v902_v16, %v906_v17  ;;  %v6667_v16 = vcombine.high %v965_v8, %v969_v11 }
 0x1c7   :  { %802 = vmatprep.subr.bf16.mxu0 %v7552_v30  ;;  %v6613_v30 = vcombine.high %v910_v27, %v914_v28  ;;  %v978_v27 = vld [vmem:[#allocation9 + $0x4a8] sm:$0xff]  ;;  %v6666_v28 = vcombine.low %v965_v8, %v969_v11 }
 0x1c8   :  { %v1022_v8 = vld [vmem:[#allocation9 + $0x608] sm:$0xff] }
 0x1ca   :  { %803 = vmatpush1.bf16.msra.mxu0 %v7550_v32  ;;  %v918_v32 = vld [vmem:[#allocation9 + $0x2c8] sm:$0xff] }
 0x1cb   :  { %804 = vmatprep.subr.bf16.mxu0 %v7555_v33  ;;  %v922_v33 = vld [vmem:[#allocation9 + $0x2e8] sm:$0xff] }
 0x1cc   :  { %v6621_v35 = vcombine.high %v918_v32, %v922_v33  ;;  %v6620_v40 = vcombine.low %v918_v32, %v922_v33  ;;  %v981_v33 = vld [vmem:[#allocation9 + $0x4c0] sm:$0xff] }
 0x1ce   :  { %805 = vmatpush1.bf16.msra.mxu0 %v7553_v36  ;;  %v926_v36 = vld [vmem:[#allocation9 + $0x308] sm:$0xff] }
 0x1cf   :  { %2528 = vmatprep.subr.bf16.mxu0 %v6533_v38  ;;  %v930_v38 = vld [vmem:[#allocation9 + $0x328] sm:$0xff] }
 0x1d0   :  { %v6629_v41 = vcombine.high %v926_v36, %v930_v38  ;;  %v6628_v44 = vcombine.low %v926_v36, %v930_v38  ;;  %v986_v36 = vld [vmem:[#allocation9 + $0x4e8] sm:$0xff] }
 0x1d1   :  { %807 = vmatmul.mubr.bf16.vlgmr.msra.gmra.mrb[8].mxu0 %v8595_v1  ;;  %v890_v1 = vld [vmem:[#allocation9 + $0x1e8] sm:$0xff] }
 0x1d2   :  { %2529 = vmatpush1.bf16.msra.mxu0 %v6532_v42  ;;  %v6589_v7 = vcombine.high %v886_v0, %v890_v1  ;;  %v6588_v13 = vcombine.low %v886_v0, %v890_v1  ;;  %v934_v42 = vld [vmem:[#allocation9 + $0x348] sm:$0xff] }
 0x1d3   :  { %2530 = vmatprep.subr.bf16.mxu0 %v6541_v43  ;;  %v938_v43 = vld [vmem:[#allocation9 + $0x368] sm:$0xff] }
 0x1d4   :  { %v6637_v45 = vcombine.high %v934_v42, %v938_v43  ;;  %v6636_v48 = vcombine.low %v934_v42, %v938_v43 }
 0x1d6   :  { %2531 = vmatpush1.bf16.msra.mxu0 %v6540_v46  ;;  %v942_v46 = vld [vmem:[#allocation9 + $0x388] sm:$0xff] }
 0x1d7   :  { %2532 = vmatprep.subr.bf16.mxu0 %v6549_v47  ;;  %v946_v47 = vld [vmem:[#allocation9 + $0x3a8] sm:$0xff] }
 0x1d8   :  { %v6645_v49 = vcombine.high %v942_v46, %v946_v47  ;;  %v6644_v52 = vcombine.low %v942_v46, %v946_v47  ;;  %v1001_v46 = vld [vmem:[#allocation9 + $0x560] sm:$0xff]  ;;  %v998_v47 = vld [vmem:[#allocation9 + $0x548] sm:$0xff] }
 0x1da   :  { %2533 = vmatpush1.bf16.msra.mxu0 %v6548_v50  ;;  %v950_v50 = vld [vmem:[#allocation9 + $0x3c8] sm:$0xff] }
 0x1db   :  { %2534 = vmatprep.subr.bf16.mxu0 %v6557_v51  ;;  %v954_v51 = vld [vmem:[#allocation9 + $0x3e8] sm:$0xff] }
 0x1dc   :  { %v6653_v53 = vcombine.high %v950_v50, %v954_v51 }
 0x1de   :  { %2535 = vmatpush1.bf16.msra.mxu0 %v6556_v54  ;;  %v6652_v54 = vcombine.low %v950_v50, %v954_v51 }
 0x1df   :  { %2536 = vmatprep.subr.bf16.mxu0 %v6565_v55  ;;  %v6661_v55 = vcombine.high %v8603_v20, %v8607_v22  ;;  %v989_v20 = vld [vmem:[#allocation9 + $0x500] sm:$0xff] }
 0x1e0   :  { %v993_v22 = vld [vmem:[#allocation9 + $0x520] sm:$0xff] }
 0x1e1   :  { %v6691_v43 = vcombine.high %v989_v20, %v993_v22 }
 0x1e2   :  { %2537 = vmatpush1.bf16.msra.mxu0 %v6564_v58  ;;  %v378_v58 = vrot.slane %v8615_v57, %v8586_v37 }
 0x1e3   :  { %2538 = vmatprep.subr.bf16.mxu0 %v6573_v59  ;;  %v382_v59 = vrot.slane %v8615_v57, %v8589_v39 }
 0x1e4   :  { %v398_v60 = vrot.slane %v378_v58, %v8586_v37 }
 0x1e5   :  { %v402_v61 = vrot.slane %v382_v59, %v8586_v37 }
 0x1e6   :  { %2539 = vmatpush1.bf16.msra.mxu0 %v6572_v62 }
 0x1e7   :  { %2540 = vmatprep.subr.bf16.mxu0 %v6581_v63 }
 0x1ea   :  { %2541 = vmatpush1.bf16.msra.mxu0 %v6580_v5 }
 0x1eb   :  { %2542 = vmatprep.subr.bf16.mxu0 %v6589_v7 }
 0x1ee   :  { %2543 = vmatpush1.bf16.msra.mxu0 %v6588_v13  ;;  %v970_v13 = vld [vmem:[#allocation9 + $0x468] sm:$0xff] }
 0x1ef   :  { %2544 = vmatprep.subr.bf16.mxu0 %v6597_v15  ;;  %v6669_v17 = vcombine.high %v966_v12, %v970_v13 }
 0x1f2   :  { %2545 = vmatpush1.bf16.msra.mxu0 %v6596_v23  ;;  %v977_v23 = vld [vmem:[#allocation9 + $0x4a0] sm:$0xff] }
 0x1f3   :  { %2546 = vmatprep.subr.bf16.mxu0 %v6605_v26  ;;  %v974_v26 = vld [vmem:[#allocation9 + $0x488] sm:$0xff]  ;;  %v6674_v38 = vcombine.low %v973_v21, %v977_v23 }
 0x1f4   :  { %v6677_v32 = vcombine.high %v974_v26, %v978_v27 }
 0x1f6   :  { %2547 = vmatpush1.bf16.msra.mxu0 %v6604_v29  ;;  %v6668_v29 = vcombine.low %v966_v12, %v970_v13 }
 0x1f7   :  { %2548 = vmatprep.subr.bf16.mxu0 %v6613_v30  ;;  %v6675_v30 = vcombine.high %v973_v21, %v977_v23  ;;  %v1030_v21 = vld [vmem:[#allocation9 + $0x648] sm:$0xff] }
 0x1f8   :  { %v1034_v23 = vld [vmem:[#allocation9 + $0x668] sm:$0xff] }
 0x1fa   :  { %2549 = vmatpush1.bf16.msra.mxu0 %v6612_v34  ;;  %v985_v34 = vld [vmem:[#allocation9 + $0x4e0] sm:$0xff] }
 0x1fb   :  { %2550 = vmatprep.subr.bf16.mxu0 %v6621_v35  ;;  %v982_v35 = vld [vmem:[#allocation9 + $0x4c8] sm:$0xff]  ;;  %v6683_v18 = vcombine.high %v981_v33, %v985_v34 }
 0x1fc   :  { %v6685_v19 = vcombine.high %v982_v35, %v986_v36  ;;  %v6684_v42 = vcombine.low %v982_v35, %v986_v36  ;;  %v6732_v36 = vcombine.low %v1030_v21, %v1034_v23 }
 0x1fe   :  { %2551 = vmatpush1.bf16.msra.mxu0 %v6620_v40  ;;  %v6676_v40 = vcombine.low %v974_v26, %v978_v27 }
 0x1ff   :  { %2552 = vmatprep.subr.bf16.mxu0 %v6629_v41  ;;  %v6682_v41 = vcombine.low %v981_v33, %v985_v34  ;;  %v1038_v33 = vld [vmem:[#allocation9 + $0x688] sm:$0xff] }
 0x200   :  { %v1042_v34 = vld [vmem:[#allocation9 + $0x6a8] sm:$0xff] }
 0x202   :  { %2553 = vmatpush1.bf16.msra.mxu0 %v6628_v44 }
 0x203   :  { %2554 = vmatprep.subr.bf16.mxu0 %v6637_v45  ;;  %v997_v45 = vld [vmem:[#allocation9 + $0x540] sm:$0xff] }
 0x204   :  { %v6699_v51 = vcombine.high %v997_v45, %v1001_v46  ;;  %v6698_v58 = vcombine.low %v997_v45, %v1001_v46  ;;  %v1054_v45 = vld [vmem:[#allocation9 + $0x708] sm:$0xff] }
 0x205   :  { %v1058_v46 = vld [vmem:[#allocation9 + $0x728] sm:$0xff] }
 0x206   :  { %2555 = vmatpush1.bf16.msra.mxu0 %v6636_v48  ;;  %v1002_v48 = vld [vmem:[#allocation9 + $0x568] sm:$0xff] }
 0x207   :  { %2556 = vmatprep.subr.bf16.mxu0 %v6645_v49  ;;  %v6690_v49 = vcombine.low %v989_v20, %v993_v22  ;;  %v6700_v59 = vcombine.low %v998_v47, %v1002_v48  ;;  %v1046_v20 = vld [vmem:[#allocation9 + $0x6c8] sm:$0xff] }
 0x208   :  { %v1050_v22 = vld [vmem:[#allocation9 + $0x6e8] sm:$0xff] }
 0x20a   :  { %2557 = vmatpush1.bf16.msra.mxu0 %v6644_v52  ;;  %v6701_v52 = vcombine.high %v998_v47, %v1002_v48  ;;  %v6748_v48 = vcombine.low %v1046_v20, %v1050_v22 }
 0x20b   :  { %2558 = vmatprep.subr.bf16.mxu0 %v6653_v53  ;;  %v1005_v53 = vld [vmem:[#allocation9 + $0x580] sm:$0xff] }
 0x20e   :  { %2559 = vmatpush1.bf16.msra.mxu0 %v6652_v54  ;;  %v1009_v54 = vld [vmem:[#allocation9 + $0x5a0] sm:$0xff] }
 0x20f   :  { %2571 = vmatprep.subr.bf16.mxu0 %v6661_v55  ;;  %v1006_v55 = vld [vmem:[#allocation9 + $0x588] sm:$0xff] }
 0x264   :  { %v765_v62 = vpop.f32.mrb[4].mxu0 }
 0x265   :  { %v766_v63 = vadd.f32 %v765_v62, %v398_v60  ;;  %v767_v0 = vpop.f32.mrb[5].mxu0  ;;  %v1013_v62 = vld [vmem:[#allocation9 + $0x5c0] sm:$0xff] }
 0x266   :  { %v768_v1 = vadd.f32 %v767_v0, %v402_v61  ;;  %v769_v2 = vpop.f32.mrb[6].mxu0  ;;  %v1014_v0 = vld [vmem:[#allocation9 + $0x5c8] sm:$0xff] }
 0x267   :  { %v770_v3 = vadd.f32 %v769_v2, %v398_v60  ;;  %v771_v4 = vpop.f32.mrb[7].mxu0  ;;  %v817_v6 = vmax.f32 %v766_v63, 0.0  ;;  %v6707_v60 = vcombine.high %v1005_v53, %v1009_v54  ;;  %v1017_v63 = vld [vmem:[#allocation9 + $0x5e0] sm:$0xff]  ;;  %v6706_v2 = vcombine.low %v1005_v53, %v1009_v54  ;;  %v1062_v54 = vld [vmem:[#allocation9 + $0x748] sm:$0xff] }
 0x268   :  { %v772_v5 = vadd.f32 %v771_v4, %v402_v61  ;;  %v818_v9 = vmax.f32 %v768_v1, 0.0  ;;  %v6709_v61 = vcombine.high %v1006_v55, %v1010_v56  ;;  %v1018_v1 = vld [vmem:[#allocation9 + $0x5e8] sm:$0xff]  ;;  %v6715_v4 = vcombine.high %v1013_v62, %v1017_v63  ;;  %v1065_v53 = vld [vmem:[#allocation9 + $0x760] sm:$0xff] }
 0x269   :  { %v821_v7 = vmax.f32 %v770_v3, 0.0  ;;  %v6708_v3 = vcombine.low %v1006_v55, %v1010_v56  ;;  %v6716_v11 = vcombine.low %v1014_v0, %v1018_v1  ;;  %v1066_v55 = vld [vmem:[#allocation9 + $0x768] sm:$0xff]  ;;  %v8641_v56 = vsub.s32 6, %v8583_v31 }
 0x26a   :  { %v822_v10 = vmax.f32 %v772_v5, 0.0  ;;  %v6717_v5 = vcombine.high %v1014_v0, %v1018_v1  ;;  %v1073_v1 = vld [vmem:[#allocation9 + $0x7a0] sm:$0xff] }
 0x26b   :  { %v8623_v14 = vpack.c.bf16 %v821_v7, %v817_v6  ;;  %v1021_v6 = vld [vmem:[#allocation9 + $0x600] sm:$0xff]  ;;  %v390_v0 = vrot.slane %v8615_v57, %v8641_v56 }
 0x26c   :  { %v8625_v15 = vpack.c.bf16 %v822_v10, %v818_v9  ;;  %v1025_v7 = vld [vmem:[#allocation9 + $0x620] sm:$0xff]  ;;  %v1026_v9 = vld [vmem:[#allocation9 + $0x628] sm:$0xff]  ;;  %v6714_v10 = vcombine.low %v1013_v62, %v1017_v63 }
 0x26d   :  { %v6723_v12 = vcombine.high %v1021_v6, %v1025_v7  ;;  %v6725_v13 = vcombine.high %v1022_v8, %v1026_v9  ;;  %v6722_v26 = vcombine.low %v1021_v6, %v1025_v7  ;;  %v6724_v27 = vcombine.low %v1022_v8, %v1026_v9  ;;  %v1069_v63 = vld [vmem:[#allocation9 + $0x780] sm:$0xff] }
 0x26e   :  { %2474 = vmatprep.mubr.bf16.mxu1 %v8625_v15  ;;  %2560 = vmatprep.mubr.bf16.mxu0 %v8625_v15  ;;  %v6771_v6 = vcombine.high %v1069_v63, %v1073_v1  ;;  %v1077_v8 = vld [vmem:[#allocation9 + $0x7c0] sm:$0xff]  ;;  %v410_v9 = vrot.slane %v390_v0, %v8586_v37  ;;  %v856_v0 = vld [vmem:[#allocation9 + $0xd8] sm:$0xff] }
 0x26f   :  { %2475 = vmatmul.mubr.bf16.vlgmr.msra.gmra.mrb[0].mxu1 %v8623_v14  ;;  %2561 = vmatmul.mubr.bf16.vlgmr.msra.gmra.mrb[12].mxu0 %v8623_v14 }
 0x270   :  { %2486 = vmatpush1.bf16.msra.mxu1 %v6658_v24  ;;  %2572 = vmatpush1.bf16.msra.mxu0 %v6660_v25  ;;  %v990_v24 = vld [vmem:[#allocation9 + $0x508] sm:$0xff] }
 0x271   :  { %2487 = vmatprep.subr.bf16.mxu1 %v6667_v16  ;;  %2573 = vmatprep.subr.bf16.mxu0 %v6669_v17  ;;  %v994_v25 = vld [vmem:[#allocation9 + $0x528] sm:$0xff]  ;;  %v1029_v16 = vld [vmem:[#allocation9 + $0x640] sm:$0xff] }
 0x272   :  { %v6693_v44 = vcombine.high %v990_v24, %v994_v25  ;;  %v6692_v50 = vcombine.low %v990_v24, %v994_v25  ;;  %v1033_v17 = vld [vmem:[#allocation9 + $0x660] sm:$0xff]  ;;  %v6740_v25 = vcombine.low %v1038_v33, %v1042_v34 }
 0x273   :  { %v6730_v35 = vcombine.low %v1029_v16, %v1033_v17 }
 0x274   :  { %2488 = vmatpush1.bf16.msra.mxu1 %v6666_v28  ;;  %2574 = vmatpush1.bf16.msra.mxu0 %v6668_v29  ;;  %v6731_v28 = vcombine.high %v1029_v16, %v1033_v17  ;;  %v6733_v29 = vcombine.high %v1030_v21, %v1034_v23 }
 0x275   :  { %2489 = vmatprep.subr.bf16.mxu1 %v6675_v30  ;;  %2575 = vmatprep.subr.bf16.mxu0 %v6677_v32  ;;  %v1037_v30 = vld [vmem:[#allocation9 + $0x680] sm:$0xff] }
 0x276   :  { %v1041_v32 = vld [vmem:[#allocation9 + $0x6a0] sm:$0xff] }
 0x277   :  { %v6738_v24 = vcombine.low %v1037_v30, %v1041_v32 }
 0x278   :  { %2490 = vmatpush1.bf16.msra.mxu1 %v6674_v38  ;;  %2576 = vmatpush1.bf16.msra.mxu0 %v6676_v40  ;;  %v6739_v38 = vcombine.high %v1037_v30, %v1041_v32  ;;  %v6741_v40 = vcombine.high %v1038_v33, %v1042_v34  ;;  %v835_v30 = vld [vmem:[#allocation9 + $0x30] sm:$0xff]  ;;  %v832_v32 = vld [vmem:[#allocation9 + $0x18] sm:$0xff] }
 0x279   :  { %2491 = vmatprep.subr.bf16.mxu1 %v6683_v18  ;;  %2577 = vmatprep.subr.bf16.mxu0 %v6685_v19  ;;  %v1045_v18 = vld [vmem:[#allocation9 + $0x6c0] sm:$0xff]  ;;  %v836_v33 = vld [vmem:[#allocation9 + $0x38] sm:$0xff] }
 0x27a   :  { %v1049_v19 = vld [vmem:[#allocation9 + $0x6e0] sm:$0xff] }
 0x27b   :  { %v6746_v47 = vcombine.low %v1045_v18, %v1049_v19 }
 0x27c   :  { %2492 = vmatpush1.bf16.msra.mxu1 %v6682_v41  ;;  %2578 = vmatpush1.bf16.msra.mxu0 %v6684_v42  ;;  %v6747_v41 = vcombine.high %v1045_v18, %v1049_v19  ;;  %v6749_v42 = vcombine.high %v1046_v20, %v1050_v22  ;;  %v6537_v22 = vcombine.high %v832_v32, %v836_v33 }
 0x27d   :  { %2493 = vmatprep.subr.bf16.mxu1 %v6691_v43  ;;  %2579 = vmatprep.subr.bf16.mxu0 %v6693_v44  ;;  %v1053_v43 = vld [vmem:[#allocation9 + $0x700] sm:$0xff] }
 0x27e   :  { %v1057_v44 = vld [vmem:[#allocation9 + $0x720] sm:$0xff] }
 0x280   :  { %2494 = vmatpush1.bf16.msra.mxu1 %v6690_v49  ;;  %2580 = vmatpush1.bf16.msra.mxu0 %v6692_v50  ;;  %v6755_v49 = vcombine.high %v1053_v43, %v1057_v44  ;;  %v6757_v50 = vcombine.high %v1054_v45, %v1058_v46 }
 0x281   :  { %2495 = vmatprep.subr.bf16.mxu1 %v6699_v51  ;;  %2581 = vmatprep.subr.bf16.mxu0 %v6701_v52  ;;  %v1061_v51 = vld [vmem:[#allocation9 + $0x740] sm:$0xff]  ;;  %v8638_v52 = vsub.s32 4, %v8583_v31 }
 0x282   :  { %v6762_v31 = vcombine.low %v1061_v51, %v1065_v53 }
 0x283   :  { %v386_v62 = vrot.slane %v8615_v57, %v8638_v52 }
 0x284   :  { %2496 = vmatpush1.bf16.msra.mxu1 %v6698_v58  ;;  %2582 = vmatpush1.bf16.msra.mxu0 %v6700_v59  ;;  %v6754_v58 = vcombine.low %v1053_v43, %v1057_v44  ;;  %v6756_v59 = vcombine.low %v1054_v45, %v1058_v46  ;;  %v843_v43 = vld [vmem:[#allocation9 + $0x70] sm:$0xff]  ;;  %v840_v44 = vld [vmem:[#allocation9 + $0x58] sm:$0xff] }
 0x285   :  { %2497 = vmatprep.subr.bf16.mxu1 %v6707_v60  ;;  %2583 = vmatprep.subr.bf16.mxu0 %v6709_v61  ;;  %v6763_v60 = vcombine.high %v1061_v51, %v1065_v53  ;;  %v6765_v61 = vcombine.high %v1062_v54, %v1066_v55  ;;  %v844_v45 = vld [vmem:[#allocation9 + $0x78] sm:$0xff]  ;;  %v847_v51 = vld [vmem:[#allocation9 + $0x90] sm:$0xff] }
 0x286   :  { %v851_v53 = vld [vmem:[#allocation9 + $0xb0] sm:$0xff] }
 0x288   :  { %2498 = vmatpush1.bf16.msra.mxu1 %v6706_v2  ;;  %2584 = vmatpush1.bf16.msra.mxu0 %v6708_v3  ;;  %v1070_v2 = vld [vmem:[#allocation9 + $0x788] sm:$0xff] }
 0x289   :  { %2499 = vmatprep.subr.bf16.mxu1 %v6715_v4  ;;  %2585 = vmatprep.subr.bf16.mxu0 %v6717_v5  ;;  %v1074_v3 = vld [vmem:[#allocation9 + $0x7a8] sm:$0xff]  ;;  %v6764_v4 = vcombine.low %v1062_v54, %v1066_v55  ;;  %v406_v5 = vrot.slane %v386_v62, %v8586_v37  ;;  %v848_v54 = vld [vmem:[#allocation9 + $0x98] sm:$0xff]  ;;  %v855_v62 = vld [vmem:[#allocation9 + $0xd0] sm:$0xff] }
 0x28a   :  { %v6773_v7 = vcombine.high %v1070_v2, %v1074_v3  ;;  %v6772_v16 = vcombine.low %v1070_v2, %v1074_v3  ;;  %v852_v55 = vld [vmem:[#allocation9 + $0xb8] sm:$0xff]  ;;  %v6550_v2 = vcombine.low %v847_v51, %v851_v53 }
 0x28b   :  { %v6552_v3 = vcombine.low %v848_v54, %v852_v55 }
 0x28c   :  { %2500 = vmatpush1.bf16.msra.mxu1 %v6714_v10  ;;  %2586 = vmatpush1.bf16.msra.mxu0 %v6716_v11  ;;  %v1081_v10 = vld [vmem:[#allocation9 + $0x7e0] sm:$0xff]  ;;  %v1078_v11 = vld [vmem:[#allocation9 + $0x7c8] sm:$0xff] }
 0x28d   :  { %2501 = vmatprep.subr.bf16.mxu1 %v6723_v12  ;;  %2587 = vmatprep.subr.bf16.mxu0 %v6725_v13  ;;  %v1082_v12 = vld [vmem:[#allocation9 + $0x7e8] sm:$0xff]  ;;  %v6770_v13 = vcombine.low %v1069_v63, %v1073_v1  ;;  %v6779_v23 = vcombine.high %v1077_v8, %v1081_v10  ;;  %v859_v63 = vld [vmem:[#allocation9 + $0xf0] sm:$0xff]  ;;  %v860_v1 = vld [vmem:[#allocation9 + $0xf8] sm:$0xff] }
 0x290   :  { %2502 = vmatpush1.bf16.msra.mxu1 %v6722_v26  ;;  %2588 = vmatpush1.bf16.msra.mxu0 %v6724_v27  ;;  %v6781_v26 = vcombine.high %v1078_v11, %v1082_v12  ;;  %v831_v27 = vld [vmem:[#allocation9 + $0x10] sm:$0xff] }
 0x291   :  { %2503 = vmatprep.subr.bf16.mxu1 %v6731_v28  ;;  %2589 = vmatprep.subr.bf16.mxu0 %v6733_v29  ;;  %v6535_v20 = vcombine.high %v831_v27, %v835_v30 }
 0x294   :  { %2504 = vmatpush1.bf16.msra.mxu1 %v6730_v35  ;;  %2590 = vmatpush1.bf16.msra.mxu0 %v6732_v36 }
 0x295   :  { %2505 = vmatprep.subr.bf16.mxu1 %v6739_v38  ;;  %2591 = vmatprep.subr.bf16.mxu0 %v6741_v40  ;;  %v6778_v38 = vcombine.low %v1077_v8, %v1081_v10  ;;  %v6780_v40 = vcombine.low %v1078_v11, %v1082_v12  ;;  %v6558_v8 = vcombine.low %v855_v62, %v859_v63  ;;  %v871_v12 = vld [vmem:[#allocation9 + $0x150] sm:$0xff] }
 0x298   :  { %2506 = vmatpush1.bf16.msra.mxu1 %v6738_v24  ;;  %2592 = vmatpush1.bf16.msra.mxu0 %v6740_v25 }
 0x299   :  { %2507 = vmatprep.subr.bf16.mxu1 %v6747_v41  ;;  %2593 = vmatprep.subr.bf16.mxu0 %v6749_v42  ;;  %v839_v41 = vld [vmem:[#allocation9 + $0x50] sm:$0xff] }
 0x29c   :  { %2508 = vmatpush1.bf16.msra.mxu1 %v6746_v47  ;;  %2594 = vmatpush1.bf16.msra.mxu0 %v6748_v48  ;;  %v6534_v47 = vcombine.low %v831_v27, %v835_v30  ;;  %v6536_v48 = vcombine.low %v832_v32, %v836_v33  ;;  %v879_v27 = vld [vmem:[#allocation9 + $0x190] sm:$0xff]  ;;  %v884_v30 = vld [vmem:[#allocation9 + $0x1b8] sm:$0xff] }
 0x29d   :  { %2509 = vmatprep.subr.bf16.mxu1 %v6755_v49  ;;  %2595 = vmatprep.subr.bf16.mxu0 %v6757_v50  ;;  %v6543_v49 = vcombine.high %v839_v41, %v843_v43  ;;  %v6545_v50 = vcombine.high %v840_v44, %v844_v45 }
 0x2a0   :  { %2510 = vmatpush1.bf16.msra.mxu1 %v6754_v58  ;;  %2596 = vmatpush1.bf16.msra.mxu0 %v6756_v59  ;;  %v6542_v58 = vcombine.low %v839_v41, %v843_v43  ;;  %v6544_v59 = vcombine.low %v840_v44, %v844_v45  ;;  %v899_v41 = vld [vmem:[#allocation9 + $0x230] sm:$0xff]  ;;  %v896_v43 = vld [vmem:[#allocation9 + $0x218] sm:$0xff] }
 0x2a1   :  { %2511 = vmatprep.subr.bf16.mxu1 %v6763_v60  ;;  %2597 = vmatprep.subr.bf16.mxu0 %v6765_v61  ;;  %v6551_v60 = vcombine.high %v847_v51, %v851_v53  ;;  %v6553_v61 = vcombine.high %v848_v54, %v852_v55  ;;  %v900_v44 = vld [vmem:[#allocation9 + $0x238] sm:$0xff]  ;;  %v907_v51 = vld [vmem:[#allocation9 + $0x270] sm:$0xff] }
 0x2a2   :  { %v904_v53 = vld [vmem:[#allocation9 + $0x258] sm:$0xff] }
 0x2a3   :  { %v908_v54 = vld [vmem:[#allocation9 + $0x278] sm:$0xff] }
 0x2a4   :  { %v808_v57 = vpop.f32.mrb[8].mxu0  ;;  %2512 = vmatpush1.bf16.msra.mxu1 %v6762_v31  ;;  %2598 = vmatpush1.bf16.msra.mxu0 %v6764_v4  ;;  %v6559_v31 = vcombine.high %v855_v62, %v859_v63  ;;  %v6561_v4 = vcombine.high %v856_v0, %v860_v1  ;;  %v915_v62 = vld [vmem:[#allocation9 + $0x2b0] sm:$0xff]  ;;  %v912_v63 = vld [vmem:[#allocation9 + $0x298] sm:$0xff] }
 0x2a5   :  { %v809_v17 = vadd.f32 %v808_v57, %v406_v5  ;;  %v810_v21 = vpop.f32.mrb[9].mxu0  ;;  %2513 = vmatprep.subr.bf16.mxu1 %v6771_v6  ;;  %2599 = vmatprep.subr.bf16.mxu0 %v6773_v7  ;;  %v867_v6 = vld [vmem:[#allocation9 + $0x130] sm:$0xff]  ;;  %v868_v7 = vld [vmem:[#allocation9 + $0x138] sm:$0xff] }
 0x2a6   :  { %v811_v28 = vadd.f32 %v810_v21, %v410_v9  ;;  %v812_v29 = vpop.f32.mrb[10].mxu0  ;;  %v875_v57 = vld [vmem:[#allocation9 + $0x170] sm:$0xff] }
 0x2a7   :  { %v813_v34 = vadd.f32 %v812_v29, %v406_v5  ;;  %v814_v35 = vpop.f32.mrb[11].mxu0  ;;  %v819_v18 = vmax.f32 %v809_v17, 0.0  ;;  %v863_v5 = vld [vmem:[#allocation9 + $0x110] sm:$0xff]  ;;  %v880_v29 = vld [vmem:[#allocation9 + $0x198] sm:$0xff]  ;;  %v6574_v32 = vcombine.low %v871_v12, %v875_v57 }
 0x2a8   :  { %v815_v36 = vadd.f32 %v814_v35, %v410_v9  ;;  %2514 = vmatpush1.bf16.msra.mxu1 %v6770_v13  ;;  %2600 = vmatpush1.bf16.msra.mxu0 %v6772_v16  ;;  %v820_v24 = vmax.f32 %v811_v28, 0.0  ;;  %v6560_v9 = vcombine.low %v856_v0, %v860_v1  ;;  %v6567_v10 = vcombine.high %v863_v5, %v867_v6  ;;  %v872_v13 = vld [vmem:[#allocation9 + $0x158] sm:$0xff]  ;;  %v883_v28 = vld [vmem:[#allocation9 + $0x1b0] sm:$0xff] }
 0x2a9   :  { %v823_v19 = vmax.f32 %v813_v34, 0.0  ;;  %2515 = vmatprep.subr.bf16.mxu1 %v6779_v23  ;;  %2601 = vmatprep.subr.bf16.mxu0 %v6781_v26  ;;  %v876_v16 = vld [vmem:[#allocation9 + $0x178] sm:$0xff]  ;;  %v6566_v17 = vcombine.low %v863_v5, %v867_v6  ;;  %v6575_v23 = vcombine.high %v871_v12, %v875_v57  ;;  %v6583_v34 = vcombine.high %v879_v27, %v883_v28  ;;  %v923_v5 = vld [vmem:[#allocation9 + $0x2f0] sm:$0xff] }
 0x2aa   :  { %v824_v25 = vmax.f32 %v815_v36, 0.0  ;;  %v6577_v26 = vcombine.high %v872_v13, %v876_v16  ;;  %v6576_v33 = vcombine.low %v872_v13, %v876_v16  ;;  %v6585_v35 = vcombine.high %v880_v29, %v884_v30  ;;  %v887_v36 = vld [vmem:[#allocation9 + $0x1d0] sm:$0xff]  ;;  %v916_v0 = vld [vmem:[#allocation9 + $0x2b8] sm:$0xff] }
 0x2ab   :  { %v8649_v42 = vpack.c.bf16 %v823_v19, %v819_v18  ;;  %v892_v18 = vld [vmem:[#allocation9 + $0x1f8] sm:$0xff]  ;;  %v6582_v19 = vcombine.low %v879_v27, %v883_v28  ;;  %v931_v12 = vld [vmem:[#allocation9 + $0x330] sm:$0xff] }
 0x2ac   :  { %v8651_v46 = vpack.c.bf16 %v824_v25, %v820_v24  ;;  %2516 = vmatpush1.bf16.msra.mxu1 %v6778_v38  ;;  %2602 = vmatpush1.bf16.msra.mxu0 %v6780_v40  ;;  %v891_v38 = vld [vmem:[#allocation9 + $0x1f0] sm:$0xff]  ;;  %v888_v40 = vld [vmem:[#allocation9 + $0x1d8] sm:$0xff] }
 0x2ad   :  { %2614 = vmatprep.subr.bf16.mxu1 %v6535_v20  ;;  %2700 = vmatprep.subr.bf16.mxu0 %v6537_v22  ;;  %v6584_v20 = vcombine.low %v880_v29, %v884_v30  ;;  %v6591_v22 = vcombine.high %v887_v36, %v891_v38  ;;  %v6593_v24 = vcombine.high %v888_v40, %v892_v18  ;;  %v895_v25 = vld [vmem:[#allocation9 + $0x210] sm:$0xff]  ;;  %v920_v6 = vld [vmem:[#allocation9 + $0x2d8] sm:$0xff] }
 0x2ae   :  { %2517 = vmatprep.mubr.bf16.mxu1 %v8651_v46  ;;  %2603 = vmatprep.mubr.bf16.mxu0 %v8651_v46  ;;  %v6590_v45 = vcombine.low %v887_v36, %v891_v38  ;;  %v6598_v55 = vcombine.low %v895_v25, %v899_v41  ;;  %v928_v57 = vld [vmem:[#allocation9 + $0x318] sm:$0xff]  ;;  %v939_v27 = vld [vmem:[#allocation9 + $0x370] sm:$0xff] }
 0x2af   :  { %2518 = vmatmul.mubr.bf16.vlgmr.msra.gmra.mrb[0].mxu1 %v8649_v42  ;;  %2604 = vmatmul.mubr.bf16.vlgmr.msra.gmra.mrb[12].mxu0 %v8649_v42  ;;  %v932_v13 = vld [vmem:[#allocation9 + $0x338] sm:$0xff]  ;;  %v947_v36 = vld [vmem:[#allocation9 + $0x3b0] sm:$0xff] }
 0x2b0   :  { %2615 = vmatpush1.bf16.msra.mxu1 %v6534_v47  ;;  %2646 = vmatprep.mubr.bf16.mxu1 %v8625_v15  ;;  %v6592_v47 = vcombine.low %v888_v40, %v892_v18  ;;  %v936_v28 = vld [vmem:[#allocation9 + $0x358] sm:$0xff] }
 0x2b1   :  { %2701 = vmatpush1.bf16.msra.mxu0 %v6536_v48  ;;  %2732 = vmatprep.mubr.bf16.mxu0 %v8625_v15  ;;  %v864_v15 = vld [vmem:[#allocation9 + $0x118] sm:$0xff]  ;;  %v6599_v48 = vcombine.high %v895_v25, %v899_v41  ;;  %v955_v25 = vld [vmem:[#allocation9 + $0x3f0] sm:$0xff] }
 0x2b2   :  { %2616 = vmatprep.subr.bf16.mxu1 %v6543_v49  ;;  %2702 = vmatprep.subr.bf16.mxu0 %v6545_v50  ;;  %v6569_v11 = vcombine.high %v864_v15, %v868_v7  ;;  %v6568_v21 = vcombine.low %v864_v15, %v868_v7  ;;  %v6601_v49 = vcombine.high %v896_v43, %v900_v44  ;;  %v903_v50 = vld [vmem:[#allocation9 + $0x250] sm:$0xff]  ;;  %v924_v15 = vld [vmem:[#allocation9 + $0x2f8] sm:$0xff] }
 0x2b3   :  { %v6606_v1 = vcombine.low %v903_v50, %v907_v51  ;;  %v940_v29 = vld [vmem:[#allocation9 + $0x378] sm:$0xff] }
 0x2b4   :  { %2617 = vmatpush1.bf16.msra.mxu1 %v6542_v58  ;;  %v6600_v58 = vcombine.low %v896_v43, %v900_v44  ;;  %v944_v38 = vld [vmem:[#allocation9 + $0x398] sm:$0xff] }
 0x2b5   :  { %2703 = vmatpush1.bf16.msra.mxu0 %v6544_v59  ;;  %2618 = vmatprep.subr.bf16.mxu1 %v6551_v60  ;;  %v6607_v59 = vcombine.high %v903_v50, %v907_v51  ;;  %v6609_v60 = vcombine.high %v904_v53, %v908_v54  ;;  %v948_v40 = vld [vmem:[#allocation9 + $0x3b8] sm:$0xff]  ;;  %v963_v50 = vld [vmem:[#allocation9 + $0x430] sm:$0xff] }
 0x2b6   :  { %2704 = vmatprep.subr.bf16.mxu0 %v6553_v61  ;;  %v911_v61 = vld [vmem:[#allocation9 + $0x290] sm:$0xff]  ;;  %v952_v41 = vld [vmem:[#allocation9 + $0x3d8] sm:$0xff] }
 0x2b7   :  { %v6614_v7 = vcombine.low %v911_v61, %v915_v62  ;;  %v956_v43 = vld [vmem:[#allocation9 + $0x3f8] sm:$0xff] }
 0x2b8   :  { %2619 = vmatpush1.bf16.msra.mxu1 %v6550_v2  ;;  %v6608_v2 = vcombine.low %v904_v53, %v908_v54  ;;  %v960_v51 = vld [vmem:[#allocation9 + $0x418] sm:$0xff] }
 0x2b9   :  { %2705 = vmatpush1.bf16.msra.mxu0 %v6552_v3  ;;  %2620 = vmatprep.subr.bf16.mxu1 %v6559_v31  ;;  %v6615_v3 = vcombine.high %v911_v61, %v915_v62  ;;  %v6617_v31 = vcombine.high %v912_v63, %v916_v0  ;;  %v964_v53 = vld [vmem:[#allocation9 + $0x438] sm:$0xff]  ;;  %v971_v61 = vld [vmem:[#allocation9 + $0x470] sm:$0xff] }
 0x2ba   :  { %2706 = vmatprep.subr.bf16.mxu0 %v6561_v4  ;;  %v919_v4 = vld [vmem:[#allocation9 + $0x2d0] sm:$0xff] }
 0x2bb   :  { %v6622_v16 = vcombine.low %v919_v4, %v923_v5 }
 0x2bc   :  { %2621 = vmatpush1.bf16.msra.mxu1 %v6558_v8  ;;  %v6616_v8 = vcombine.low %v912_v63, %v916_v0  ;;  %v968_v63 = vld [vmem:[#allocation9 + $0x458] sm:$0xff] }
 0x2bd   :  { %2707 = vmatpush1.bf16.msra.mxu0 %v6560_v9  ;;  %2622 = vmatprep.subr.bf16.mxu1 %v6567_v10  ;;  %v6623_v9 = vcombine.high %v919_v4, %v923_v5  ;;  %v6625_v10 = vcombine.high %v920_v6, %v924_v15  ;;  %v972_v0 = vld [vmem:[#allocation9 + $0x478] sm:$0xff] }
 0x2be   :  { %2708 = vmatprep.subr.bf16.mxu0 %v6569_v11  ;;  %v927_v11 = vld [vmem:[#allocation9 + $0x310] sm:$0xff]  ;;  %v6673_v4 = vcombine.high %v968_v63, %v972_v0  ;;  %v976_v5 = vld [vmem:[#allocation9 + $0x498] sm:$0xff] }
 0x2bf   :  { %v6630_v30 = vcombine.low %v927_v11, %v931_v12 }
 0x2c0   :  { %2623 = vmatpush1.bf16.msra.mxu1 %v6566_v17  ;;  %v6624_v17 = vcombine.low %v920_v6, %v924_v15  ;;  %v980_v6 = vld [vmem:[#allocation9 + $0x4b8] sm:$0xff] }
 0x2c1   :  { %2709 = vmatpush1.bf16.msra.mxu0 %v6568_v21  ;;  %2624 = vmatprep.subr.bf16.mxu1 %v6575_v23  ;;  %v6631_v21 = vcombine.high %v927_v11, %v931_v12  ;;  %v6633_v23 = vcombine.high %v928_v57, %v932_v13  ;;  %v987_v11 = vld [vmem:[#allocation9 + $0x4f0] sm:$0xff]  ;;  %v984_v12 = vld [vmem:[#allocation9 + $0x4d8] sm:$0xff] }
 0x2c2   :  { %2710 = vmatprep.subr.bf16.mxu0 %v6577_v26  ;;  %v935_v26 = vld [vmem:[#allocation9 + $0x350] sm:$0xff] }
 0x2c3   :  { %v6638_v18 = vcombine.low %v935_v26, %v939_v27 }
 0x2c4   :  { %2625 = vmatpush1.bf16.msra.mxu1 %v6574_v32  ;;  %v6632_v32 = vcombine.low %v928_v57, %v932_v13  ;;  %v988_v57 = vld [vmem:[#allocation9 + $0x4f8] sm:$0xff] }
 0x2c5   :  { %2711 = vmatpush1.bf16.msra.mxu0 %v6576_v33  ;;  %2626 = vmatprep.subr.bf16.mxu1 %v6583_v34  ;;  %v6639_v33 = vcombine.high %v935_v26, %v939_v27  ;;  %v6641_v34 = vcombine.high %v936_v28, %v940_v29  ;;  %v992_v26 = vld [vmem:[#allocation9 + $0x518] sm:$0xff] }
 0x2c6   :  { %2712 = vmatprep.subr.bf16.mxu0 %v6585_v35  ;;  %v943_v35 = vld [vmem:[#allocation9 + $0x390] sm:$0xff]  ;;  %v996_v27 = vld [vmem:[#allocation9 + $0x538] sm:$0xff] }
 0x2c7   :  { %v6646_v44 = vcombine.low %v943_v35, %v947_v36 }
 0x2c8   :  { %2627 = vmatpush1.bf16.msra.mxu1 %v6582_v19  ;;  %v6640_v19 = vcombine.low %v936_v28, %v940_v29  ;;  %v6688_v28 = vcombine.low %v984_v12, %v988_v57 }
 0x2c9   :  { %2713 = vmatpush1.bf16.msra.mxu0 %v6584_v20  ;;  %2628 = vmatprep.subr.bf16.mxu1 %v6591_v22  ;;  %v6647_v20 = vcombine.high %v943_v35, %v947_v36  ;;  %v6649_v22 = vcombine.high %v944_v38, %v948_v40  ;;  %v1004_v35 = vld [vmem:[#allocation9 + $0x578] sm:$0xff] }
 0x2ca   :  { %2714 = vmatprep.subr.bf16.mxu0 %v6593_v24  ;;  %v951_v24 = vld [vmem:[#allocation9 + $0x3d0] sm:$0xff] }
 0x2cb   :  { %v6654_v54 = vcombine.low %v951_v24, %v955_v25 }
 0x2cc   :  { %2629 = vmatpush1.bf16.msra.mxu1 %v6590_v45  ;;  %v6648_v45 = vcombine.low %v944_v38, %v948_v40  ;;  %v6696_v38 = vcombine.low %v992_v26, %v996_v27 }
 0x2cd   :  { %2715 = vmatpush1.bf16.msra.mxu0 %v6592_v47  ;;  %2630 = vmatprep.subr.bf16.mxu1 %v6599_v48  ;;  %v6655_v47 = vcombine.high %v951_v24, %v955_v25  ;;  %v6657_v48 = vcombine.high %v952_v41, %v956_v43  ;;  %v1012_v24 = vld [vmem:[#allocation9 + $0x5b8] sm:$0xff] }
 0x2ce   :  { %2716 = vmatprep.subr.bf16.mxu0 %v6601_v49  ;;  %v959_v49 = vld [vmem:[#allocation9 + $0x410] sm:$0xff] }
 0x2cf   :  { %v6662_v62 = vcombine.low %v959_v49, %v963_v50 }
 0x2d0   :  { %2631 = vmatpush1.bf16.msra.mxu1 %v6598_v55  ;;  %v6656_v55 = vcombine.low %v952_v41, %v956_v43 }
 0x2d1   :  { %2717 = vmatpush1.bf16.msra.mxu0 %v6600_v58  ;;  %2632 = vmatprep.subr.bf16.mxu1 %v6607_v59  ;;  %v6663_v58 = vcombine.high %v959_v49, %v963_v50  ;;  %v6665_v59 = vcombine.high %v960_v51, %v964_v53  ;;  %v1020_v49 = vld [vmem:[#allocation9 + $0x5f8] sm:$0xff] }
 0x2d2   :  { %2718 = vmatprep.subr.bf16.mxu0 %v6609_v60  ;;  %v967_v60 = vld [vmem:[#allocation9 + $0x450] sm:$0xff] }
 0x2d3   :  { %v6670_v15 = vcombine.low %v967_v60, %v971_v61 }
 0x2d4   :  { %2633 = vmatpush1.bf16.msra.mxu1 %v6606_v1  ;;  %v6664_v1 = vcombine.low %v960_v51, %v964_v53 }
 0x2d5   :  { %2719 = vmatpush1.bf16.msra.mxu0 %v6608_v2  ;;  %2634 = vmatprep.subr.bf16.mxu1 %v6615_v3  ;;  %v6671_v2 = vcombine.high %v967_v60, %v971_v61  ;;  %v975_v3 = vld [vmem:[#allocation9 + $0x490] sm:$0xff]  ;;  %v1028_v60 = vld [vmem:[#allocation9 + $0x638] sm:$0xff] }
 0x2d6   :  { %2720 = vmatprep.subr.bf16.mxu0 %v6617_v31  ;;  %v979_v31 = vld [vmem:[#allocation9 + $0x4b0] sm:$0xff] }
 0x2d7   :  { %v6678_v13 = vcombine.low %v975_v3, %v979_v31 }
 0x2d8   :  { %2635 = vmatpush1.bf16.msra.mxu1 %v6614_v7  ;;  %v6672_v7 = vcombine.low %v968_v63, %v972_v0 }
 0x2d9   :  { %2721 = vmatpush1.bf16.msra.mxu0 %v6616_v8  ;;  %2636 = vmatprep.subr.bf16.mxu1 %v6623_v9  ;;  %v6679_v8 = vcombine.high %v975_v3, %v979_v31  ;;  %v6681_v9 = vcombine.high %v976_v5, %v980_v6  ;;  %v1032_v3 = vld [vmem:[#allocation9 + $0x658] sm:$0xff] }
 0x2da   :  { %2722 = vmatprep.subr.bf16.mxu0 %v6625_v10  ;;  %v983_v10 = vld [vmem:[#allocation9 + $0x4d0] sm:$0xff]  ;;  %v1036_v31 = vld [vmem:[#allocation9 + $0x678] sm:$0xff] }
 0x2dc   :  { %2637 = vmatpush1.bf16.msra.mxu1 %v6622_v16  ;;  %v6687_v16 = vcombine.high %v983_v10, %v987_v11 }
 0x2dd   :  { %2723 = vmatpush1.bf16.msra.mxu0 %v6624_v17  ;;  %2638 = vmatprep.subr.bf16.mxu1 %v6631_v21  ;;  %v6689_v17 = vcombine.high %v984_v12, %v988_v57  ;;  %v991_v21 = vld [vmem:[#allocation9 + $0x510] sm:$0xff]  ;;  %v6736_v12 = vcombine.low %v1032_v3, %v1036_v31 }
 0x2de   :  { %2724 = vmatprep.subr.bf16.mxu0 %v6633_v23  ;;  %v995_v23 = vld [vmem:[#allocation9 + $0x530] sm:$0xff] }
 0x2df   :  { %v6695_v29 = vcombine.high %v991_v21, %v995_v23  ;;  %v6694_v36 = vcombine.low %v991_v21, %v995_v23  ;;  %v1052_v21 = vld [vmem:[#allocation9 + $0x6f8] sm:$0xff] }
 0x2e0   :  { %2639 = vmatpush1.bf16.msra.mxu1 %v6630_v30  ;;  %v6697_v30 = vcombine.high %v992_v26, %v996_v27 }
 0x2e1   :  { %2725 = vmatpush1.bf16.msra.mxu0 %v6632_v32  ;;  %2640 = vmatprep.subr.bf16.mxu1 %v6639_v33  ;;  %v999_v32 = vld [vmem:[#allocation9 + $0x550] sm:$0xff] }
 0x2e2   :  { %2726 = vmatprep.subr.bf16.mxu0 %v6641_v34  ;;  %v1003_v33 = vld [vmem:[#allocation9 + $0x570] sm:$0xff]  ;;  %v1000_v34 = vld [vmem:[#allocation9 + $0x558] sm:$0xff] }
 0x2e3   :  { %v6703_v40 = vcombine.high %v999_v32, %v1003_v33  ;;  %v6702_v25 = vcombine.low %v999_v32, %v1003_v33  ;;  %v6704_v41 = vcombine.low %v1000_v34, %v1004_v35  ;;  %v1060_v32 = vld [vmem:[#allocation9 + $0x738] sm:$0xff] }
 0x2e4   :  { %2641 = vmatpush1.bf16.msra.mxu1 %v6638_v18  ;;  %v6705_v18 = vcombine.high %v1000_v34, %v1004_v35 }
 0x2e5   :  { %2727 = vmatpush1.bf16.msra.mxu0 %v6640_v19  ;;  %2642 = vmatprep.subr.bf16.mxu1 %v6647_v20  ;;  %v1007_v19 = vld [vmem:[#allocation9 + $0x590] sm:$0xff] }
 0x2e6   :  { %2728 = vmatprep.subr.bf16.mxu0 %v6649_v22  ;;  %v1011_v20 = vld [vmem:[#allocation9 + $0x5b0] sm:$0xff]  ;;  %v1008_v22 = vld [vmem:[#allocation9 + $0x598] sm:$0xff] }
 0x2e7   :  { %v6711_v43 = vcombine.high %v1007_v19, %v1011_v20  ;;  %v6710_v50 = vcombine.low %v1007_v19, %v1011_v20  ;;  %v6712_v51 = vcombine.low %v1008_v22, %v1012_v24  ;;  %v1068_v19 = vld [vmem:[#allocation9 + $0x778] sm:$0xff] }
 0x2e8   :  { %2643 = vmatpush1.bf16.msra.mxu1 %v6646_v44  ;;  %v6713_v44 = vcombine.high %v1008_v22, %v1012_v24 }
 0x2e9   :  { %2729 = vmatpush1.bf16.msra.mxu0 %v6648_v45  ;;  %2644 = vmatprep.subr.bf16.mxu1 %v6655_v47  ;;  %v1015_v45 = vld [vmem:[#allocation9 + $0x5d0] sm:$0xff] }
 0x2ea   :  { %2730 = vmatprep.subr.bf16.mxu0 %v6657_v48  ;;  %v1019_v47 = vld [vmem:[#allocation9 + $0x5f0] sm:$0xff]  ;;  %v1016_v48 = vld [vmem:[#allocation9 + $0x5d8] sm:$0xff] }
 0x2eb   :  { %v6719_v53 = vcombine.high %v1015_v45, %v1019_v47  ;;  %v6718_v61 = vcombine.low %v1015_v45, %v1019_v47  ;;  %v1076_v45 = vld [vmem:[#allocation9 + $0x7b8] sm:$0xff] }
 0x2ec   :  { %2645 = vmatpush1.bf16.msra.mxu1 %v6654_v54  ;;  %v6721_v54 = vcombine.high %v1016_v48, %v1020_v49 }
 0x2ed   :  { %2731 = vmatpush1.bf16.msra.mxu0 %v6656_v55  ;;  %2657 = vmatprep.subr.bf16.mxu1 %v6663_v58  ;;  %v1023_v55 = vld [vmem:[#allocation9 + $0x610] sm:$0xff] }
 0x2ee   :  { %2743 = vmatprep.subr.bf16.mxu0 %v6665_v59  ;;  %v1027_v58 = vld [vmem:[#allocation9 + $0x630] sm:$0xff]  ;;  %v1024_v59 = vld [vmem:[#allocation9 + $0x618] sm:$0xff] }
 0x2ef   :  { %2647 = vmatmul.mubr.bf16.vlgmr.msra.gmra.mrb[4].mxu1 %v8623_v14  ;;  %v6727_v63 = vcombine.high %v1023_v55, %v1027_v58  ;;  %v6729_v0 = vcombine.high %v1024_v59, %v1028_v60 }
 0x2f0   :  { %2733 = vmatmul.mubr.bf16.vlgmr.msra.gmra.mrb[16].mxu0 %v8623_v14  ;;  %2658 = vmatpush1.bf16.msra.mxu1 %v6662_v62  ;;  %v6680_v14 = vcombine.low %v976_v5, %v980_v6  ;;  %v6720_v62 = vcombine.low %v1016_v48, %v1020_v49  ;;  %v6728_v5 = vcombine.low %v1024_v59, %v1028_v60 }
 0x2f1   :  { %2689 = vmatprep.mubr.bf16.mxu1 %v8651_v46  ;;  %2744 = vmatpush1.bf16.msra.mxu0 %v6664_v1  ;;  %v1031_v1 = vld [vmem:[#allocation9 + $0x650] sm:$0xff] }
 0x2f2   :  { %2775 = vmatprep.mubr.bf16.mxu0 %v8651_v46  ;;  %2659 = vmatprep.subr.bf16.mxu1 %v6671_v2  ;;  %v6686_v46 = vcombine.low %v983_v10, %v987_v11  ;;  %v1035_v2 = vld [vmem:[#allocation9 + $0x670] sm:$0xff]  ;;  %v1044_v10 = vld [vmem:[#allocation9 + $0x6b8] sm:$0xff] }
 0x2f3   :  { %2745 = vmatprep.subr.bf16.mxu0 %v6673_v4  ;;  %v6726_v4 = vcombine.low %v1023_v55, %v1027_v58  ;;  %v6735_v6 = vcombine.high %v1031_v1, %v1035_v2  ;;  %v6734_v11 = vcombine.low %v1031_v1, %v1035_v2  ;;  %v1084_v55 = vld [vmem:[#allocation9 + $0x7f8] sm:$0xff]  ;;  %v7561_v1 = vld [vmem:[#allocation12 + $0xc] ss:$28 sps:$4 sm:$0xff]   ;;  %v7556_v2 = vld [vmem:[#allocation12] ss:$28 sps:$4 sm:$0xff]  }
 0x2f4   :  { %2660 = vmatpush1.bf16.msra.mxu1 %v6670_v15  ;;  %v6737_v15 = vcombine.high %v1032_v3, %v1036_v31  ;;  %v7559_v3 = vld [vmem:[#allocation12 + $0x8] ss:$28 sps:$4 sm:$0xff]   ;;  %v7564_v31 = vld [vmem:[#allocation12 + $0x3c] ss:$28 sps:$4 sm:$0xff]  }
 0x2f5   :  { %2746 = vmatpush1.bf16.msra.mxu0 %v6672_v7  ;;  %2661 = vmatprep.subr.bf16.mxu1 %v6679_v8  ;;  %v1039_v7 = vld [vmem:[#allocation9 + $0x690] sm:$0xff] }
 0x2f6   :  { %2747 = vmatprep.subr.bf16.mxu0 %v6681_v9  ;;  %v1043_v8 = vld [vmem:[#allocation9 + $0x6b0] sm:$0xff]  ;;  %v1040_v9 = vld [vmem:[#allocation9 + $0x698] sm:$0xff] }
 0x2f7   :  { %v6743_v57 = vcombine.high %v1039_v7, %v1043_v8  ;;  %v6742_v23 = vcombine.low %v1039_v7, %v1043_v8  ;;  %v6744_v26 = vcombine.low %v1040_v9, %v1044_v10  ;;  %v7573_v7 = vld [vmem:[#allocation12 + $0x7c] ss:$28 sps:$4 sm:$0xff]   ;;  %v7568_v8 = vld [vmem:[#allocation12 + $0x70] ss:$28 sps:$4 sm:$0xff]  }
 0x2f8   :  { %2662 = vmatpush1.bf16.msra.mxu1 %v6678_v13  ;;  %v6745_v13 = vcombine.high %v1040_v9, %v1044_v10  ;;  %v7571_v9 = vld [vmem:[#allocation12 + $0x78] ss:$28 sps:$4 sm:$0xff]   ;;  %v7576_v10 = vld [vmem:[#allocation12 + $0xac] ss:$28 sps:$4 sm:$0xff]  }
 0x2f9   :  { %2748 = vmatpush1.bf16.msra.mxu0 %v6680_v14  ;;  %2663 = vmatprep.subr.bf16.mxu1 %v6687_v16  ;;  %v1047_v14 = vld [vmem:[#allocation9 + $0x6d0] sm:$0xff] }
 0x2fa   :  { %2749 = vmatprep.subr.bf16.mxu0 %v6689_v17  ;;  %v1051_v16 = vld [vmem:[#allocation9 + $0x6f0] sm:$0xff]  ;;  %v1048_v17 = vld [vmem:[#allocation9 + $0x6d8] sm:$0xff] }
 0x2fb   :  { %v6751_v27 = vcombine.high %v1047_v14, %v1051_v16  ;;  %v6750_v33 = vcombine.low %v1047_v14, %v1051_v16  ;;  %v6752_v34 = vcombine.low %v1048_v17, %v1052_v21  ;;  %v7580_v14 = vld [vmem:[#allocation12 + $0xe0] ss:$28 sps:$4 sm:$0xff]   ;;  %v7583_v16 = vld [vmem:[#allocation12 + $0xe8] ss:$28 sps:$4 sm:$0xff]  }
 0x2fc   :  { %2664 = vmatpush1.bf16.msra.mxu1 %v6686_v46  ;;  %v6753_v46 = vcombine.high %v1048_v17, %v1052_v21  ;;  %v7588_v17 = vld [vmem:[#allocation12 + $0x11c] ss:$28 sps:$4 sm:$0xff]   ;;  %v7591_v21 = vld [vmem:[#allocation12 + $0x124] ss:$28 sps:$4 sm:$0xff]  }
 0x2fd   :  { %2750 = vmatpush1.bf16.msra.mxu0 %v6688_v28  ;;  %2665 = vmatprep.subr.bf16.mxu1 %v6695_v29  ;;  %v1055_v28 = vld [vmem:[#allocation9 + $0x710] sm:$0xff] }
 0x2fe   :  { %2751 = vmatprep.subr.bf16.mxu0 %v6697_v30  ;;  %v1059_v29 = vld [vmem:[#allocation9 + $0x730] sm:$0xff]  ;;  %v1056_v30 = vld [vmem:[#allocation9 + $0x718] sm:$0xff] }
 0x2ff   :  { %v6759_v35 = vcombine.high %v1055_v28, %v1059_v29  ;;  %v6758_v20 = vcombine.low %v1055_v28, %v1059_v29  ;;  %v6760_v22 = vcombine.low %v1056_v30, %v1060_v32  ;;  %v7592_v28 = vld [vmem:[#allocation12 + $0x150] ss:$28 sps:$4 sm:$0xff]   ;;  %v7595_v29 = vld [vmem:[#allocation12 + $0x158] ss:$28 sps:$4 sm:$0xff]  }
 0x300   :  { %2666 = vmatpush1.bf16.msra.mxu1 %v6694_v36  ;;  %v6761_v36 = vcombine.high %v1056_v30, %v1060_v32  ;;  %v7600_v30 = vld [vmem:[#allocation12 + $0x18c] ss:$28 sps:$4 sm:$0xff]   ;;  %v7603_v32 = vld [vmem:[#allocation12 + $0x194] ss:$28 sps:$4 sm:$0xff]  }
 0x301   :  { %2752 = vmatpush1.bf16.msra.mxu0 %v6696_v38  ;;  %2667 = vmatprep.subr.bf16.mxu1 %v6703_v40  ;;  %v1063_v38 = vld [vmem:[#allocation9 + $0x750] sm:$0xff] }
 0x302   :  { %2753 = vmatprep.subr.bf16.mxu0 %v6705_v18  ;;  %v1067_v40 = vld [vmem:[#allocation9 + $0x770] sm:$0xff]  ;;  %v1064_v18 = vld [vmem:[#allocation9 + $0x758] sm:$0xff] }
 0x303   :  { %v6767_v24 = vcombine.high %v1063_v38, %v1067_v40  ;;  %v6766_v47 = vcombine.low %v1063_v38, %v1067_v40  ;;  %v6768_v48 = vcombine.low %v1064_v18, %v1068_v19  ;;  %v7604_v38 = vld [vmem:[#allocation12 + $0x1c0] ss:$28 sps:$4 sm:$0xff]   ;;  %v7607_v40 = vld [vmem:[#allocation12 + $0x1c8] ss:$28 sps:$4 sm:$0xff]  }
 0x304   :  { %2668 = vmatpush1.bf16.msra.mxu1 %v6702_v25  ;;  %v6769_v25 = vcombine.high %v1064_v18, %v1068_v19  ;;  %v7612_v18 = vld [vmem:[#allocation12 + $0x1fc] ss:$28 sps:$4 sm:$0xff]   ;;  %v7615_v19 = vld [vmem:[#allocation12 + $0x204] ss:$28 sps:$4 sm:$0xff]  }
 0x305   :  { %2754 = vmatpush1.bf16.msra.mxu0 %v6704_v41  ;;  %2669 = vmatprep.subr.bf16.mxu1 %v6711_v43  ;;  %v1071_v41 = vld [vmem:[#allocation9 + $0x790] sm:$0xff] }
 0x306   :  { %2755 = vmatprep.subr.bf16.mxu0 %v6713_v44  ;;  %v1075_v43 = vld [vmem:[#allocation9 + $0x7b0] sm:$0xff]  ;;  %v1072_v44 = vld [vmem:[#allocation9 + $0x798] sm:$0xff] }
 0x307   :  { %v6775_v49 = vcombine.high %v1071_v41, %v1075_v43  ;;  %v6774_v58 = vcombine.low %v1071_v41, %v1075_v43  ;;  %v6776_v59 = vcombine.low %v1072_v44, %v1076_v45  ;;  %v7616_v41 = vld [vmem:[#allocation12 + $0x230] ss:$28 sps:$4 sm:$0xff]   ;;  %v7619_v43 = vld [vmem:[#allocation12 + $0x238] ss:$28 sps:$4 sm:$0xff]  }
 0x308   :  { %2670 = vmatpush1.bf16.msra.mxu1 %v6710_v50  ;;  %v6777_v50 = vcombine.high %v1072_v44, %v1076_v45  ;;  %v7624_v44 = vld [vmem:[#allocation12 + $0x26c] ss:$28 sps:$4 sm:$0xff]   ;;  %v7627_v45 = vld [vmem:[#allocation12 + $0x274] ss:$28 sps:$4 sm:$0xff]  }
 0x309   :  { %2756 = vmatpush1.bf16.msra.mxu0 %v6712_v51  ;;  %2671 = vmatprep.subr.bf16.mxu1 %v6719_v53  ;;  %v1079_v51 = vld [vmem:[#allocation9 + $0x7d0] sm:$0xff] }
 0x30a   :  { %2757 = vmatprep.subr.bf16.mxu0 %v6721_v54  ;;  %v1083_v53 = vld [vmem:[#allocation9 + $0x7f0] sm:$0xff]  ;;  %v1080_v54 = vld [vmem:[#allocation9 + $0x7d8] sm:$0xff] }
 0x30b   :  { %v6783_v60 = vcombine.high %v1079_v51, %v1083_v53 }
 0x30c   :  { %2672 = vmatpush1.bf16.msra.mxu1 %v6718_v61  ;;  %v6785_v61 = vcombine.high %v1080_v54, %v1084_v55 }
 0x30d   :  { %2758 = vmatpush1.bf16.msra.mxu0 %v6720_v62  ;;  %2673 = vmatprep.subr.bf16.mxu1 %v6727_v63  ;;  %v6782_v62 = vcombine.low %v1079_v51, %v1083_v53  ;;  %v6784_v63 = vcombine.low %v1080_v54, %v1084_v55  ;;  %v7628_v51 = vld [vmem:[#allocation12 + $0x2a0] ss:$28 sps:$4 sm:$0xff]   ;;  %v7631_v53 = vld [vmem:[#allocation12 + $0x2a8] ss:$28 sps:$4 sm:$0xff]  }
 0x30e   :  { %2759 = vmatprep.subr.bf16.mxu0 %v6729_v0  ;;  %v7558_v0 = vld [vmem:[#allocation12 + $0x4] ss:$28 sps:$4 sm:$0xff]   ;;  %v7636_v54 = vld [vmem:[#allocation12 + $0x2dc] ss:$28 sps:$4 sm:$0xff]  }
 0x30f   :  { %v7639_v55 = vld [vmem:[#allocation12 + $0x2e4] ss:$28 sps:$4 sm:$0xff]  }
 0x310   :  { %2674 = vmatpush1.bf16.msra.mxu1 %v6726_v4  ;;  %v7567_v4 = vld [vmem:[#allocation12 + $0x44] ss:$28 sps:$4 sm:$0xff]  }
 0x311   :  { %2760 = vmatpush1.bf16.msra.mxu0 %v6728_v5  ;;  %2675 = vmatprep.subr.bf16.mxu1 %v6735_v6  ;;  %v7562_v5 = vld [vmem:[#allocation12 + $0x38] ss:$28 sps:$4 sm:$0xff]   ;;  %v7565_v6 = vld [vmem:[#allocation12 + $0x40] ss:$28 sps:$4 sm:$0xff]  }
 0x312   :  { %2761 = vmatprep.subr.bf16.mxu0 %v6737_v15  ;;  %v7570_v15 = vld [vmem:[#allocation12 + $0x74] ss:$28 sps:$4 sm:$0xff]  }
 0x314   :  { %2676 = vmatpush1.bf16.msra.mxu1 %v6734_v11  ;;  %v7579_v11 = vld [vmem:[#allocation12 + $0xb4] ss:$28 sps:$4 sm:$0xff]  }
 0x315   :  { %2762 = vmatpush1.bf16.msra.mxu0 %v6736_v12  ;;  %2677 = vmatprep.subr.bf16.mxu1 %v6743_v57  ;;  %v7574_v12 = vld [vmem:[#allocation12 + $0xa8] ss:$28 sps:$4 sm:$0xff]  }
 0x316   :  { %2763 = vmatprep.subr.bf16.mxu0 %v6745_v13  ;;  %v7582_v57 = vld [vmem:[#allocation12 + $0xe4] ss:$28 sps:$4 sm:$0xff]   ;;  %v7585_v13 = vld [vmem:[#allocation12 + $0xec] ss:$28 sps:$4 sm:$0xff]  }
 0x318   :  { %2678 = vmatpush1.bf16.msra.mxu1 %v6742_v23  ;;  %v7586_v23 = vld [vmem:[#allocation12 + $0x118] ss:$28 sps:$4 sm:$0xff]  }
 0x319   :  { %2764 = vmatpush1.bf16.msra.mxu0 %v6744_v26  ;;  %2679 = vmatprep.subr.bf16.mxu1 %v6751_v27  ;;  %v7589_v26 = vld [vmem:[#allocation12 + $0x120] ss:$28 sps:$4 sm:$0xff]   ;;  %v7594_v27 = vld [vmem:[#allocation12 + $0x154] ss:$28 sps:$4 sm:$0xff]  }
 0x31a   :  { %2765 = vmatprep.subr.bf16.mxu0 %v6753_v46  ;;  %v7597_v46 = vld [vmem:[#allocation12 + $0x15c] ss:$28 sps:$4 sm:$0xff]  }
 0x31c   :  { %2680 = vmatpush1.bf16.msra.mxu1 %v6750_v33  ;;  %v7598_v33 = vld [vmem:[#allocation12 + $0x188] ss:$28 sps:$4 sm:$0xff]  }
 0x31d   :  { %2766 = vmatpush1.bf16.msra.mxu0 %v6752_v34  ;;  %2681 = vmatprep.subr.bf16.mxu1 %v6759_v35  ;;  %v7601_v34 = vld [vmem:[#allocation12 + $0x190] ss:$28 sps:$4 sm:$0xff]   ;;  %v7606_v35 = vld [vmem:[#allocation12 + $0x1c4] ss:$28 sps:$4 sm:$0xff]  }
 0x31e   :  { %2767 = vmatprep.subr.bf16.mxu0 %v6761_v36  ;;  %v7609_v36 = vld [vmem:[#allocation12 + $0x1cc] ss:$28 sps:$4 sm:$0xff]  }
 0x320   :  { %2682 = vmatpush1.bf16.msra.mxu1 %v6758_v20  ;;  %v7610_v20 = vld [vmem:[#allocation12 + $0x1f8] ss:$28 sps:$4 sm:$0xff]  }
 0x321   :  { %2768 = vmatpush1.bf16.msra.mxu0 %v6760_v22  ;;  %2683 = vmatprep.subr.bf16.mxu1 %v6767_v24  ;;  %v7613_v22 = vld [vmem:[#allocation12 + $0x200] ss:$28 sps:$4 sm:$0xff]   ;;  %v7618_v24 = vld [vmem:[#allocation12 + $0x234] ss:$28 sps:$4 sm:$0xff]  }
 0x322   :  { %2769 = vmatprep.subr.bf16.mxu0 %v6769_v25  ;;  %v7621_v25 = vld [vmem:[#allocation12 + $0x23c] ss:$28 sps:$4 sm:$0xff]  }
 0x324   :  { %2684 = vmatpush1.bf16.msra.mxu1 %v6766_v47  ;;  %v7622_v47 = vld [vmem:[#allocation12 + $0x268] ss:$28 sps:$4 sm:$0xff]  }
 0x325   :  { %2770 = vmatpush1.bf16.msra.mxu0 %v6768_v48  ;;  %2685 = vmatprep.subr.bf16.mxu1 %v6775_v49  ;;  %v7625_v48 = vld [vmem:[#allocation12 + $0x270] ss:$28 sps:$4 sm:$0xff]   ;;  %v7630_v49 = vld [vmem:[#allocation12 + $0x2a4] ss:$28 sps:$4 sm:$0xff]  }
 0x326   :  { %2771 = vmatprep.subr.bf16.mxu0 %v6777_v50  ;;  %v7633_v50 = vld [vmem:[#allocation12 + $0x2ac] ss:$28 sps:$4 sm:$0xff]  }
 0x328   :  { %2686 = vmatpush1.bf16.msra.mxu1 %v6774_v58  ;;  %v7634_v58 = vld [vmem:[#allocation12 + $0x2d8] ss:$28 sps:$4 sm:$0xff]  }
 0x329   :  { %2772 = vmatpush1.bf16.msra.mxu0 %v6776_v59  ;;  %2687 = vmatprep.subr.bf16.mxu1 %v6783_v60  ;;  %v7637_v59 = vld [vmem:[#allocation12 + $0x2e0] ss:$28 sps:$4 sm:$0xff]   ;;  %v7642_v60 = vld [vmem:[#allocation12 + $0x314] ss:$28 sps:$4 sm:$0xff]  }
 0x32a   :  { %2773 = vmatprep.subr.bf16.mxu0 %v6785_v61  ;;  %v7645_v61 = vld [vmem:[#allocation12 + $0x31c] ss:$28 sps:$4 sm:$0xff]  }
 0x32c   :  { %2688 = vmatpush1.bf16.msra.mxu1 %v6782_v62  ;;  %v7640_v62 = vld [vmem:[#allocation12 + $0x310] ss:$28 sps:$4 sm:$0xff]  }
 0x32d   :  { %2774 = vmatpush1.bf16.msra.mxu0 %v6784_v63  ;;  %5694 = vmatprep.subr.bf16.mxu1 %v7558_v0  ;;  %v7643_v63 = vld [vmem:[#allocation12 + $0x318] ss:$28 sps:$4 sm:$0xff]   ;;  %v7648_v0 = vld [vmem:[#allocation12 + $0x34c] ss:$28 sps:$4 sm:$0xff]  }
 0x32e   :  { %5866 = vmatprep.subr.bf16.mxu0 %v7561_v1  ;;  %v7651_v1 = vld [vmem:[#allocation12 + $0x354] ss:$28 sps:$4 sm:$0xff]  }
 0x32f   :  { %2690 = vmatmul.mubr.bf16.vlgmr.msra.gmra.mrb[4].mxu1 %v8649_v42 }
 0x330   :  { %2776 = vmatmul.mubr.bf16.vlgmr.msra.gmra.mrb[16].mxu0 %v8649_v42  ;;  %5695 = vmatpush1.bf16.msra.mxu1 %v7556_v2  ;;  %v7577_v42 = vld [vmem:[#allocation12 + $0xb0] ss:$28 sps:$4 sm:$0xff]   ;;  %v7646_v2 = vld [vmem:[#allocation12 + $0x348] ss:$28 sps:$4 sm:$0xff]  }
 0x331   :  { %5867 = vmatpush1.bf16.msra.mxu0 %v7559_v3  ;;  %5696 = vmatprep.subr.bf16.mxu1 %v7564_v31  ;;  %v7649_v3 = vld [vmem:[#allocation12 + $0x350] ss:$28 sps:$4 sm:$0xff]   ;;  %v7654_v31 = vld [vmem:[#allocation12 + $0x384] ss:$28 sps:$4 sm:$0xff]  }
 0x332   :  { %5868 = vmatprep.subr.bf16.mxu0 %v7567_v4  ;;  %v7657_v4 = vld [vmem:[#allocation12 + $0x38c] ss:$28 sps:$4 sm:$0xff]  }
 0x334   :  { %5697 = vmatpush1.bf16.msra.mxu1 %v7562_v5  ;;  %v8665_v5 = vld [vmem:[#allocation10] sm:$0xff] }
 0x335   :  { %5869 = vmatpush1.bf16.msra.mxu0 %v7565_v6  ;;  %5698 = vmatprep.subr.bf16.mxu1 %v7570_v15  ;;  %v1086_v6 = vunpack.c.l.bf16 %v8665_v5 }
 0x336   :  { %5870 = vmatprep.subr.bf16.mxu0 %v7573_v7 }
 0x337   :  { %v1093_v15 = vrot.slane %v1086_v6, %v8586_v37  ;;  %v1101_v7 = vrot.slane %v1086_v6, %v8638_v52 }
 0x338   :  { %5699 = vmatpush1.bf16.msra.mxu1 %v7568_v8  ;;  %v1097_v8 = vrot.slane %v1086_v6, %v8589_v39 }
 0x339   :  { %5871 = vmatpush1.bf16.msra.mxu0 %v7571_v9  ;;  %5700 = vmatprep.subr.bf16.mxu1 %v7576_v10  ;;  %v1105_v9 = vrot.slane %v1086_v6, %v8641_v56  ;;  %v1133_v10 = vrot.slane %v1093_v15, %v8586_v37  ;;  %v7690_v6 = vld [vmem:[#allocation12 + $0x4d4] ss:$28 sps:$4 sm:$0xff]   ;;  %v7693_v15 = vld [vmem:[#allocation12 + $0x4dc] ss:$28 sps:$4 sm:$0xff]  }
 0x33a   :  { %5872 = vmatprep.subr.bf16.mxu0 %v7579_v11  ;;  %v1141_v11 = vrot.slane %v1101_v7, %v8586_v37  ;;  %v7688_v7 = vld [vmem:[#allocation12 + $0x4d0] ss:$28 sps:$4 sm:$0xff]  }
 0x33c   :  { %5701 = vmatpush1.bf16.msra.mxu1 %v7574_v12  ;;  %v1137_v12 = vrot.slane %v1097_v8, %v8586_v37  ;;  %v7691_v8 = vld [vmem:[#allocation12 + $0x4d8] ss:$28 sps:$4 sm:$0xff]  }
 0x33d   :  { %5873 = vmatpush1.bf16.msra.mxu0 %v7577_v42  ;;  %5702 = vmatprep.subr.bf16.mxu1 %v7582_v57  ;;  %v1145_v42 = vrot.slane %v1105_v9, %v8586_v37  ;;  %v7696_v9 = vld [vmem:[#allocation12 + $0x50c] ss:$28 sps:$4 sm:$0xff]  }
 0x33e   :  { %5874 = vmatprep.subr.bf16.mxu0 %v7585_v13 }
 0x340   :  { %5703 = vmatpush1.bf16.msra.mxu1 %v7580_v14 }
 0x341   :  { %5875 = vmatpush1.bf16.msra.mxu0 %v7583_v16  ;;  %5704 = vmatprep.subr.bf16.mxu1 %v7588_v17 }
 0x342   :  { %5876 = vmatprep.subr.bf16.mxu0 %v7591_v21 }
 0x344   :  { %5705 = vmatpush1.bf16.msra.mxu1 %v7586_v23 }
 0x345   :  { %5877 = vmatpush1.bf16.msra.mxu0 %v7589_v26  ;;  %5706 = vmatprep.subr.bf16.mxu1 %v7594_v27 }
 0x346   :  { %5878 = vmatprep.subr.bf16.mxu0 %v7597_v46 }
 0x348   :  { %5707 = vmatpush1.bf16.msra.mxu1 %v7592_v28 }
 0x349   :  { %5879 = vmatpush1.bf16.msra.mxu0 %v7595_v29  ;;  %5708 = vmatprep.subr.bf16.mxu1 %v7600_v30 }
 0x34a   :  { %5880 = vmatprep.subr.bf16.mxu0 %v7603_v32 }
 0x34c   :  { %5709 = vmatpush1.bf16.msra.mxu1 %v7598_v33 }
 0x34d   :  { %5881 = vmatpush1.bf16.msra.mxu0 %v7601_v34  ;;  %5710 = vmatprep.subr.bf16.mxu1 %v7606_v35 }
 0x34e   :  { %5882 = vmatprep.subr.bf16.mxu0 %v7609_v36 }
 0x350   :  { %5711 = vmatpush1.bf16.msra.mxu1 %v7604_v38 }
 0x351   :  { %5883 = vmatpush1.bf16.msra.mxu0 %v7607_v40  ;;  %5712 = vmatprep.subr.bf16.mxu1 %v7612_v18 }
 0x352   :  { %5884 = vmatprep.subr.bf16.mxu0 %v7615_v19 }
 0x354   :  { %5713 = vmatpush1.bf16.msra.mxu1 %v7610_v20 }
 0x355   :  { %5885 = vmatpush1.bf16.msra.mxu0 %v7613_v22  ;;  %5714 = vmatprep.subr.bf16.mxu1 %v7618_v24 }
 0x356   :  { %5886 = vmatprep.subr.bf16.mxu0 %v7621_v25 }
 0x358   :  { %5715 = vmatpush1.bf16.msra.mxu1 %v7616_v41 }
 0x359   :  { %5887 = vmatpush1.bf16.msra.mxu0 %v7619_v43  ;;  %5716 = vmatprep.subr.bf16.mxu1 %v7624_v44  ;;  %v7652_v44 = vld [vmem:[#allocation12 + $0x380] ss:$28 sps:$4 sm:$0xff]  }
 0x35a   :  { %5888 = vmatprep.subr.bf16.mxu0 %v7627_v45  ;;  %v7655_v45 = vld [vmem:[#allocation12 + $0x388] ss:$28 sps:$4 sm:$0xff]  }
 0x35c   :  { %5717 = vmatpush1.bf16.msra.mxu1 %v7622_v47  ;;  %v7660_v47 = vld [vmem:[#allocation12 + $0x3bc] ss:$28 sps:$4 sm:$0xff]  }
 0x35d   :  { %5889 = vmatpush1.bf16.msra.mxu0 %v7625_v48  ;;  %5718 = vmatprep.subr.bf16.mxu1 %v7630_v49  ;;  %v7663_v48 = vld [vmem:[#allocation12 + $0x3c4] ss:$28 sps:$4 sm:$0xff]   ;;  %v7658_v49 = vld [vmem:[#allocation12 + $0x3b8] ss:$28 sps:$4 sm:$0xff]  }
 0x35e   :  { %5890 = vmatprep.subr.bf16.mxu0 %v7633_v50  ;;  %v7661_v50 = vld [vmem:[#allocation12 + $0x3c0] ss:$28 sps:$4 sm:$0xff]  }
 0x360   :  { %5719 = vmatpush1.bf16.msra.mxu1 %v7628_v51  ;;  %v7666_v51 = vld [vmem:[#allocation12 + $0x3f4] ss:$28 sps:$4 sm:$0xff]  }
 0x361   :  { %5891 = vmatpush1.bf16.msra.mxu0 %v7631_v53  ;;  %5720 = vmatprep.subr.bf16.mxu1 %v7636_v54  ;;  %v7669_v53 = vld [vmem:[#allocation12 + $0x3fc] ss:$28 sps:$4 sm:$0xff]   ;;  %v7664_v54 = vld [vmem:[#allocation12 + $0x3f0] ss:$28 sps:$4 sm:$0xff]  }
 0x362   :  { %5892 = vmatprep.subr.bf16.mxu0 %v7639_v55  ;;  %v7667_v55 = vld [vmem:[#allocation12 + $0x3f8] ss:$28 sps:$4 sm:$0xff]  }
 0x364   :  { %5721 = vmatpush1.bf16.msra.mxu1 %v7634_v58  ;;  %v7672_v58 = vld [vmem:[#allocation12 + $0x42c] ss:$28 sps:$4 sm:$0xff]  }
 0x365   :  { %5893 = vmatpush1.bf16.msra.mxu0 %v7637_v59  ;;  %5722 = vmatprep.subr.bf16.mxu1 %v7642_v60  ;;  %v7675_v59 = vld [vmem:[#allocation12 + $0x434] ss:$28 sps:$4 sm:$0xff]   ;;  %v7670_v60 = vld [vmem:[#allocation12 + $0x428] ss:$28 sps:$4 sm:$0xff]  }
 0x366   :  { %5894 = vmatprep.subr.bf16.mxu0 %v7645_v61  ;;  %v7673_v61 = vld [vmem:[#allocation12 + $0x430] ss:$28 sps:$4 sm:$0xff]  }
 0x368   :  { %5723 = vmatpush1.bf16.msra.mxu1 %v7640_v62  ;;  %v7678_v62 = vld [vmem:[#allocation12 + $0x464] ss:$28 sps:$4 sm:$0xff]  }
 0x369   :  { %5895 = vmatpush1.bf16.msra.mxu0 %v7643_v63  ;;  %5724 = vmatprep.subr.bf16.mxu1 %v7648_v0  ;;  %v7681_v63 = vld [vmem:[#allocation12 + $0x46c] ss:$28 sps:$4 sm:$0xff]   ;;  %v7676_v0 = vld [vmem:[#allocation12 + $0x460] ss:$28 sps:$4 sm:$0xff]  }
 0x36a   :  { %5896 = vmatprep.subr.bf16.mxu0 %v7651_v1  ;;  %v7679_v1 = vld [vmem:[#allocation12 + $0x468] ss:$28 sps:$4 sm:$0xff]  }
 0x36c   :  { %5725 = vmatpush1.bf16.msra.mxu1 %v7646_v2  ;;  %v7684_v2 = vld [vmem:[#allocation12 + $0x49c] ss:$28 sps:$4 sm:$0xff]  }
 0x36d   :  { %5897 = vmatpush1.bf16.msra.mxu0 %v7649_v3  ;;  %5737 = vmatprep.subr.bf16.mxu1 %v7654_v31  ;;  %v7687_v3 = vld [vmem:[#allocation12 + $0x4a4] ss:$28 sps:$4 sm:$0xff]   ;;  %v7682_v31 = vld [vmem:[#allocation12 + $0x498] ss:$28 sps:$4 sm:$0xff]  }
 0x36e   :  { %5909 = vmatprep.subr.bf16.mxu0 %v7657_v4  ;;  %v7685_v4 = vld [vmem:[#allocation12 + $0x4a0] ss:$28 sps:$4 sm:$0xff]  }
 0x382   :  { %v2519_v57 = vpop.f32.mrb[0].mxu1  ;;  %v2605_v13 = vpop.f32.mrb[12].mxu0 }
 0x383   :  { %v7338_v14 = vadd.f32 %v2519_v57, %v1133_v10  ;;  %v7342_v16 = vadd.f32 %v2605_v13, %v1141_v11  ;;  %v2521_v17 = vpop.f32.mrb[1].mxu1  ;;  %v2607_v21 = vpop.f32.mrb[13].mxu0  ;;  %v7705_v57 = vld [vmem:[#allocation12 + $0x54c] ss:$28 sps:$4 sm:$0xff]   ;;  %v7700_v13 = vld [vmem:[#allocation12 + $0x540] ss:$28 sps:$4 sm:$0xff]  }
 0x384   :  { %v7339_v23 = vadd.f32 %v2521_v17, %v1137_v12  ;;  %v7343_v26 = vadd.f32 %v2607_v21, %v1145_v42  ;;  %v2523_v27 = vpop.f32.mrb[2].mxu1  ;;  %v2609_v46 = vpop.f32.mrb[14].mxu0  ;;  %v7711_v17 = vld [vmem:[#allocation12 + $0x584] ss:$28 sps:$4 sm:$0xff]   ;;  %v7706_v21 = vld [vmem:[#allocation12 + $0x578] ss:$28 sps:$4 sm:$0xff]  }
 0x385   :  { %v7340_v28 = vadd.f32 %v2523_v27, %v1133_v10  ;;  %v7344_v29 = vadd.f32 %v2609_v46, %v1141_v11  ;;  %v2525_v30 = vpop.f32.mrb[3].mxu1  ;;  %v2611_v32 = vpop.f32.mrb[15].mxu0  ;;  %v2786_v35 = vmax.f32 %v7338_v14, 0.0  ;;  %v2788_v36 = vmax.f32 %v7342_v16, 0.0  ;;  %v7699_v10 = vld [vmem:[#allocation12 + $0x514] ss:$28 sps:$4 sm:$0xff]  }
 0x386   :  { %v7341_v33 = vadd.f32 %v2525_v30, %v1137_v12  ;;  %v7345_v34 = vadd.f32 %v2611_v32, %v1145_v42  ;;  %v2787_v18 = vmax.f32 %v7339_v23, 0.0  ;;  %v2789_v19 = vmax.f32 %v7343_v26, 0.0  ;;  %v7694_v11 = vld [vmem:[#allocation12 + $0x508] ss:$28 sps:$4 sm:$0xff]   ;;  %v7697_v12 = vld [vmem:[#allocation12 + $0x510] ss:$28 sps:$4 sm:$0xff]  }
 0x387   :  { %v2794_v38 = vmax.f32 %v7340_v28, 0.0  ;;  %v2796_v40 = vmax.f32 %v7344_v29, 0.0  ;;  %v7702_v42 = vld [vmem:[#allocation12 + $0x544] ss:$28 sps:$4 sm:$0xff]   ;;  %v7708_v16 = vld [vmem:[#allocation12 + $0x57c] ss:$28 sps:$4 sm:$0xff]  }
 0x388   :  { %v2795_v20 = vmax.f32 %v7341_v33, 0.0  ;;  %v2797_v22 = vmax.f32 %v7345_v34, 0.0  ;;  %v7703_v14 = vld [vmem:[#allocation12 + $0x548] ss:$28 sps:$4 sm:$0xff]   ;;  %v7709_v23 = vld [vmem:[#allocation12 + $0x580] ss:$28 sps:$4 sm:$0xff]  }
 0x389   :  { %v8676_v24 = vpack.c.bf16 %v2794_v38, %v2786_v35  ;;  %v8678_v25 = vpack.c.bf16 %v2796_v40, %v2788_v36  ;;  %v7714_v26 = vld [vmem:[#allocation12 + $0x5b4] ss:$28 sps:$4 sm:$0xff]   ;;  %v7717_v27 = vld [vmem:[#allocation12 + $0x5bc] ss:$28 sps:$4 sm:$0xff]   ;;  %v7720_v29 = vld [vmem:[#allocation12 + $0x5ec] ss:$28 sps:$4 sm:$0xff]  }
 0x38a   :  { %v8680_v41 = vpack.c.bf16 %v2795_v20, %v2787_v18  ;;  %v8682_v43 = vpack.c.bf16 %v2797_v22, %v2789_v19  ;;  %v7712_v46 = vld [vmem:[#allocation12 + $0x5b0] ss:$28 sps:$4 sm:$0xff]   ;;  %v7715_v28 = vld [vmem:[#allocation12 + $0x5b8] ss:$28 sps:$4 sm:$0xff]   ;;  %v7718_v32 = vld [vmem:[#allocation12 + $0x5e8] ss:$28 sps:$4 sm:$0xff]  }
 0x38b   :  { %v7723_v30 = vld [vmem:[#allocation12 + $0x5f4] ss:$28 sps:$4 sm:$0xff]   ;;  %v7726_v34 = vld [vmem:[#allocation12 + $0x624] ss:$28 sps:$4 sm:$0xff]   ;;  %v7729_v35 = vld [vmem:[#allocation12 + $0x62c] ss:$28 sps:$4 sm:$0xff]  }
 0x38c   :  { %5726 = vmatprep.mubr.bf16.mxu1 %v8680_v41  ;;  %5898 = vmatprep.mubr.bf16.mxu0 %v8680_v41  ;;  %v7721_v33 = vld [vmem:[#allocation12 + $0x5f0] ss:$28 sps:$4 sm:$0xff]   ;;  %v7724_v36 = vld [vmem:[#allocation12 + $0x620] ss:$28 sps:$4 sm:$0xff]   ;;  %v7727_v38 = vld [vmem:[#allocation12 + $0x628] ss:$28 sps:$4 sm:$0xff]  }
 0x38d   :  { %5727 = vmatmul.mubr.bf16.vlgmr.msra.gmra.mrb[8].mxu1 %v8676_v24  ;;  %5899 = vmatmul.mubr.bf16.vlgmr.msra.gmra.mrb[20].mxu0 %v8676_v24  ;;  %v7732_v40 = vld [vmem:[#allocation12 + $0x65c] ss:$28 sps:$4 sm:$0xff]   ;;  %v7735_v18 = vld [vmem:[#allocation12 + $0x664] ss:$28 sps:$4 sm:$0xff]   ;;  %v7738_v22 = vld [vmem:[#allocation12 + $0x694] ss:$28 sps:$4 sm:$0xff]  }
 0x38e   :  { %5738 = vmatpush1.bf16.msra.mxu1 %v7652_v44  ;;  %5910 = vmatpush1.bf16.msra.mxu0 %v7655_v45  ;;  %v7730_v19 = vld [vmem:[#allocation12 + $0x658] ss:$28 sps:$4 sm:$0xff]   ;;  %v7733_v20 = vld [vmem:[#allocation12 + $0x660] ss:$28 sps:$4 sm:$0xff]   ;;  %v7736_v45 = vld [vmem:[#allocation12 + $0x690] ss:$28 sps:$4 sm:$0xff]  }
 0x38f   :  { %5769 = vmatprep.mubr.bf16.mxu1 %v8682_v43  ;;  %5941 = vmatprep.mubr.bf16.mxu0 %v8682_v43  ;;  %v7741_v44 = vld [vmem:[#allocation12 + $0x69c] ss:$28 sps:$4 sm:$0xff]  }
 0x390   :  { %5739 = vmatprep.subr.bf16.mxu1 %v7660_v47  ;;  %5911 = vmatprep.subr.bf16.mxu0 %v7663_v48  ;;  %v7739_v47 = vld [vmem:[#allocation12 + $0x698] ss:$28 sps:$4 sm:$0xff]   ;;  %v7744_v48 = vld [vmem:[#allocation12 + $0x6cc] ss:$28 sps:$4 sm:$0xff]  }
 0x392   :  { %5740 = vmatpush1.bf16.msra.mxu1 %v7658_v49  ;;  %5912 = vmatpush1.bf16.msra.mxu0 %v7661_v50  ;;  %v7747_v49 = vld [vmem:[#allocation12 + $0x6d4] ss:$28 sps:$4 sm:$0xff]   ;;  %v7742_v50 = vld [vmem:[#allocation12 + $0x6c8] ss:$28 sps:$4 sm:$0xff]  }
 0x393   :  { %5741 = vmatprep.subr.bf16.mxu1 %v7666_v51  ;;  %5913 = vmatprep.subr.bf16.mxu0 %v7669_v53  ;;  %v7745_v51 = vld [vmem:[#allocation12 + $0x6d0] ss:$28 sps:$4 sm:$0xff]   ;;  %v7750_v53 = vld [vmem:[#allocation12 + $0x704] ss:$28 sps:$4 sm:$0xff]  }
 0x396   :  { %5742 = vmatpush1.bf16.msra.mxu1 %v7664_v54  ;;  %5914 = vmatpush1.bf16.msra.mxu0 %v7667_v55  ;;  %v7753_v54 = vld [vmem:[#allocation12 + $0x70c] ss:$28 sps:$4 sm:$0xff]   ;;  %v7748_v55 = vld [vmem:[#allocation12 + $0x700] ss:$28 sps:$4 sm:$0xff]  }
 0x397   :  { %5743 = vmatprep.subr.bf16.mxu1 %v7672_v58  ;;  %5915 = vmatprep.subr.bf16.mxu0 %v7675_v59  ;;  %v7751_v58 = vld [vmem:[#allocation12 + $0x708] ss:$28 sps:$4 sm:$0xff]   ;;  %v7756_v59 = vld [vmem:[#allocation12 + $0x73c] ss:$28 sps:$4 sm:$0xff]  }
 0x39a   :  { %5744 = vmatpush1.bf16.msra.mxu1 %v7670_v60  ;;  %5916 = vmatpush1.bf16.msra.mxu0 %v7673_v61  ;;  %v7759_v60 = vld [vmem:[#allocation12 + $0x744] ss:$28 sps:$4 sm:$0xff]   ;;  %v7754_v61 = vld [vmem:[#allocation12 + $0x738] ss:$28 sps:$4 sm:$0xff]  }
 0x39b   :  { %5745 = vmatprep.subr.bf16.mxu1 %v7678_v62  ;;  %5917 = vmatprep.subr.bf16.mxu0 %v7681_v63  ;;  %v7757_v62 = vld [vmem:[#allocation12 + $0x740] ss:$28 sps:$4 sm:$0xff]   ;;  %v7762_v63 = vld [vmem:[#allocation12 + $0x774] ss:$28 sps:$4 sm:$0xff]  }
 0x39e   :  { %5746 = vmatpush1.bf16.msra.mxu1 %v7676_v0  ;;  %5918 = vmatpush1.bf16.msra.mxu0 %v7679_v1  ;;  %v7765_v0 = vld [vmem:[#allocation12 + $0x77c] ss:$28 sps:$4 sm:$0xff]   ;;  %v7760_v1 = vld [vmem:[#allocation12 + $0x770] ss:$28 sps:$4 sm:$0xff]  }
 0x39f   :  { %5747 = vmatprep.subr.bf16.mxu1 %v7684_v2  ;;  %5919 = vmatprep.subr.bf16.mxu0 %v7687_v3  ;;  %v7763_v2 = vld [vmem:[#allocation12 + $0x778] ss:$28 sps:$4 sm:$0xff]   ;;  %v7768_v3 = vld [vmem:[#allocation12 + $0x7ac] ss:$28 sps:$4 sm:$0xff]  }
 0x3a2   :  { %5748 = vmatpush1.bf16.msra.mxu1 %v7682_v31  ;;  %5920 = vmatpush1.bf16.msra.mxu0 %v7685_v4  ;;  %v7771_v31 = vld [vmem:[#allocation12 + $0x7b4] ss:$28 sps:$4 sm:$0xff]   ;;  %v7766_v4 = vld [vmem:[#allocation12 + $0x7a8] ss:$28 sps:$4 sm:$0xff]  }
 0x3a3   :  { %5749 = vmatprep.subr.bf16.mxu1 %v7690_v6  ;;  %5921 = vmatprep.subr.bf16.mxu0 %v7693_v15  ;;  %v7769_v6 = vld [vmem:[#allocation12 + $0x7b0] ss:$28 sps:$4 sm:$0xff]   ;;  %v7774_v15 = vld [vmem:[#allocation12 + $0x7e4] ss:$28 sps:$4 sm:$0xff]  }
 0x3a6   :  { %5750 = vmatpush1.bf16.msra.mxu1 %v7688_v7  ;;  %5922 = vmatpush1.bf16.msra.mxu0 %v7691_v8  ;;  %v7777_v7 = vld [vmem:[#allocation12 + $0x7ec] ss:$28 sps:$4 sm:$0xff]   ;;  %v7772_v8 = vld [vmem:[#allocation12 + $0x7e0] ss:$28 sps:$4 sm:$0xff]  }
 0x3a7   :  { %5751 = vmatprep.subr.bf16.mxu1 %v7696_v9  ;;  %5923 = vmatprep.subr.bf16.mxu0 %v7699_v10  ;;  %v7775_v9 = vld [vmem:[#allocation12 + $0x7e8] ss:$28 sps:$4 sm:$0xff]   ;;  %v7780_v10 = vld [vmem:[#allocation12 + $0x81c] ss:$28 sps:$4 sm:$0xff]  }
 0x3aa   :  { %5752 = vmatpush1.bf16.msra.mxu1 %v7694_v11  ;;  %5924 = vmatpush1.bf16.msra.mxu0 %v7697_v12  ;;  %v7783_v11 = vld [vmem:[#allocation12 + $0x824] ss:$28 sps:$4 sm:$0xff]   ;;  %v7778_v12 = vld [vmem:[#allocation12 + $0x818] ss:$28 sps:$4 sm:$0xff]  }
 0x3ab   :  { %5753 = vmatprep.subr.bf16.mxu1 %v7702_v42  ;;  %5925 = vmatprep.subr.bf16.mxu0 %v7705_v57  ;;  %v7781_v42 = vld [vmem:[#allocation12 + $0x820] ss:$28 sps:$4 sm:$0xff]   ;;  %v7786_v57 = vld [vmem:[#allocation12 + $0x854] ss:$28 sps:$4 sm:$0xff]  }
 0x3ae   :  { %5754 = vmatpush1.bf16.msra.mxu1 %v7700_v13  ;;  %5926 = vmatpush1.bf16.msra.mxu0 %v7703_v14  ;;  %v7789_v13 = vld [vmem:[#allocation12 + $0x85c] ss:$28 sps:$4 sm:$0xff]   ;;  %v7784_v14 = vld [vmem:[#allocation12 + $0x850] ss:$28 sps:$4 sm:$0xff]  }
 0x3af   :  { %5755 = vmatprep.subr.bf16.mxu1 %v7708_v16  ;;  %5927 = vmatprep.subr.bf16.mxu0 %v7711_v17  ;;  %v7787_v16 = vld [vmem:[#allocation12 + $0x858] ss:$28 sps:$4 sm:$0xff]   ;;  %v7792_v17 = vld [vmem:[#allocation12 + $0x88c] ss:$28 sps:$4 sm:$0xff]  }
 0x3b2   :  { %5756 = vmatpush1.bf16.msra.mxu1 %v7706_v21  ;;  %5928 = vmatpush1.bf16.msra.mxu0 %v7709_v23  ;;  %v7795_v21 = vld [vmem:[#allocation12 + $0x894] ss:$28 sps:$4 sm:$0xff]   ;;  %v7790_v23 = vld [vmem:[#allocation12 + $0x888] ss:$28 sps:$4 sm:$0xff]  }
 0x3b3   :  { %5757 = vmatprep.subr.bf16.mxu1 %v7714_v26  ;;  %5929 = vmatprep.subr.bf16.mxu0 %v7717_v27  ;;  %v7793_v26 = vld [vmem:[#allocation12 + $0x890] ss:$28 sps:$4 sm:$0xff]   ;;  %v7798_v27 = vld [vmem:[#allocation12 + $0x8c4] ss:$28 sps:$4 sm:$0xff]  }
 0x3b6   :  { %5758 = vmatpush1.bf16.msra.mxu1 %v7712_v46  ;;  %5930 = vmatpush1.bf16.msra.mxu0 %v7715_v28  ;;  %v7801_v46 = vld [vmem:[#allocation12 + $0x8cc] ss:$28 sps:$4 sm:$0xff]   ;;  %v7796_v28 = vld [vmem:[#allocation12 + $0x8c0] ss:$28 sps:$4 sm:$0xff]  }
 0x3b7   :  { %5759 = vmatprep.subr.bf16.mxu1 %v7720_v29  ;;  %5931 = vmatprep.subr.bf16.mxu0 %v7723_v30  ;;  %v7799_v29 = vld [vmem:[#allocation12 + $0x8c8] ss:$28 sps:$4 sm:$0xff]   ;;  %v7804_v30 = vld [vmem:[#allocation12 + $0x8fc] ss:$28 sps:$4 sm:$0xff]  }
 0x3ba   :  { %5760 = vmatpush1.bf16.msra.mxu1 %v7718_v32  ;;  %5932 = vmatpush1.bf16.msra.mxu0 %v7721_v33  ;;  %v7807_v32 = vld [vmem:[#allocation12 + $0x904] ss:$28 sps:$4 sm:$0xff]   ;;  %v7802_v33 = vld [vmem:[#allocation12 + $0x8f8] ss:$28 sps:$4 sm:$0xff]  }
 0x3bb   :  { %5761 = vmatprep.subr.bf16.mxu1 %v7726_v34  ;;  %5933 = vmatprep.subr.bf16.mxu0 %v7729_v35  ;;  %v7805_v34 = vld [vmem:[#allocation12 + $0x900] ss:$28 sps:$4 sm:$0xff]   ;;  %v7810_v35 = vld [vmem:[#allocation12 + $0x934] ss:$28 sps:$4 sm:$0xff]  }
 0x3be   :  { %5762 = vmatpush1.bf16.msra.mxu1 %v7724_v36  ;;  %5934 = vmatpush1.bf16.msra.mxu0 %v7727_v38  ;;  %v7813_v36 = vld [vmem:[#allocation12 + $0x93c] ss:$28 sps:$4 sm:$0xff]   ;;  %v7808_v38 = vld [vmem:[#allocation12 + $0x930] ss:$28 sps:$4 sm:$0xff]  }
 0x3bf   :  { %5763 = vmatprep.subr.bf16.mxu1 %v7732_v40  ;;  %5935 = vmatprep.subr.bf16.mxu0 %v7735_v18  ;;  %v7811_v40 = vld [vmem:[#allocation12 + $0x938] ss:$28 sps:$4 sm:$0xff]   ;;  %v7816_v18 = vld [vmem:[#allocation12 + $0x96c] ss:$28 sps:$4 sm:$0xff]  }
 0x3c2   :  { %5764 = vmatpush1.bf16.msra.mxu1 %v7730_v19  ;;  %5936 = vmatpush1.bf16.msra.mxu0 %v7733_v20  ;;  %v7819_v19 = vld [vmem:[#allocation12 + $0x974] ss:$28 sps:$4 sm:$0xff]   ;;  %v7814_v20 = vld [vmem:[#allocation12 + $0x968] ss:$28 sps:$4 sm:$0xff]  }
 0x3c3   :  { %5765 = vmatprep.subr.bf16.mxu1 %v7738_v22  ;;  %5937 = vmatprep.subr.bf16.mxu0 %v7741_v44  ;;  %v7817_v22 = vld [vmem:[#allocation12 + $0x970] ss:$28 sps:$4 sm:$0xff]   ;;  %v7822_v44 = vld [vmem:[#allocation12 + $0x9a4] ss:$28 sps:$4 sm:$0xff]  }
 0x3c6   :  { %5766 = vmatpush1.bf16.msra.mxu1 %v7736_v45  ;;  %5938 = vmatpush1.bf16.msra.mxu0 %v7739_v47  ;;  %v7825_v45 = vld [vmem:[#allocation12 + $0x9ac] ss:$28 sps:$4 sm:$0xff]   ;;  %v1087_v47 = vunpack.c.h.bf16 %v8665_v5  ;;  %v7829_v5 = vld [vmem:[#allocation12 + $0x9e0] ss:$28 sps:$4 sm:$0xff]  }
 0x3c7   :  { %5767 = vmatprep.subr.bf16.mxu1 %v7744_v48  ;;  %5939 = vmatprep.subr.bf16.mxu0 %v7747_v49  ;;  %v7820_v48 = vld [vmem:[#allocation12 + $0x9a0] ss:$28 sps:$4 sm:$0xff]   ;;  %v7823_v49 = vld [vmem:[#allocation12 + $0x9a8] ss:$28 sps:$4 sm:$0xff]  }
 0x3ca   :  { %5768 = vmatpush1.bf16.msra.mxu1 %v7742_v50  ;;  %5940 = vmatpush1.bf16.msra.mxu0 %v7745_v51  ;;  %v7828_v50 = vld [vmem:[#allocation12 + $0x9dc] ss:$28 sps:$4 sm:$0xff]   ;;  %v7831_v51 = vld [vmem:[#allocation12 + $0x9e4] ss:$28 sps:$4 sm:$0xff]  }
 0x3cb   :  { %5780 = vmatprep.subr.bf16.mxu1 %v7750_v53  ;;  %5952 = vmatprep.subr.bf16.mxu0 %v7753_v54  ;;  %v1109_v53 = vrot.slane %v1087_v47, %v8586_v37  ;;  %v1117_v54 = vrot.slane %v1087_v47, %v8638_v52 }
 0x3cd   :  { %5770 = vmatmul.mubr.bf16.vlgmr.msra.gmra.mrb[8].mxu1 %v8678_v25  ;;  %5942 = vmatmul.mubr.bf16.vlgmr.msra.gmra.mrb[20].mxu0 %v8678_v25 }
 0x3ce   :  { %5781 = vmatpush1.bf16.msra.mxu1 %v7748_v55  ;;  %5953 = vmatpush1.bf16.msra.mxu0 %v7751_v58  ;;  %v1113_v55 = vrot.slane %v1087_v47, %v8589_v39  ;;  %v1121_v58 = vrot.slane %v1087_v47, %v8641_v56  ;;  %v7855_v47 = vld [vmem:[#allocation12 + $0xac4] ss:$28 sps:$4 sm:$0xff]  }
 0x3cf   :  { %5782 = vmatprep.subr.bf16.mxu1 %v7756_v59  ;;  %5954 = vmatprep.subr.bf16.mxu0 %v7759_v60  ;;  %v7826_v59 = vld [vmem:[#allocation12 + $0x9d8] ss:$28 sps:$4 sm:$0xff]   ;;  %v1149_v60 = vrot.slane %v1109_v53, %v8586_v37  ;;  %v7856_v53 = vld [vmem:[#allocation12 + $0xaf0] ss:$28 sps:$4 sm:$0xff]  }
 0x3d2   :  { %5783 = vmatpush1.bf16.msra.mxu1 %v7754_v61  ;;  %5955 = vmatpush1.bf16.msra.mxu0 %v7757_v62  ;;  %v7834_v61 = vld [vmem:[#allocation12 + $0xa14] ss:$28 sps:$4 sm:$0xff]   ;;  %v7837_v62 = vld [vmem:[#allocation12 + $0xa1c] ss:$28 sps:$4 sm:$0xff]  }
 0x3d3   :  { %5784 = vmatprep.subr.bf16.mxu1 %v7762_v63  ;;  %5956 = vmatprep.subr.bf16.mxu0 %v7765_v0  ;;  %v1157_v63 = vrot.slane %v1117_v54, %v8586_v37  ;;  %v1153_v0 = vrot.slane %v1113_v55, %v8586_v37  ;;  %v7859_v54 = vld [vmem:[#allocation12 + $0xaf8] ss:$28 sps:$4 sm:$0xff]   ;;  %v7864_v55 = vld [vmem:[#allocation12 + $0xb2c] ss:$28 sps:$4 sm:$0xff]  }
 0x3d6   :  { %5785 = vmatpush1.bf16.msra.mxu1 %v7760_v1  ;;  %5957 = vmatpush1.bf16.msra.mxu0 %v7763_v2  ;;  %v1161_v1 = vrot.slane %v1121_v58, %v8586_v37  ;;  %v7867_v58 = vld [vmem:[#allocation12 + $0xb34] ss:$28 sps:$4 sm:$0xff]  }
 0x3d7   :  { %5786 = vmatprep.subr.bf16.mxu1 %v7768_v3  ;;  %5958 = vmatprep.subr.bf16.mxu0 %v7771_v31  ;;  %v7832_v3 = vld [vmem:[#allocation12 + $0xa10] ss:$28 sps:$4 sm:$0xff]   ;;  %v7835_v31 = vld [vmem:[#allocation12 + $0xa18] ss:$28 sps:$4 sm:$0xff]  }
 0x3da   :  { %5787 = vmatpush1.bf16.msra.mxu1 %v7766_v4  ;;  %5959 = vmatpush1.bf16.msra.mxu0 %v7769_v6 }
 0x3db   :  { %5788 = vmatprep.subr.bf16.mxu1 %v7774_v15  ;;  %5960 = vmatprep.subr.bf16.mxu0 %v7777_v7  ;;  %v7840_v7 = vld [vmem:[#allocation12 + $0xa4c] ss:$28 sps:$4 sm:$0xff]  }
 0x3de   :  { %5789 = vmatpush1.bf16.msra.mxu1 %v7772_v8  ;;  %5961 = vmatpush1.bf16.msra.mxu0 %v7775_v9  ;;  %v7843_v8 = vld [vmem:[#allocation12 + $0xa54] ss:$28 sps:$4 sm:$0xff]  }
 0x3df   :  { %5790 = vmatprep.subr.bf16.mxu1 %v7780_v10  ;;  %5962 = vmatprep.subr.bf16.mxu0 %v7783_v11 }
 0x3e2   :  { %5791 = vmatpush1.bf16.msra.mxu1 %v7778_v12  ;;  %5963 = vmatpush1.bf16.msra.mxu0 %v7781_v42 }
 0x3e3   :  { %5792 = vmatprep.subr.bf16.mxu1 %v7786_v57  ;;  %5964 = vmatprep.subr.bf16.mxu0 %v7789_v13 }
 0x3e6   :  { %5793 = vmatpush1.bf16.msra.mxu1 %v7784_v14  ;;  %5965 = vmatpush1.bf16.msra.mxu0 %v7787_v16 }
 0x3e7   :  { %5794 = vmatprep.subr.bf16.mxu1 %v7792_v17  ;;  %5966 = vmatprep.subr.bf16.mxu0 %v7795_v21 }
 0x3ea   :  { %5795 = vmatpush1.bf16.msra.mxu1 %v7790_v23  ;;  %5967 = vmatpush1.bf16.msra.mxu0 %v7793_v26  ;;  %v7838_v23 = vld [vmem:[#allocation12 + $0xa48] ss:$28 sps:$4 sm:$0xff]   ;;  %v7841_v26 = vld [vmem:[#allocation12 + $0xa50] ss:$28 sps:$4 sm:$0xff]  }
 0x3eb   :  { %5796 = vmatprep.subr.bf16.mxu1 %v7798_v27  ;;  %5968 = vmatprep.subr.bf16.mxu0 %v7801_v46 }
 0x3ee   :  { %5797 = vmatpush1.bf16.msra.mxu1 %v7796_v28  ;;  %5969 = vmatpush1.bf16.msra.mxu0 %v7799_v29  ;;  %v7846_v29 = vld [vmem:[#allocation12 + $0xa84] ss:$28 sps:$4 sm:$0xff]  }
 0x3ef   :  { %5798 = vmatprep.subr.bf16.mxu1 %v7804_v30  ;;  %5970 = vmatprep.subr.bf16.mxu0 %v7807_v32  ;;  %v7849_v30 = vld [vmem:[#allocation12 + $0xa8c] ss:$28 sps:$4 sm:$0xff]  }
 0x3f2   :  { %5799 = vmatpush1.bf16.msra.mxu1 %v7802_v33  ;;  %5971 = vmatpush1.bf16.msra.mxu0 %v7805_v34 }
 0x3f3   :  { %5800 = vmatprep.subr.bf16.mxu1 %v7810_v35  ;;  %5972 = vmatprep.subr.bf16.mxu0 %v7813_v36 }
 0x3f6   :  { %5801 = vmatpush1.bf16.msra.mxu1 %v7808_v38  ;;  %5973 = vmatpush1.bf16.msra.mxu0 %v7811_v40 }
 0x3f7   :  { %5802 = vmatprep.subr.bf16.mxu1 %v7816_v18  ;;  %5974 = vmatprep.subr.bf16.mxu0 %v7819_v19 }
 0x3fa   :  { %5803 = vmatpush1.bf16.msra.mxu1 %v7814_v20  ;;  %5975 = vmatpush1.bf16.msra.mxu0 %v7817_v22  ;;  %v7844_v20 = vld [vmem:[#allocation12 + $0xa80] ss:$28 sps:$4 sm:$0xff]   ;;  %v7847_v22 = vld [vmem:[#allocation12 + $0xa88] ss:$28 sps:$4 sm:$0xff]  }
 0x3fb   :  { %5804 = vmatprep.subr.bf16.mxu1 %v7822_v44  ;;  %5976 = vmatprep.subr.bf16.mxu0 %v7825_v45  ;;  %v7852_v45 = vld [vmem:[#allocation12 + $0xabc] ss:$28 sps:$4 sm:$0xff]  }
 0x3fe   :  { %5805 = vmatpush1.bf16.msra.mxu1 %v7820_v48  ;;  %5977 = vmatpush1.bf16.msra.mxu0 %v7823_v49  ;;  %v7850_v48 = vld [vmem:[#allocation12 + $0xab8] ss:$28 sps:$4 sm:$0xff]   ;;  %v7853_v49 = vld [vmem:[#allocation12 + $0xac0] ss:$28 sps:$4 sm:$0xff]  }
 0x3ff   :  { %5806 = vmatprep.subr.bf16.mxu1 %v7828_v50  ;;  %5978 = vmatprep.subr.bf16.mxu0 %v7831_v51  ;;  %v7858_v50 = vld [vmem:[#allocation12 + $0xaf4] ss:$28 sps:$4 sm:$0xff]   ;;  %v7861_v51 = vld [vmem:[#allocation12 + $0xafc] ss:$28 sps:$4 sm:$0xff]  }
 0x402   :  { %5807 = vmatpush1.bf16.msra.mxu1 %v7826_v59  ;;  %5979 = vmatpush1.bf16.msra.mxu0 %v7829_v5  ;;  %v2691_v2 = vpop.f32.mrb[4].mxu1  ;;  %v7862_v59 = vld [vmem:[#allocation12 + $0xb28] ss:$28 sps:$4 sm:$0xff]   ;;  %v7865_v5 = vld [vmem:[#allocation12 + $0xb30] ss:$28 sps:$4 sm:$0xff]  }
 0x403   :  { %v7346_v4 = vadd.f32 %v2691_v2, %v1149_v60  ;;  %v2777_v6 = vpop.f32.mrb[16].mxu0  ;;  %v2693_v15 = vpop.f32.mrb[5].mxu1  ;;  %5808 = vmatprep.subr.bf16.mxu1 %v7834_v61  ;;  %5980 = vmatprep.subr.bf16.mxu0 %v7837_v62  ;;  %v7873_v61 = vld [vmem:[#allocation12 + $0xb6c] ss:$28 sps:$4 sm:$0xff]   ;;  %v7868_v62 = vld [vmem:[#allocation12 + $0xb60] ss:$28 sps:$4 sm:$0xff]  }
 0x404   :  { %v7350_v9 = vadd.f32 %v2777_v6, %v1157_v63  ;;  %v7347_v10 = vadd.f32 %v2693_v15, %v1153_v0  ;;  %v2779_v11 = vpop.f32.mrb[17].mxu0  ;;  %v2695_v12 = vpop.f32.mrb[6].mxu1  ;;  %v7874_v2 = vld [vmem:[#allocation12 + $0xb98] ss:$28 sps:$4 sm:$0xff]   ;;  %v7880_v6 = vld [vmem:[#allocation12 + $0xbd0] ss:$28 sps:$4 sm:$0xff]  }
 0x405   :  { %v7351_v42 = vadd.f32 %v2779_v11, %v1161_v1  ;;  %v7348_v57 = vadd.f32 %v2695_v12, %v1149_v60  ;;  %v2781_v13 = vpop.f32.mrb[18].mxu0  ;;  %v2697_v14 = vpop.f32.mrb[7].mxu1  ;;  %v2790_v27 = vmax.f32 %v7346_v4, 0.0  ;;  %v7870_v60 = vld [vmem:[#allocation12 + $0xb64] ss:$28 sps:$4 sm:$0xff]  }
 0x406   :  { %v7352_v16 = vadd.f32 %v2781_v13, %v1157_v63  ;;  %v7349_v17 = vadd.f32 %v2697_v14, %v1153_v0  ;;  %v2783_v21 = vpop.f32.mrb[19].mxu0  ;;  %5809 = vmatpush1.bf16.msra.mxu1 %v7832_v3  ;;  %5981 = vmatpush1.bf16.msra.mxu0 %v7835_v31  ;;  %v2792_v32 = vmax.f32 %v7350_v9, 0.0  ;;  %v2791_v33 = vmax.f32 %v7347_v10, 0.0  ;;  %v7871_v63 = vld [vmem:[#allocation12 + $0xb68] ss:$28 sps:$4 sm:$0xff]  }
 0x407   :  { %v2798_v46 = vmax.f32 %v7348_v57, 0.0  ;;  %v7353_v28 = vadd.f32 %v2783_v21, %v1161_v1  ;;  %5810 = vmatprep.subr.bf16.mxu1 %v7840_v7  ;;  %5982 = vmatprep.subr.bf16.mxu0 %v7843_v8  ;;  %v2793_v36 = vmax.f32 %v7351_v42, 0.0  ;;  %v7876_v0 = vld [vmem:[#allocation12 + $0xb9c] ss:$28 sps:$4 sm:$0xff]   ;;  %v7879_v1 = vld [vmem:[#allocation12 + $0xba4] ss:$28 sps:$4 sm:$0xff]  }
 0x408   :  { %v2800_v34 = vmax.f32 %v7352_v16, 0.0  ;;  %v2799_v35 = vmax.f32 %v7349_v17, 0.0  ;;  %v7877_v3 = vld [vmem:[#allocation12 + $0xba0] ss:$28 sps:$4 sm:$0xff]   ;;  %v7882_v31 = vld [vmem:[#allocation12 + $0xbd4] ss:$28 sps:$4 sm:$0xff]  }
 0x409   :  { %v8701_v38 = vpack.c.bf16 %v2798_v46, %v2790_v27  ;;  %v2801_v40 = vmax.f32 %v7353_v28, 0.0  ;;  %v7885_v4 = vld [vmem:[#allocation12 + $0xbdc] ss:$28 sps:$4 sm:$0xff]   ;;  %v7888_v7 = vld [vmem:[#allocation12 + $0xc0c] ss:$28 sps:$4 sm:$0xff]  }
 0x40a   :  { %v8703_v18 = vpack.c.bf16 %v2800_v34, %v2792_v32  ;;  %v8705_v19 = vpack.c.bf16 %v2799_v35, %v2791_v33  ;;  %5811 = vmatpush1.bf16.msra.mxu1 %v7838_v23  ;;  %5983 = vmatpush1.bf16.msra.mxu0 %v7841_v26  ;;  %v7883_v15 = vld [vmem:[#allocation12 + $0xbd8] ss:$28 sps:$4 sm:$0xff]   ;;  %v7886_v9 = vld [vmem:[#allocation12 + $0xc08] ss:$28 sps:$4 sm:$0xff]   ;;  %v7889_v10 = vld [vmem:[#allocation12 + $0xc10] ss:$28 sps:$4 sm:$0xff]  }
 0x40b   :  { %v8707_v44 = vpack.c.bf16 %v2801_v40, %v2793_v36  ;;  %5823 = vmatprep.subr.bf16.mxu1 %v7846_v29  ;;  %5995 = vmatprep.subr.bf16.mxu0 %v7849_v30  ;;  %v7891_v8 = vld [vmem:[#allocation12 + $0xc14] ss:$28 sps:$4 sm:$0xff]   ;;  %v7894_v11 = vld [vmem:[#allocation12 + $0xc44] ss:$28 sps:$4 sm:$0xff]   ;;  %v7897_v12 = vld [vmem:[#allocation12 + $0xc4c] ss:$28 sps:$4 sm:$0xff]  }
 0x40c   :  { %5812 = vmatprep.mubr.bf16.mxu1 %v8705_v19  ;;  %5984 = vmatprep.mubr.bf16.mxu0 %v8705_v19  ;;  %v7892_v42 = vld [vmem:[#allocation12 + $0xc40] ss:$28 sps:$4 sm:$0xff]   ;;  %v7895_v57 = vld [vmem:[#allocation12 + $0xc48] ss:$28 sps:$4 sm:$0xff]   ;;  %v7898_v16 = vld [vmem:[#allocation12 + $0xc78] ss:$28 sps:$4 sm:$0xff]  }
 0x40d   :  { %5813 = vmatmul.mubr.bf16.vlgmr.msra.gmra.mrb[8].mxu1 %v8701_v38  ;;  %5985 = vmatmul.mubr.bf16.vlgmr.msra.gmra.mrb[20].mxu0 %v8701_v38  ;;  %v7900_v13 = vld [vmem:[#allocation12 + $0xc7c] ss:$28 sps:$4 sm:$0xff]   ;;  %v7903_v14 = vld [vmem:[#allocation12 + $0xc84] ss:$28 sps:$4 sm:$0xff]   ;;  %v7906_v21 = vld [vmem:[#allocation12 + $0xcb4] ss:$28 sps:$4 sm:$0xff]  }
 0x40e   :  { %5824 = vmatpush1.bf16.msra.mxu1 %v7844_v20  ;;  %5996 = vmatpush1.bf16.msra.mxu0 %v7847_v22  ;;  %v7901_v17 = vld [vmem:[#allocation12 + $0xc80] ss:$28 sps:$4 sm:$0xff]   ;;  %v7904_v26 = vld [vmem:[#allocation12 + $0xcb0] ss:$28 sps:$4 sm:$0xff]   ;;  %v7907_v27 = vld [vmem:[#allocation12 + $0xcb8] ss:$28 sps:$4 sm:$0xff]  }
 0x40f   :  { %5855 = vmatprep.mubr.bf16.mxu1 %v8707_v44  ;;  %6027 = vmatprep.mubr.bf16.mxu0 %v8707_v44  ;;  %v7909_v23 = vld [vmem:[#allocation12 + $0xcbc] ss:$28 sps:$4 sm:$0xff]   ;;  %v7912_v46 = vld [vmem:[#allocation12 + $0xcec] ss:$28 sps:$4 sm:$0xff]   ;;  %v7915_v28 = vld [vmem:[#allocation12 + $0xcf4] ss:$28 sps:$4 sm:$0xff]  }
 0x410   :  { %5825 = vmatprep.subr.bf16.mxu1 %v7852_v45  ;;  %5997 = vmatprep.subr.bf16.mxu0 %v7855_v47  ;;  %v7910_v29 = vld [vmem:[#allocation12 + $0xce8] ss:$28 sps:$4 sm:$0xff]   ;;  %v7913_v30 = vld [vmem:[#allocation12 + $0xcf0] ss:$28 sps:$4 sm:$0xff]   ;;  %v7916_v34 = vld [vmem:[#allocation12 + $0xd20] ss:$28 sps:$4 sm:$0xff]  }
 0x411   :  { %v7918_v32 = vld [vmem:[#allocation12 + $0xd24] ss:$28 sps:$4 sm:$0xff]   ;;  %v7921_v33 = vld [vmem:[#allocation12 + $0xd2c] ss:$28 sps:$4 sm:$0xff]   ;;  %v7924_v36 = vld [vmem:[#allocation12 + $0xd5c] ss:$28 sps:$4 sm:$0xff]  }
 0x412   :  { %5826 = vmatpush1.bf16.msra.mxu1 %v7850_v48  ;;  %5998 = vmatpush1.bf16.msra.mxu0 %v7853_v49  ;;  %v7919_v35 = vld [vmem:[#allocation12 + $0xd28] ss:$28 sps:$4 sm:$0xff]   ;;  %v7922_v20 = vld [vmem:[#allocation12 + $0xd58] ss:$28 sps:$4 sm:$0xff]   ;;  %v7925_v22 = vld [vmem:[#allocation12 + $0xd60] ss:$28 sps:$4 sm:$0xff]  }
 0x413   :  { %5827 = vmatprep.subr.bf16.mxu1 %v7858_v50  ;;  %5999 = vmatprep.subr.bf16.mxu0 %v7861_v51  ;;  %v7927_v40 = vld [vmem:[#allocation12 + $0xd64] ss:$28 sps:$4 sm:$0xff]   ;;  %v7930_v45 = vld [vmem:[#allocation12 + $0xd94] ss:$28 sps:$4 sm:$0xff]   ;;  %v7933_v47 = vld [vmem:[#allocation12 + $0xd9c] ss:$28 sps:$4 sm:$0xff]  }
 0x414   :  { %v7928_v48 = vld [vmem:[#allocation12 + $0xd90] ss:$28 sps:$4 sm:$0xff]   ;;  %v7931_v49 = vld [vmem:[#allocation12 + $0xd98] ss:$28 sps:$4 sm:$0xff]  }
 0x415   :  { %v7936_v50 = vld [vmem:[#allocation12 + $0xdcc] ss:$28 sps:$4 sm:$0xff]   ;;  %v7939_v51 = vld [vmem:[#allocation12 + $0xdd4] ss:$28 sps:$4 sm:$0xff]  }
 0x416   :  { %5828 = vmatpush1.bf16.msra.mxu1 %v7856_v53  ;;  %6000 = vmatpush1.bf16.msra.mxu0 %v7859_v54  ;;  %v7934_v53 = vld [vmem:[#allocation12 + $0xdc8] ss:$28 sps:$4 sm:$0xff]   ;;  %v7937_v54 = vld [vmem:[#allocation12 + $0xdd0] ss:$28 sps:$4 sm:$0xff]  }
 0x417   :  { %5829 = vmatprep.subr.bf16.mxu1 %v7864_v55  ;;  %6001 = vmatprep.subr.bf16.mxu0 %v7867_v58  ;;  %v7942_v55 = vld [vmem:[#allocation12 + $0x14] ss:$28 sps:$4 sm:$0xff]  }
 0x418   :  { %v7943_v58 = vld [vmem:[#allocation12 + $0x1d8] ss:$28 sps:$4 sm:$0xff]  }
 0x41a   :  { %5830 = vmatpush1.bf16.msra.mxu1 %v7862_v59  ;;  %6002 = vmatpush1.bf16.msra.mxu0 %v7865_v5  ;;  %v7940_v59 = vld [vmem:[#allocation12 + $0x10] ss:$28 sps:$4 sm:$0xff]   ;;  %v7944_v5 = vld [vmem:[#allocation12 + $0x18] ss:$28 sps:$4 sm:$0xff]  }
 0x41b   :  { %5831 = vmatprep.subr.bf16.mxu1 %v7870_v60  ;;  %6003 = vmatprep.subr.bf16.mxu0 %v7873_v61  ;;  %v7947_v60 = vld [vmem:[#allocation12 + $0x4c] ss:$28 sps:$4 sm:$0xff]  }
 0x41c   :  { %v7948_v61 = vld [vmem:[#allocation12 + $0x210] ss:$28 sps:$4 sm:$0xff]  }
 0x41e   :  { %5832 = vmatpush1.bf16.msra.mxu1 %v7868_v62  ;;  %6004 = vmatpush1.bf16.msra.mxu0 %v7871_v63  ;;  %v7945_v62 = vld [vmem:[#allocation12 + $0x48] ss:$28 sps:$4 sm:$0xff]   ;;  %v7949_v63 = vld [vmem:[#allocation12 + $0x50] ss:$28 sps:$4 sm:$0xff]  }
 0x41f   :  { %5833 = vmatprep.subr.bf16.mxu1 %v7876_v0  ;;  %6005 = vmatprep.subr.bf16.mxu0 %v7879_v1  ;;  %v7952_v0 = vld [vmem:[#allocation12 + $0x84] ss:$28 sps:$4 sm:$0xff]  }
 0x420   :  { %v7953_v1 = vld [vmem:[#allocation12 + $0x248] ss:$28 sps:$4 sm:$0xff]  }
 0x422   :  { %5834 = vmatpush1.bf16.msra.mxu1 %v7874_v2  ;;  %6006 = vmatpush1.bf16.msra.mxu0 %v7877_v3  ;;  %v7950_v2 = vld [vmem:[#allocation12 + $0x80] ss:$28 sps:$4 sm:$0xff]   ;;  %v7954_v3 = vld [vmem:[#allocation12 + $0x88] ss:$28 sps:$4 sm:$0xff]  }
 0x423   :  { %5835 = vmatprep.subr.bf16.mxu1 %v7882_v31  ;;  %6007 = vmatprep.subr.bf16.mxu0 %v7885_v4  ;;  %v7957_v31 = vld [vmem:[#allocation12 + $0xbc] ss:$28 sps:$4 sm:$0xff]  }
 0x424   :  { %v7958_v4 = vld [vmem:[#allocation12 + $0x280] ss:$28 sps:$4 sm:$0xff]  }
 0x426   :  { %5836 = vmatpush1.bf16.msra.mxu1 %v7880_v6  ;;  %6008 = vmatpush1.bf16.msra.mxu0 %v7883_v15  ;;  %v7955_v6 = vld [vmem:[#allocation12 + $0xb8] ss:$28 sps:$4 sm:$0xff]   ;;  %v7959_v15 = vld [vmem:[#allocation12 + $0xc0] ss:$28 sps:$4 sm:$0xff]  }
 0x427   :  { %5837 = vmatprep.subr.bf16.mxu1 %v7888_v7  ;;  %6009 = vmatprep.subr.bf16.mxu0 %v7891_v8  ;;  %v7962_v7 = vld [vmem:[#allocation12 + $0xf4] ss:$28 sps:$4 sm:$0xff]  }
 0x428   :  { %v7960_v8 = vld [vmem:[#allocation12 + $0xf0] ss:$28 sps:$4 sm:$0xff]  }
 0x42a   :  { %5838 = vmatpush1.bf16.msra.mxu1 %v7886_v9  ;;  %6010 = vmatpush1.bf16.msra.mxu0 %v7889_v10  ;;  %v7964_v9 = vld [vmem:[#allocation12 + $0xf8] ss:$28 sps:$4 sm:$0xff]   ;;  %v7967_v10 = vld [vmem:[#allocation12 + $0x12c] ss:$28 sps:$4 sm:$0xff]  }
 0x42b   :  { %5839 = vmatprep.subr.bf16.mxu1 %v7894_v11  ;;  %6011 = vmatprep.subr.bf16.mxu0 %v7897_v12  ;;  %v7968_v11 = vld [vmem:[#allocation12 + $0x2f0] ss:$28 sps:$4 sm:$0xff]   ;;  %v7965_v12 = vld [vmem:[#allocation12 + $0x128] ss:$28 sps:$4 sm:$0xff]  }
 0x42e   :  { %5840 = vmatpush1.bf16.msra.mxu1 %v7892_v42  ;;  %6012 = vmatpush1.bf16.msra.mxu0 %v7895_v57  ;;  %v7969_v42 = vld [vmem:[#allocation12 + $0x130] ss:$28 sps:$4 sm:$0xff]   ;;  %v7972_v57 = vld [vmem:[#allocation12 + $0x164] ss:$28 sps:$4 sm:$0xff]  }
 0x42f   :  { %5841 = vmatprep.subr.bf16.mxu1 %v7900_v13  ;;  %6013 = vmatprep.subr.bf16.mxu0 %v7903_v14  ;;  %v7973_v13 = vld [vmem:[#allocation12 + $0x328] ss:$28 sps:$4 sm:$0xff]   ;;  %v7970_v14 = vld [vmem:[#allocation12 + $0x160] ss:$28 sps:$4 sm:$0xff]  }
 0x432   :  { %5842 = vmatpush1.bf16.msra.mxu1 %v7898_v16  ;;  %6014 = vmatpush1.bf16.msra.mxu0 %v7901_v17  ;;  %v7974_v16 = vld [vmem:[#allocation12 + $0x168] ss:$28 sps:$4 sm:$0xff]   ;;  %v7977_v17 = vld [vmem:[#allocation12 + $0x19c] ss:$28 sps:$4 sm:$0xff]  }
 0x433   :  { %5843 = vmatprep.subr.bf16.mxu1 %v7906_v21  ;;  %6015 = vmatprep.subr.bf16.mxu0 %v7909_v23  ;;  %v7978_v21 = vld [vmem:[#allocation12 + $0x360] ss:$28 sps:$4 sm:$0xff]   ;;  %v7975_v23 = vld [vmem:[#allocation12 + $0x198] ss:$28 sps:$4 sm:$0xff]  }
 0x436   :  { %5844 = vmatpush1.bf16.msra.mxu1 %v7904_v26  ;;  %6016 = vmatpush1.bf16.msra.mxu0 %v7907_v27  ;;  %v7979_v26 = vld [vmem:[#allocation12 + $0x1a0] ss:$28 sps:$4 sm:$0xff]   ;;  %v7982_v27 = vld [vmem:[#allocation12 + $0x1d4] ss:$28 sps:$4 sm:$0xff]  }
 0x437   :  { %5845 = vmatprep.subr.bf16.mxu1 %v7912_v46  ;;  %6017 = vmatprep.subr.bf16.mxu0 %v7915_v28  ;;  %v7983_v46 = vld [vmem:[#allocation12 + $0x558] ss:$28 sps:$4 sm:$0xff]   ;;  %v7980_v28 = vld [vmem:[#allocation12 + $0x1d0] ss:$28 sps:$4 sm:$0xff]  }
 0x43a   :  { %5846 = vmatpush1.bf16.msra.mxu1 %v7910_v29  ;;  %6018 = vmatpush1.bf16.msra.mxu0 %v7913_v30  ;;  %v7984_v29 = vld [vmem:[#allocation12 + $0x398] ss:$28 sps:$4 sm:$0xff]   ;;  %v7987_v30 = vld [vmem:[#allocation12 + $0x20c] ss:$28 sps:$4 sm:$0xff]  }
 0x43b   :  { %5847 = vmatprep.subr.bf16.mxu1 %v7918_v32  ;;  %6019 = vmatprep.subr.bf16.mxu0 %v7921_v33  ;;  %v7988_v32 = vld [vmem:[#allocation12 + $0x590] ss:$28 sps:$4 sm:$0xff]   ;;  %v7985_v33 = vld [vmem:[#allocation12 + $0x208] ss:$28 sps:$4 sm:$0xff]  }
 0x43e   :  { %5848 = vmatpush1.bf16.msra.mxu1 %v7916_v34  ;;  %6020 = vmatpush1.bf16.msra.mxu0 %v7919_v35  ;;  %v7989_v34 = vld [vmem:[#allocation12 + $0x3d0] ss:$28 sps:$4 sm:$0xff]   ;;  %v7992_v35 = vld [vmem:[#allocation12 + $0x244] ss:$28 sps:$4 sm:$0xff]  }
 0x43f   :  { %5849 = vmatprep.subr.bf16.mxu1 %v7924_v36  ;;  %6021 = vmatprep.subr.bf16.mxu0 %v7927_v40  ;;  %v7993_v36 = vld [vmem:[#allocation12 + $0x5c8] ss:$28 sps:$4 sm:$0xff]   ;;  %v7990_v40 = vld [vmem:[#allocation12 + $0x240] ss:$28 sps:$4 sm:$0xff]  }
 0x442   :  { %5850 = vmatpush1.bf16.msra.mxu1 %v7922_v20  ;;  %6022 = vmatpush1.bf16.msra.mxu0 %v7925_v22  ;;  %v7994_v20 = vld [vmem:[#allocation12 + $0x408] ss:$28 sps:$4 sm:$0xff]   ;;  %v7997_v22 = vld [vmem:[#allocation12 + $0x27c] ss:$28 sps:$4 sm:$0xff]  }
 0x443   :  { %5851 = vmatprep.subr.bf16.mxu1 %v7930_v45  ;;  %6023 = vmatprep.subr.bf16.mxu0 %v7933_v47  ;;  %v7998_v45 = vld [vmem:[#allocation12 + $0x600] ss:$28 sps:$4 sm:$0xff]   ;;  %v7995_v47 = vld [vmem:[#allocation12 + $0x278] ss:$28 sps:$4 sm:$0xff]  }
 0x446   :  { %5852 = vmatpush1.bf16.msra.mxu1 %v7928_v48  ;;  %6024 = vmatpush1.bf16.msra.mxu0 %v7931_v49  ;;  %v7999_v48 = vld [vmem:[#allocation12 + $0x440] ss:$28 sps:$4 sm:$0xff]   ;;  %v8002_v49 = vld [vmem:[#allocation12 + $0x2b4] ss:$28 sps:$4 sm:$0xff]  }
 0x447   :  { %5853 = vmatprep.subr.bf16.mxu1 %v7936_v50  ;;  %6025 = vmatprep.subr.bf16.mxu0 %v7939_v51  ;;  %v8003_v50 = vld [vmem:[#allocation12 + $0x638] ss:$28 sps:$4 sm:$0xff]   ;;  %v8000_v51 = vld [vmem:[#allocation12 + $0x2b0] ss:$28 sps:$4 sm:$0xff]  }
 0x44a   :  { %5854 = vmatpush1.bf16.msra.mxu1 %v7934_v53  ;;  %6026 = vmatpush1.bf16.msra.mxu0 %v7937_v54  ;;  %v8004_v53 = vld [vmem:[#allocation12 + $0x478] ss:$28 sps:$4 sm:$0xff]   ;;  %v8007_v54 = vld [vmem:[#allocation12 + $0x2ec] ss:$28 sps:$4 sm:$0xff]  }
 0x44b   :  { %6038 = vmatprep.subr.bf16.mxu1 %v7942_v55  ;;  %7250 = vmatprep.subr.bf16.mxu0 %v7943_v58  ;;  %v8008_v55 = vld [vmem:[#allocation12 + $0x670] ss:$28 sps:$4 sm:$0xff]   ;;  %v8005_v58 = vld [vmem:[#allocation12 + $0x2e8] ss:$28 sps:$4 sm:$0xff]  }
 0x44d   :  { %5856 = vmatmul.mubr.bf16.vlgmr.msra.gmra.mrb[8].mxu1 %v8703_v18  ;;  %6028 = vmatmul.mubr.bf16.vlgmr.msra.gmra.mrb[20].mxu0 %v8703_v18 }
 0x44e   :  { %6039 = vmatpush1.bf16.msra.mxu1 %v7940_v59  ;;  %6070 = vmatprep.mubr.bf16.mxu1 %v8680_v41  ;;  %v8009_v59 = vld [vmem:[#allocation12 + $0x4b0] ss:$28 sps:$4 sm:$0xff]  }
 0x44f   :  { %7251 = vmatpush3.bf16.msra.mxu0 %v7944_v5  ;;  %6242 = vmatprep.mubr.bf16.mxu0 %v8680_v41  ;;  %v7963_v41 = vld [vmem:[#allocation12 + $0x2b8] ss:$28 sps:$4 sm:$0xff]   ;;  %v8012_v5 = vld [vmem:[#allocation12 + $0x324] ss:$28 sps:$4 sm:$0xff]  }
 0x450   :  { %6040 = vmatprep.subr.bf16.mxu1 %v7947_v60  ;;  %7252 = vmatprep.subr.bf16.mxu0 %v7948_v61  ;;  %v8013_v60 = vld [vmem:[#allocation12 + $0x6a8] ss:$28 sps:$4 sm:$0xff]   ;;  %v8010_v61 = vld [vmem:[#allocation12 + $0x320] ss:$28 sps:$4 sm:$0xff]  }
 0x452   :  { %6041 = vmatpush1.bf16.msra.mxu1 %v7945_v62  ;;  %v8014_v62 = vld [vmem:[#allocation12 + $0x4e8] ss:$28 sps:$4 sm:$0xff]  }
 0x453   :  { %7253 = vmatpush3.bf16.msra.mxu0 %v7949_v63  ;;  %6042 = vmatprep.subr.bf16.mxu1 %v7952_v0  ;;  %v8017_v63 = vld [vmem:[#allocation12 + $0x35c] ss:$28 sps:$4 sm:$0xff]  }
 0x454   :  { %7254 = vmatprep.subr.bf16.mxu0 %v7953_v1  ;;  %v8018_v0 = vld [vmem:[#allocation12 + $0x6e0] ss:$28 sps:$4 sm:$0xff]   ;;  %v8015_v1 = vld [vmem:[#allocation12 + $0x358] ss:$28 sps:$4 sm:$0xff]  }
 0x456   :  { %6043 = vmatpush1.bf16.msra.mxu1 %v7950_v2  ;;  %v8019_v2 = vld [vmem:[#allocation12 + $0x520] ss:$28 sps:$4 sm:$0xff]  }
 0x457   :  { %7255 = vmatpush3.bf16.msra.mxu0 %v7954_v3  ;;  %6044 = vmatprep.subr.bf16.mxu1 %v7957_v31  ;;  %v8022_v3 = vld [vmem:[#allocation12 + $0x394] ss:$28 sps:$4 sm:$0xff]  }
 0x458   :  { %7256 = vmatprep.subr.bf16.mxu0 %v7958_v4  ;;  %v8023_v31 = vld [vmem:[#allocation12 + $0x8d8] ss:$28 sps:$4 sm:$0xff]   ;;  %v8020_v4 = vld [vmem:[#allocation12 + $0x390] ss:$28 sps:$4 sm:$0xff]  }
 0x45a   :  { %6045 = vmatpush1.bf16.msra.mxu1 %v7955_v6  ;;  %v8024_v6 = vld [vmem:[#allocation12 + $0x718] ss:$28 sps:$4 sm:$0xff]  }
 0x45b   :  { %7257 = vmatpush3.bf16.msra.mxu0 %v7959_v15  ;;  %6046 = vmatprep.subr.bf16.mxu1 %v7962_v7  ;;  %v8027_v15 = vld [vmem:[#allocation12 + $0x3cc] ss:$28 sps:$4 sm:$0xff]  }
 0x45c   :  { %7258 = vmatprep.subr.bf16.mxu0 %v7963_v41  ;;  %v8028_v7 = vld [vmem:[#allocation12 + $0x910] ss:$28 sps:$4 sm:$0xff]   ;;  %v8025_v41 = vld [vmem:[#allocation12 + $0x3c8] ss:$28 sps:$4 sm:$0xff]  }
 0x45e   :  { %6047 = vmatpush1.bf16.msra.mxu1 %v7960_v8  ;;  %v8029_v8 = vld [vmem:[#allocation12 + $0x750] ss:$28 sps:$4 sm:$0xff]  }
 0x45f   :  { %7259 = vmatpush3.bf16.msra.mxu0 %v7964_v9  ;;  %6048 = vmatprep.subr.bf16.mxu1 %v7967_v10  ;;  %v8032_v9 = vld [vmem:[#allocation12 + $0x404] ss:$28 sps:$4 sm:$0xff]  }
 0x460   :  { %7260 = vmatprep.subr.bf16.mxu0 %v7968_v11  ;;  %v8033_v10 = vld [vmem:[#allocation12 + $0x948] ss:$28 sps:$4 sm:$0xff]   ;;  %v8030_v11 = vld [vmem:[#allocation12 + $0x400] ss:$28 sps:$4 sm:$0xff]  }
 0x462   :  { %6049 = vmatpush1.bf16.msra.mxu1 %v7965_v12  ;;  %v8037_v12 = vld [vmem:[#allocation12 + $0x43c] ss:$28 sps:$4 sm:$0xff]  }
 0x463   :  { %7261 = vmatpush3.bf16.msra.mxu0 %v7969_v42  ;;  %6050 = vmatprep.subr.bf16.mxu1 %v7972_v57  ;;  %v8038_v42 = vld [vmem:[#allocation12 + $0x980] ss:$28 sps:$4 sm:$0xff]   ;;  %v8035_v57 = vld [vmem:[#allocation12 + $0x438] ss:$28 sps:$4 sm:$0xff]  }
 0x464   :  { %7262 = vmatprep.subr.bf16.mxu0 %v7973_v13  ;;  %v8042_v13 = vld [vmem:[#allocation12 + $0x474] ss:$28 sps:$4 sm:$0xff]  }
 0x466   :  { %6051 = vmatpush1.bf16.msra.mxu1 %v7970_v14  ;;  %v8043_v14 = vld [vmem:[#allocation12 + $0x9b8] ss:$28 sps:$4 sm:$0xff]  }
 0x467   :  { %7263 = vmatpush3.bf16.msra.mxu0 %v7974_v16  ;;  %6052 = vmatprep.subr.bf16.mxu1 %v7977_v17  ;;  %v8040_v16 = vld [vmem:[#allocation12 + $0x470] ss:$28 sps:$4 sm:$0xff]   ;;  %v8044_v17 = vld [vmem:[#allocation12 + $0x7f8] ss:$28 sps:$4 sm:$0xff]  }
 0x468   :  { %7264 = vmatprep.subr.bf16.mxu0 %v7978_v21  ;;  %v8047_v21 = vld [vmem:[#allocation12 + $0x4ac] ss:$28 sps:$4 sm:$0xff]  }
 0x46a   :  { %6053 = vmatpush1.bf16.msra.mxu1 %v7975_v23  ;;  %v8048_v23 = vld [vmem:[#allocation12 + $0x9f0] ss:$28 sps:$4 sm:$0xff]  }
 0x46b   :  { %7265 = vmatpush3.bf16.msra.mxu0 %v7979_v26  ;;  %6054 = vmatprep.subr.bf16.mxu1 %v7982_v27  ;;  %v8045_v26 = vld [vmem:[#allocation12 + $0x4a8] ss:$28 sps:$4 sm:$0xff]   ;;  %v8049_v27 = vld [vmem:[#allocation12 + $0x830] ss:$28 sps:$4 sm:$0xff]  }
 0x46c   :  { %7272 = vmatprep.subr.bf16.mxu0 %v7983_v46  ;;  %v8052_v46 = vld [vmem:[#allocation12 + $0x4e4] ss:$28 sps:$4 sm:$0xff]  }
 0x46e   :  { %6243 = vmatmul.mubr.bf16.vlgmr.msra.gmra.mrb[24].mxu0 %v8676_v24  ;;  %6055 = vmatpush1.bf16.msra.mxu1 %v7980_v28  ;;  %v8053_v28 = vld [vmem:[#allocation12 + $0xa28] ss:$28 sps:$4 sm:$0xff]  }
 0x46f   :  { %7273 = vmatpush3.bf16.msra.mxu0 %v7984_v29  ;;  %6283 = vmatprep.mubr.bf16.mxu0 %v8682_v43  ;;  %v8050_v29 = vld [vmem:[#allocation12 + $0x4e0] ss:$28 sps:$4 sm:$0xff]  }
 0x470   :  { %6056 = vmatprep.subr.bf16.mxu1 %v7987_v30  ;;  %7274 = vmatprep.subr.bf16.mxu0 %v7988_v32  ;;  %v8054_v30 = vld [vmem:[#allocation12 + $0x868] ss:$28 sps:$4 sm:$0xff]   ;;  %v8057_v32 = vld [vmem:[#allocation12 + $0x51c] ss:$28 sps:$4 sm:$0xff]  }
 0x472   :  { %6057 = vmatpush1.bf16.msra.mxu1 %v7985_v33  ;;  %v8058_v33 = vld [vmem:[#allocation12 + $0xa60] ss:$28 sps:$4 sm:$0xff]  }
 0x473   :  { %7275 = vmatpush3.bf16.msra.mxu0 %v7989_v34  ;;  %6058 = vmatprep.subr.bf16.mxu1 %v7992_v35  ;;  %v8055_v34 = vld [vmem:[#allocation12 + $0x518] ss:$28 sps:$4 sm:$0xff]   ;;  %v8059_v35 = vld [vmem:[#allocation12 + $0x8a0] ss:$28 sps:$4 sm:$0xff]  }
 0x474   :  { %7276 = vmatprep.subr.bf16.mxu0 %v7993_v36  ;;  %v8062_v36 = vld [vmem:[#allocation12 + $0x554] ss:$28 sps:$4 sm:$0xff]  }
 0x476   :  { %6059 = vmatpush1.bf16.msra.mxu1 %v7990_v40  ;;  %v8063_v40 = vld [vmem:[#allocation12 + $0xc58] ss:$28 sps:$4 sm:$0xff]  }
 0x477   :  { %7277 = vmatpush3.bf16.msra.mxu0 %v7994_v20  ;;  %6060 = vmatprep.subr.bf16.mxu1 %v7997_v22  ;;  %v8060_v20 = vld [vmem:[#allocation12 + $0x550] ss:$28 sps:$4 sm:$0xff]   ;;  %v8064_v22 = vld [vmem:[#allocation12 + $0xa98] ss:$28 sps:$4 sm:$0xff]  }
 0x478   :  { %7278 = vmatprep.subr.bf16.mxu0 %v7998_v45  ;;  %v8067_v45 = vld [vmem:[#allocation12 + $0x58c] ss:$28 sps:$4 sm:$0xff]  }
 0x47a   :  { %6061 = vmatpush1.bf16.msra.mxu1 %v7995_v47  ;;  %v8068_v47 = vld [vmem:[#allocation12 + $0xc90] ss:$28 sps:$4 sm:$0xff]  }
 0x47b   :  { %7279 = vmatpush3.bf16.msra.mxu0 %v7999_v48  ;;  %6062 = vmatprep.subr.bf16.mxu1 %v8002_v49  ;;  %v8065_v48 = vld [vmem:[#allocation12 + $0x588] ss:$28 sps:$4 sm:$0xff]   ;;  %v8069_v49 = vld [vmem:[#allocation12 + $0xad0] ss:$28 sps:$4 sm:$0xff]  }
 0x47c   :  { %7280 = vmatprep.subr.bf16.mxu0 %v8003_v50  ;;  %v8072_v50 = vld [vmem:[#allocation12 + $0x5c4] ss:$28 sps:$4 sm:$0xff]  }
 0x47e   :  { %6063 = vmatpush1.bf16.msra.mxu1 %v8000_v51  ;;  %v8073_v51 = vld [vmem:[#allocation12 + $0xcc8] ss:$28 sps:$4 sm:$0xff]  }
 0x47f   :  { %7281 = vmatpush3.bf16.msra.mxu0 %v8004_v53  ;;  %6064 = vmatprep.subr.bf16.mxu1 %v8007_v54  ;;  %v8070_v53 = vld [vmem:[#allocation12 + $0x5c0] ss:$28 sps:$4 sm:$0xff]   ;;  %v8074_v54 = vld [vmem:[#allocation12 + $0xb08] ss:$28 sps:$4 sm:$0xff]  }
 0x480   :  { %7282 = vmatprep.subr.bf16.mxu0 %v8008_v55  ;;  %v8077_v55 = vld [vmem:[#allocation12 + $0x5fc] ss:$28 sps:$4 sm:$0xff]  }
 0x482   :  { %6065 = vmatpush1.bf16.msra.mxu1 %v8005_v58  ;;  %v8078_v58 = vld [vmem:[#allocation12 + $0xd00] ss:$28 sps:$4 sm:$0xff]  }
 0x483   :  { %7283 = vmatpush3.bf16.msra.mxu0 %v8009_v59  ;;  %6066 = vmatprep.subr.bf16.mxu1 %v8012_v5  ;;  %v8075_v59 = vld [vmem:[#allocation12 + $0x5f8] ss:$28 sps:$4 sm:$0xff]   ;;  %v8079_v5 = vld [vmem:[#allocation12 + $0xb40] ss:$28 sps:$4 sm:$0xff]  }
 0x484   :  { %7284 = vmatprep.subr.bf16.mxu0 %v8013_v60  ;;  %v8082_v60 = vld [vmem:[#allocation12 + $0x634] ss:$28 sps:$4 sm:$0xff]  }
 0x486   :  { %6067 = vmatpush1.bf16.msra.mxu1 %v8010_v61  ;;  %v8083_v61 = vld [vmem:[#allocation12 + $0xd38] ss:$28 sps:$4 sm:$0xff]  }
 0x487   :  { %7285 = vmatpush3.bf16.msra.mxu0 %v8014_v62  ;;  %6068 = vmatprep.subr.bf16.mxu1 %v8017_v63  ;;  %v8080_v62 = vld [vmem:[#allocation12 + $0x630] ss:$28 sps:$4 sm:$0xff]   ;;  %v8084_v63 = vld [vmem:[#allocation12 + $0xb78] ss:$28 sps:$4 sm:$0xff]  }
 0x488   :  { %7286 = vmatprep.subr.bf16.mxu0 %v8018_v0  ;;  %v8087_v0 = vld [vmem:[#allocation12 + $0x66c] ss:$28 sps:$4 sm:$0xff]  }
 0x48a   :  { %6069 = vmatpush1.bf16.msra.mxu1 %v8015_v1  ;;  %v8088_v1 = vld [vmem:[#allocation12 + $0xd70] ss:$28 sps:$4 sm:$0xff]  }
 0x48b   :  { %7287 = vmatpush3.bf16.msra.mxu0 %v8019_v2  ;;  %6081 = vmatprep.subr.bf16.mxu1 %v8022_v3  ;;  %v8085_v2 = vld [vmem:[#allocation12 + $0x668] ss:$28 sps:$4 sm:$0xff]   ;;  %v8089_v3 = vld [vmem:[#allocation12 + $0xbb0] ss:$28 sps:$4 sm:$0xff]  }
 0x48c   :  { %7294 = vmatprep.subr.bf16.mxu0 %v8023_v31  ;;  %v8092_v31 = vld [vmem:[#allocation12 + $0x6a4] ss:$28 sps:$4 sm:$0xff]  }
 0x48d   :  { %6071 = vmatmul.mubr.bf16.vlgmr.msra.gmra.mrb[12].mxu1 %v8676_v24  ;;  %v8034_v24 = vld [vmem:[#allocation12 + $0x788] ss:$28 sps:$4 sm:$0xff]  }
 0x48e   :  { %6284 = vmatmul.mubr.bf16.vlgmr.msra.gmra.mrb[28].mxu0 %v8678_v25  ;;  %6082 = vmatpush1.bf16.msra.mxu1 %v8020_v4  ;;  %v8093_v4 = vld [vmem:[#allocation12 + $0xda8] ss:$28 sps:$4 sm:$0xff]  }
 0x48f   :  { %6113 = vmatprep.mubr.bf16.mxu1 %v8682_v43  ;;  %7295 = vmatpush3.bf16.msra.mxu0 %v8024_v6  ;;  %v8039_v43 = vld [vmem:[#allocation12 + $0x7c0] ss:$28 sps:$4 sm:$0xff]  }
 0x490   :  { %6324 = vmatprep.mubr.bf16.mxu0 %v8705_v19  ;;  %6083 = vmatprep.subr.bf16.mxu1 %v8027_v15  ;;  %v8090_v6 = vld [vmem:[#allocation12 + $0x6a0] ss:$28 sps:$4 sm:$0xff]   ;;  %v8094_v15 = vld [vmem:[#allocation12 + $0xbe8] ss:$28 sps:$4 sm:$0xff]  }
 0x491   :  { %7296 = vmatprep.subr.bf16.mxu0 %v8028_v7  ;;  %v8097_v7 = vld [vmem:[#allocation12 + $0x6dc] ss:$28 sps:$4 sm:$0xff]  }
 0x492   :  { %6084 = vmatpush1.bf16.msra.mxu1 %v8025_v41  ;;  %v8098_v41 = vld [vmem:[#allocation12 + $0xde0] ss:$28 sps:$4 sm:$0xff]  }
 0x493   :  { %7297 = vmatpush3.bf16.msra.mxu0 %v8029_v8  ;;  %6085 = vmatprep.subr.bf16.mxu1 %v8032_v9  ;;  %v8095_v8 = vld [vmem:[#allocation12 + $0x6d8] ss:$28 sps:$4 sm:$0xff]   ;;  %v8099_v9 = vld [vmem:[#allocation12 + $0xc20] ss:$28 sps:$4 sm:$0xff]  }
 0x494   :  { %7298 = vmatprep.subr.bf16.mxu0 %v8033_v10  ;;  %v8102_v10 = vld [vmem:[#allocation12 + $0x714] ss:$28 sps:$4 sm:$0xff]  }
 0x496   :  { %6086 = vmatpush1.bf16.msra.mxu1 %v8030_v11  ;;  %v8100_v11 = vld [vmem:[#allocation12 + $0x710] ss:$28 sps:$4 sm:$0xff]  }
 0x497   :  { %7299 = vmatpush3.bf16.msra.mxu0 %v8034_v24  ;;  %6087 = vmatprep.subr.bf16.mxu1 %v8037_v12  ;;  %v8105_v24 = vld [vmem:[#allocation12 + $0x74c] ss:$28 sps:$4 sm:$0xff]  }
 0x498   :  { %7300 = vmatprep.subr.bf16.mxu0 %v8038_v42  ;;  %v8103_v12 = vld [vmem:[#allocation12 + $0x748] ss:$28 sps:$4 sm:$0xff]  }
 0x499   :  { %v8108_v42 = vld [vmem:[#allocation12 + $0x784] ss:$28 sps:$4 sm:$0xff]  }
 0x49a   :  { %6088 = vmatpush1.bf16.msra.mxu1 %v8035_v57  ;;  %v8106_v57 = vld [vmem:[#allocation12 + $0x780] ss:$28 sps:$4 sm:$0xff]  }
 0x49b   :  { %7301 = vmatpush3.bf16.msra.mxu0 %v8039_v43  ;;  %6089 = vmatprep.subr.bf16.mxu1 %v8042_v13  ;;  %v8111_v43 = vld [vmem:[#allocation12 + $0x7bc] ss:$28 sps:$4 sm:$0xff]  }
 0x49c   :  { %7302 = vmatprep.subr.bf16.mxu0 %v8043_v14  ;;  %v8109_v13 = vld [vmem:[#allocation12 + $0x7b8] ss:$28 sps:$4 sm:$0xff]  }
 0x49d   :  { %v8114_v14 = vld [vmem:[#allocation12 + $0x7f4] ss:$28 sps:$4 sm:$0xff]  }
 0x49e   :  { %6090 = vmatpush1.bf16.msra.mxu1 %v8040_v16  ;;  %v8112_v16 = vld [vmem:[#allocation12 + $0x7f0] ss:$28 sps:$4 sm:$0xff]  }
 0x49f   :  { %7303 = vmatpush3.bf16.msra.mxu0 %v8044_v17  ;;  %6091 = vmatprep.subr.bf16.mxu1 %v8047_v21  ;;  %v8115_v17 = vld [vmem:[#allocation12 + $0x828] ss:$28 sps:$4 sm:$0xff]  }
 0x4a0   :  { %7304 = vmatprep.subr.bf16.mxu0 %v8048_v23  ;;  %v8120_v21 = vld [vmem:[#allocation12 + $0x864] ss:$28 sps:$4 sm:$0xff]   ;;  %v8123_v23 = vld [vmem:[#allocation12 + $0x89c] ss:$28 sps:$4 sm:$0xff]  }
 0x4a2   :  { %6092 = vmatpush1.bf16.msra.mxu1 %v8045_v26  ;;  %v8121_v26 = vld [vmem:[#allocation12 + $0x898] ss:$28 sps:$4 sm:$0xff]  }
 0x4a3   :  { %7305 = vmatpush3.bf16.msra.mxu0 %v8049_v27  ;;  %6093 = vmatprep.subr.bf16.mxu1 %v8052_v46  ;;  %v8126_v27 = vld [vmem:[#allocation12 + $0x8d4] ss:$28 sps:$4 sm:$0xff]  }
 0x4a4   :  { %7306 = vmatprep.subr.bf16.mxu0 %v8053_v28  ;;  %v8124_v46 = vld [vmem:[#allocation12 + $0x8d0] ss:$28 sps:$4 sm:$0xff]  }
 0x4a5   :  { %v8129_v28 = vld [vmem:[#allocation12 + $0x90c] ss:$28 sps:$4 sm:$0xff]  }
 0x4a6   :  { %6094 = vmatpush1.bf16.msra.mxu1 %v8050_v29  ;;  %v8127_v29 = vld [vmem:[#allocation12 + $0x908] ss:$28 sps:$4 sm:$0xff]  }
 0x4a7   :  { %7307 = vmatpush3.bf16.msra.mxu0 %v8054_v30  ;;  %6095 = vmatprep.subr.bf16.mxu1 %v8057_v32  ;;  %v8132_v30 = vld [vmem:[#allocation12 + $0x944] ss:$28 sps:$4 sm:$0xff]  }
 0x4a8   :  { %7308 = vmatprep.subr.bf16.mxu0 %v8058_v33  ;;  %v8130_v32 = vld [vmem:[#allocation12 + $0x940] ss:$28 sps:$4 sm:$0xff]  }
 0x4a9   :  { %v8135_v33 = vld [vmem:[#allocation12 + $0x97c] ss:$28 sps:$4 sm:$0xff]  }
 0x4aa   :  { %6096 = vmatpush1.bf16.msra.mxu1 %v8055_v34  ;;  %v8133_v34 = vld [vmem:[#allocation12 + $0x978] ss:$28 sps:$4 sm:$0xff]  }
 0x4ab   :  { %7309 = vmatpush3.bf16.msra.mxu0 %v8059_v35  ;;  %6097 = vmatprep.subr.bf16.mxu1 %v8062_v36  ;;  %v8138_v35 = vld [vmem:[#allocation12 + $0x9b4] ss:$28 sps:$4 sm:$0xff]  }
 0x4ac   :  { %7316 = vmatprep.subr.bf16.mxu0 %v8063_v40  ;;  %v8136_v36 = vld [vmem:[#allocation12 + $0x9b0] ss:$28 sps:$4 sm:$0xff]  }
 0x4ad   :  { %v8141_v40 = vld [vmem:[#allocation12 + $0x9ec] ss:$28 sps:$4 sm:$0xff]  }
 0x4ae   :  { %6325 = vmatmul.mubr.bf16.vlgmr.msra.gmra.mrb[32].mxu0 %v8701_v38  ;;  %6098 = vmatpush1.bf16.msra.mxu1 %v8060_v20  ;;  %v8139_v20 = vld [vmem:[#allocation12 + $0x9e8] ss:$28 sps:$4 sm:$0xff]  }
 0x4af   :  { %7317 = vmatpush3.bf16.msra.mxu0 %v8064_v22  ;;  %6365 = vmatprep.mubr.bf16.mxu0 %v8707_v44  ;;  %v8144_v22 = vld [vmem:[#allocation12 + $0xa24] ss:$28 sps:$4 sm:$0xff]  }
 0x4b0   :  { %6099 = vmatprep.subr.bf16.mxu1 %v8067_v45  ;;  %7318 = vmatprep.subr.bf16.mxu0 %v8068_v47  ;;  %v8142_v45 = vld [vmem:[#allocation12 + $0xa20] ss:$28 sps:$4 sm:$0xff]  }
 0x4b1   :  { %v8147_v47 = vld [vmem:[#allocation12 + $0xa5c] ss:$28 sps:$4 sm:$0xff]  }
 0x4b2   :  { %6100 = vmatpush1.bf16.msra.mxu1 %v8065_v48  ;;  %v8145_v48 = vld [vmem:[#allocation12 + $0xa58] ss:$28 sps:$4 sm:$0xff]  }
 0x4b3   :  { %7319 = vmatpush3.bf16.msra.mxu0 %v8069_v49  ;;  %6101 = vmatprep.subr.bf16.mxu1 %v8072_v50  ;;  %v8150_v49 = vld [vmem:[#allocation12 + $0xa94] ss:$28 sps:$4 sm:$0xff]  }
 0x4b4   :  { %7320 = vmatprep.subr.bf16.mxu0 %v8073_v51  ;;  %v8148_v50 = vld [vmem:[#allocation12 + $0xa90] ss:$28 sps:$4 sm:$0xff]  }
 0x4b5   :  { %v8153_v51 = vld [vmem:[#allocation12 + $0xacc] ss:$28 sps:$4 sm:$0xff]  }
 0x4b6   :  { %6102 = vmatpush1.bf16.msra.mxu1 %v8070_v53  ;;  %v8151_v53 = vld [vmem:[#allocation12 + $0xac8] ss:$28 sps:$4 sm:$0xff]  }
 0x4b7   :  { %7321 = vmatpush3.bf16.msra.mxu0 %v8074_v54  ;;  %6103 = vmatprep.subr.bf16.mxu1 %v8077_v55  ;;  %v8156_v54 = vld [vmem:[#allocation12 + $0xb04] ss:$28 sps:$4 sm:$0xff]  }
 0x4b8   :  { %7322 = vmatprep.subr.bf16.mxu0 %v8078_v58  ;;  %v8154_v55 = vld [vmem:[#allocation12 + $0xb00] ss:$28 sps:$4 sm:$0xff]  }
 0x4b9   :  { %v8732_v58 = vld [vmem:[#allocation13] sm:$0x7f] }
 0x4ba   :  { %6104 = vmatpush1.bf16.msra.mxu1 %v8075_v59  ;;  %v8159_v59 = vld [vmem:[#allocation12 + $0xb3c] ss:$28 sps:$4 sm:$0xff]  }
 0x4bb   :  { %7323 = vmatpush3.bf16.msra.mxu0 %v8079_v5  ;;  %6105 = vmatprep.subr.bf16.mxu1 %v8082_v60  ;;  %v3323_v5 = vunpack.c.l.bf16 %v8732_v58  ;;  %v8157_v60 = vld [vmem:[#allocation12 + $0xb38] ss:$28 sps:$4 sm:$0xff]  }
 0x4bc   :  { %7324 = vmatprep.subr.bf16.mxu0 %v8083_v61  ;;  %v8162_v61 = vld [vmem:[#allocation12 + $0xb74] ss:$28 sps:$4 sm:$0xff]  }
 0x4be   :  { %6106 = vmatpush1.bf16.msra.mxu1 %v8080_v62  ;;  %v3338_v62 = vrot.slane %v3323_v5, %v8638_v52 }
 0x4bf   :  { %7325 = vmatpush3.bf16.msra.mxu0 %v8084_v63  ;;  %6107 = vmatprep.subr.bf16.mxu1 %v8087_v0  ;;  %v3334_v63 = vrot.slane %v3323_v5, %v8589_v39  ;;  %v3342_v0 = vrot.slane %v3323_v5, %v8641_v56 }
 0x4c0   :  { %7326 = vmatprep.subr.bf16.mxu0 %v8088_v1  ;;  %v8165_v1 = vld [vmem:[#allocation12 + $0xbac] ss:$28 sps:$4 sm:$0xff]  }
 0x4c2   :  { %6108 = vmatpush1.bf16.msra.mxu1 %v8085_v2 }
 0x4c3   :  { %7327 = vmatpush3.bf16.msra.mxu0 %v8089_v3  ;;  %6109 = vmatprep.subr.bf16.mxu1 %v8092_v31  ;;  %v3373_v3 = vrot.slane %v3338_v62, %v8586_v37  ;;  %v3369_v31 = vrot.slane %v3334_v63, %v8586_v37 }
 0x4c4   :  { %7328 = vmatprep.subr.bf16.mxu0 %v8093_v4  ;;  %v3377_v4 = vrot.slane %v3342_v0, %v8586_v37 }
 0x4c6   :  { %6110 = vmatpush1.bf16.msra.mxu1 %v8090_v6  ;;  %v8163_v6 = vld [vmem:[#allocation12 + $0xba8] ss:$28 sps:$4 sm:$0xff]  }
 0x4c7   :  { %7329 = vmatpush3.bf16.msra.mxu0 %v8094_v15  ;;  %6111 = vmatprep.subr.bf16.mxu1 %v8097_v7  ;;  %v8168_v15 = vld [vmem:[#allocation12 + $0xbe4] ss:$28 sps:$4 sm:$0xff]  }
 0x4c8   :  { %7330 = vmatprep.subr.bf16.mxu0 %v8098_v41 }
 0x4ca   :  { %6112 = vmatpush1.bf16.msra.mxu1 %v8095_v8 }
 0x4cb   :  { %7331 = vmatpush3.bf16.msra.mxu0 %v8099_v9  ;;  %6124 = vmatprep.subr.bf16.mxu1 %v8102_v10 }
 0x4cd   :  { %6114 = vmatmul.mubr.bf16.vlgmr.msra.gmra.mrb[12].mxu1 %v8678_v25  ;;  %v8117_v25 = vld [vmem:[#allocation12 + $0x82c] ss:$28 sps:$4 sm:$0xff]  }
 0x4ce   :  { %6366 = vmatmul.mubr.bf16.vlgmr.msra.gmra.mrb[36].mxu0 %v8703_v18  ;;  %6125 = vmatpush1.bf16.msra.mxu1 %v8100_v11 }
 0x4cf   :  { %6156 = vmatprep.mubr.bf16.mxu1 %v8705_v19  ;;  %6126 = vmatprep.subr.bf16.mxu1 %v8105_v24  ;;  %v8118_v19 = vld [vmem:[#allocation12 + $0x860] ss:$28 sps:$4 sm:$0xff]  }
 0x4d2   :  { %6127 = vmatpush1.bf16.msra.mxu1 %v8103_v12 }
 0x4d3   :  { %6128 = vmatprep.subr.bf16.mxu1 %v8108_v42 }
 0x4d6   :  { %6129 = vmatpush1.bf16.msra.mxu1 %v8106_v57  ;;  %v8166_v57 = vld [vmem:[#allocation12 + $0xbe0] ss:$28 sps:$4 sm:$0xff]  }
 0x4d7   :  { %6130 = vmatprep.subr.bf16.mxu1 %v8111_v43 }
 0x4da   :  { %6131 = vmatpush1.bf16.msra.mxu1 %v8109_v13 }
 0x4db   :  { %6132 = vmatprep.subr.bf16.mxu1 %v8114_v14 }
 0x4de   :  { %6133 = vmatpush1.bf16.msra.mxu1 %v8112_v16  ;;  %v8171_v16 = vld [vmem:[#allocation12 + $0xc1c] ss:$28 sps:$4 sm:$0xff]  }
 0x4df   :  { %6134 = vmatprep.subr.bf16.mxu1 %v8117_v25 }
 0x4e2   :  { %6135 = vmatpush1.bf16.msra.mxu1 %v8115_v17 }
 0x4e3   :  { %6136 = vmatprep.subr.bf16.mxu1 %v8120_v21 }
 0x4e6   :  { %6137 = vmatpush1.bf16.msra.mxu1 %v8118_v19  ;;  %v8169_v19 = vld [vmem:[#allocation12 + $0xc18] ss:$28 sps:$4 sm:$0xff]  }
 0x4e7   :  { %6138 = vmatprep.subr.bf16.mxu1 %v8123_v23  ;;  %v8174_v23 = vld [vmem:[#allocation12 + $0xc54] ss:$28 sps:$4 sm:$0xff]  }
 0x4ea   :  { %6139 = vmatpush1.bf16.msra.mxu1 %v8121_v26  ;;  %v8172_v26 = vld [vmem:[#allocation12 + $0xc50] ss:$28 sps:$4 sm:$0xff]  }
 0x4eb   :  { %6140 = vmatprep.subr.bf16.mxu1 %v8126_v27  ;;  %v8177_v27 = vld [vmem:[#allocation12 + $0xc8c] ss:$28 sps:$4 sm:$0xff]  }
 0x4ee   :  { %6141 = vmatpush1.bf16.msra.mxu1 %v8124_v46 }
 0x4ef   :  { %6142 = vmatprep.subr.bf16.mxu1 %v8129_v28 }
 0x4f2   :  { %6143 = vmatpush1.bf16.msra.mxu1 %v8127_v29  ;;  %v8175_v29 = vld [vmem:[#allocation12 + $0xc88] ss:$28 sps:$4 sm:$0xff]  }
 0x4f3   :  { %6144 = vmatprep.subr.bf16.mxu1 %v8132_v30 }
 0x4f6   :  { %6145 = vmatpush1.bf16.msra.mxu1 %v8130_v32  ;;  %v8180_v32 = vld [vmem:[#allocation12 + $0xcc4] ss:$28 sps:$4 sm:$0xff]  }
 0x4f7   :  { %6146 = vmatprep.subr.bf16.mxu1 %v8135_v33 }
 0x4fa   :  { %6147 = vmatpush1.bf16.msra.mxu1 %v8133_v34 }
 0x4fb   :  { %6148 = vmatprep.subr.bf16.mxu1 %v8138_v35 }
 0x4fe   :  { %6149 = vmatpush1.bf16.msra.mxu1 %v8136_v36 }
 0x4ff   :  { %6150 = vmatprep.subr.bf16.mxu1 %v8141_v40 }
 0x502   :  { %6151 = vmatpush1.bf16.msra.mxu1 %v8139_v20  ;;  %v8178_v20 = vld [vmem:[#allocation12 + $0xcc0] ss:$28 sps:$4 sm:$0xff]  }
 0x503   :  { %6152 = vmatprep.subr.bf16.mxu1 %v8144_v22 }
 0x506   :  { %6153 = vmatpush1.bf16.msra.mxu1 %v8142_v45  ;;  %v8183_v45 = vld [vmem:[#allocation12 + $0xcfc] ss:$28 sps:$4 sm:$0xff]  }
 0x507   :  { %6154 = vmatprep.subr.bf16.mxu1 %v8147_v47 }
 0x50a   :  { %6155 = vmatpush1.bf16.msra.mxu1 %v8145_v48 }
 0x50b   :  { %6167 = vmatprep.subr.bf16.mxu1 %v8150_v49 }
 0x50d   :  { %6157 = vmatmul.mubr.bf16.vlgmr.msra.gmra.mrb[12].mxu1 %v8701_v38  ;;  %v3330_v38 = vrot.slane %v3323_v5, %v8586_v37 }
 0x50e   :  { %6168 = vmatpush1.bf16.msra.mxu1 %v8148_v50  ;;  %6199 = vmatprep.mubr.bf16.mxu1 %v8707_v44  ;;  %v8160_v44 = vld [vmem:[#allocation12 + $0xb70] ss:$28 sps:$4 sm:$0xff]   ;;  %v8181_v50 = vld [vmem:[#allocation12 + $0xcf8] ss:$28 sps:$4 sm:$0xff]  }
 0x50f   :  { %6169 = vmatprep.subr.bf16.mxu1 %v8153_v51  ;;  %v3365_v2 = vrot.slane %v3330_v38, %v8586_v37  ;;  %v8186_v51 = vld [vmem:[#allocation12 + $0xd34] ss:$28 sps:$4 sm:$0xff]  }
 0x512   :  { %6170 = vmatpush1.bf16.msra.mxu1 %v8151_v53  ;;  %v8184_v53 = vld [vmem:[#allocation12 + $0xd30] ss:$28 sps:$4 sm:$0xff]  }
 0x513   :  { %6171 = vmatprep.subr.bf16.mxu1 %v8156_v54  ;;  %v8189_v54 = vld [vmem:[#allocation12 + $0xd6c] ss:$28 sps:$4 sm:$0xff]  }
 0x516   :  { %6172 = vmatpush1.bf16.msra.mxu1 %v8154_v55  ;;  %v8187_v55 = vld [vmem:[#allocation12 + $0xd68] ss:$28 sps:$4 sm:$0xff]  }
 0x517   :  { %6173 = vmatprep.subr.bf16.mxu1 %v8159_v59  ;;  %v8192_v59 = vld [vmem:[#allocation12 + $0xda4] ss:$28 sps:$4 sm:$0xff]  }
 0x51a   :  { %6174 = vmatpush1.bf16.msra.mxu1 %v8157_v60 }
 0x51b   :  { %6175 = vmatprep.subr.bf16.mxu1 %v8162_v61  ;;  %v8190_v61 = vld [vmem:[#allocation12 + $0xda0] ss:$28 sps:$4 sm:$0xff]  }
 0x51e   :  { %6176 = vmatpush1.bf16.msra.mxu1 %v8160_v44  ;;  %v8195_v44 = vld [vmem:[#allocation12 + $0xddc] ss:$28 sps:$4 sm:$0xff]  }
 0x51f   :  { %6177 = vmatprep.subr.bf16.mxu1 %v8165_v1  ;;  %v8193_v1 = vld [vmem:[#allocation12 + $0xdd8] ss:$28 sps:$4 sm:$0xff]  }
 0x520   :  { %v5857_v7 = vpop.f32.mrb[8].mxu1  ;;  %v6029_v41 = vpop.f32.mrb[20].mxu0 }
 0x521   :  { %v7354_v8 = vadd.f32 %v5857_v7, %v3365_v2  ;;  %v7358_v9 = vadd.f32 %v6029_v41, %v3373_v3  ;;  %v5859_v10 = vpop.f32.mrb[9].mxu1  ;;  %v6031_v56 = vpop.f32.mrb[21].mxu0 }
 0x522   :  { %v7355_v11 = vadd.f32 %v5859_v10, %v3369_v31  ;;  %v7359_v24 = vadd.f32 %v6031_v56, %v3377_v4  ;;  %v5861_v12 = vpop.f32.mrb[10].mxu1  ;;  %v6033_v42 = vpop.f32.mrb[22].mxu0  ;;  %6178 = vmatpush1.bf16.msra.mxu1 %v8163_v6 }
 0x523   :  { %8196 = vtanh.f32 %v7354_v8  ;;  %v7356_v43 = vadd.f32 %v5861_v12, %v3365_v2  ;;  %v5863_v13 = vpop.f32.mrb[11].mxu1  ;;  %v6035_v14 = vpop.f32.mrb[23].mxu0  ;;  %6179 = vmatprep.subr.bf16.mxu1 %v8168_v15  ;;  %v7360_v25 = vadd.f32 %v6033_v42, %v3373_v3  ;;  %v3324_v2 = vunpack.c.h.bf16 %v8732_v58 }
 0x524   :  { %8198 = vtanh.f32 %v7358_v9  ;;  %v7357_v17 = vadd.f32 %v5863_v13, %v3369_v31  ;;  %v7361_v21 = vadd.f32 %v6035_v14, %v3377_v4 }
 0x525   :  { %8200 = vtanh.f32 %v7355_v11  ;;  %v3354_v3 = vrot.slane %v3324_v2, %v8638_v52 }
 0x526   :  { %8202 = vtanh.f32 %v7359_v24  ;;  %6180 = vmatpush1.bf16.msra.mxu1 %v8166_v57 }
 0x527   :  { %8204 = vtanh.f32 %v7356_v43  ;;  %6181 = vmatprep.subr.bf16.mxu1 %v8171_v16  ;;  %v3389_v31 = vrot.slane %v3354_v3, %v8586_v37 }
 0x528   :  { %8206 = vtanh.f32 %v7360_v25 }
 0x529   :  { %8208 = vtanh.f32 %v7357_v17 }
 0x52a   :  { %8210 = vtanh.f32 %v7361_v21  ;;  %6182 = vmatpush1.bf16.msra.mxu1 %v8169_v19 }
 0x52b   :  { %6183 = vmatprep.subr.bf16.mxu1 %v8174_v23 }
 0x52d   :  { %v8197_v46 = vpop.eup %8196 }
 0x52e   :  { %v8199_v28 = vpop.eup %8198  ;;  %6184 = vmatpush1.bf16.msra.mxu1 %v8172_v26 }
 0x52f   :  { %v8201_v30 = vpop.eup %8200  ;;  %6185 = vmatprep.subr.bf16.mxu1 %v8177_v27 }
 0x530   :  { %v8203_v33 = vpop.eup %8202  ;;  %v7242_v34 = vpack.c.bf16 %v8201_v30, %v8197_v46  ;;  %v3350_v30 = vrot.slane %v3324_v2, %v8589_v39 }
 0x531   :  { %v8205_v35 = vpop.eup %8204  ;;  %v7243_v36 = vpack.c.bf16 %v8203_v33, %v8199_v28 }
 0x532   :  { %v8207_v40 = vpop.eup %8206  ;;  %6432 = vst [vmem:[%s8784_s9] sm:$0xff] %v7242_v34  ;;  %6186 = vmatpush1.bf16.msra.mxu1 %v8175_v29  ;;  %v3346_v29 = vrot.slane %v3324_v2, %v8586_v37  ;;  %v3385_v33 = vrot.slane %v3350_v30, %v8586_v37 }
 0x533   :  { %v8209_v22 = vpop.eup %8208  ;;  %6433 = vst [vmem:[%s8784_s9 + $0x8] sm:$0xff] %v7243_v36  ;;  %6187 = vmatprep.subr.bf16.mxu1 %v8180_v32 }
 0x534   :  { %v8211_v47 = vpop.eup %8210  ;;  %v7246_v48 = vpack.c.bf16 %v8209_v22, %v8205_v35  ;;  %v3381_v32 = vrot.slane %v3346_v29, %v8586_v37 }
 0x535   :  { %v7247_v49 = vpack.c.bf16 %v8211_v47, %v8207_v40 }
 0x536   :  { %6436 = vst [vmem:[%s8784_s9 + $0x1c] sm:$0xff] %v7246_v48  ;;  %6188 = vmatpush1.bf16.msra.mxu1 %v8178_v20 }
 0x537   :  { %6437 = vst [vmem:[%s8784_s9 + $0x24] sm:$0xff] %v7247_v49  ;;  %6189 = vmatprep.subr.bf16.mxu1 %v8183_v45 }
 0x53a   :  { %6190 = vmatpush1.bf16.msra.mxu1 %v8181_v50 }
 0x53b   :  { %6191 = vmatprep.subr.bf16.mxu1 %v8186_v51 }
 0x53e   :  { %6192 = vmatpush1.bf16.msra.mxu1 %v8184_v53 }
 0x53f   :  { %6193 = vmatprep.subr.bf16.mxu1 %v8189_v54 }
 0x541   :  { %v7266_v5 = vpop.f32.mrb[24].mxu0 }
 0x542   :  { %v7267_v60 = vpop.f32.mrb[25].mxu0  ;;  %6194 = vmatpush1.bf16.msra.mxu1 %v8187_v55 }
 0x543   :  { %v7268_v38 = vadd.f32 %v7267_v60, %v7266_v5  ;;  %v7269_v62 = vpop.f32.mrb[26].mxu0  ;;  %6195 = vmatprep.subr.bf16.mxu1 %v8192_v59 }
 0x544   :  { %v7270_v63 = vpop.f32.mrb[27].mxu0 }
 0x545   :  { %v7271_v0 = vadd.f32 %v7270_v63, %v7269_v62  ;;  %v6245_v15 = vadd.f32 %v7268_v38, %v3389_v31 }
 0x546   :  { %6196 = vmatpush1.bf16.msra.mxu1 %v8190_v61 }
 0x547   :  { %6197 = vmatprep.subr.bf16.mxu1 %v8195_v44  ;;  %v6248_v9 = vadd.f32 %v7271_v0, %v3389_v31 }
 0x54a   :  { %6198 = vmatpush1.bf16.msra.mxu1 %v8193_v1 }
 0x54d   :  { %6200 = vmatmul.mubr.bf16.vlgmr.msra.gmra.mrb[12].mxu1 %v8703_v18 }
 0x561   :  { %v7288_v4 = vpop.f32.mrb[28].mxu0 }
 0x562   :  { %v7289_v6 = vpop.f32.mrb[29].mxu0 }
 0x563   :  { %v7290_v7 = vadd.f32 %v7289_v6, %v7288_v4  ;;  %v7291_v41 = vpop.f32.mrb[30].mxu0 }
 0x564   :  { %v7292_v8 = vpop.f32.mrb[31].mxu0 }
 0x565   :  { %v6286_v10 = vadd.f32 %v7290_v7, %v6245_v15  ;;  %v7293_v56 = vadd.f32 %v7292_v8, %v7291_v41 }
 0x567   :  { %v6289_v11 = vadd.f32 %v7293_v56, %v6248_v9 }
 0x581   :  { %v7310_v24 = vpop.f32.mrb[32].mxu0 }
 0x582   :  { %v7311_v12 = vpop.f32.mrb[33].mxu0 }
 0x583   :  { %v7312_v42 = vadd.f32 %v7311_v12, %v7310_v24  ;;  %v7313_v18 = vpop.f32.mrb[34].mxu0 }
 0x584   :  { %v7314_v57 = vpop.f32.mrb[35].mxu0 }
 0x585   :  { %v6327_v58 = vadd.f32 %v7312_v42, %v6286_v10  ;;  %v7315_v43 = vadd.f32 %v7314_v57, %v7313_v18 }
 0x587   :  { %v6330_v52 = vadd.f32 %v7315_v43, %v6289_v11 }
 0x5a1   :  { %v7332_v13 = vpop.f32.mrb[36].mxu0 }
 0x5a2   :  { %v7333_v14 = vpop.f32.mrb[37].mxu0 }
 0x5a3   :  { %v7334_v16 = vadd.f32 %v7333_v14, %v7332_v13  ;;  %v7335_v25 = vpop.f32.mrb[38].mxu0 }
 0x5a4   :  { %v7336_v17 = vpop.f32.mrb[39].mxu0 }
 0x5a5   :  { %v6368_v21 = vadd.f32 %v7334_v16, %v6327_v58  ;;  %v7337_v19 = vadd.f32 %v7336_v17, %v7335_v25 }
 0x5a7   :  { %8212 = vtanh.f32 %v6368_v21  ;;  %v6371_v23 = vadd.f32 %v7337_v19, %v6330_v52 }
 0x5a9   :  { %8214 = vtanh.f32 %v6371_v23 }
 0x5b1   :  { %v8213_v26 = vpop.eup %8212 }
 0x5b2   :  { %v7245_v27 = vpack.c.bf16 %v8213_v26, %v8213_v26 }
 0x5b3   :  { %v8215_v46 = vpop.eup %8214 }
 0x5b4   :  { %6435 = vst [vmem:[%s8784_s9 + $0x18] sm:$0xf] %v7245_v27  ;;  %v7249_v28 = vpack.c.bf16 %v8215_v46, %v8215_v46 }
 0x5b6   :  { %6439 = vst [vmem:[%s8784_s9 + $0x34] sm:$0xf] %v7249_v28 }
 0x620   :  { %v6201_v34 = vpop.f32.mrb[12].mxu1 }
 0x621   :  { %v7362_v35 = vadd.f32 %v6201_v34, %v3381_v32  ;;  %v6203_v36 = vpop.f32.mrb[13].mxu1 }
 0x622   :  { %v7363_v40 = vadd.f32 %v6203_v36, %v3385_v33  ;;  %v6205_v20 = vpop.f32.mrb[14].mxu1 }
 0x623   :  { %8216 = vtanh.f32 %v7362_v35  ;;  %v7364_v22 = vadd.f32 %v6205_v20, %v3381_v32  ;;  %v6207_v45 = vpop.f32.mrb[15].mxu1 }
 0x624   :  { %8218 = vtanh.f32 %v7363_v40  ;;  %v7365_v47 = vadd.f32 %v6207_v45, %v3385_v33 }
 0x625   :  { %8220 = vtanh.f32 %v7364_v22 }
 0x626   :  { %8222 = vtanh.f32 %v7365_v47 }
 0x62d   :  { %v8217_v48 = vpop.eup %8216 }
 0x62e   :  { %v8219_v49 = vpop.eup %8218 }
 0x62f   :  { %v8221_v50 = vpop.eup %8220  ;;  %v7244_v39 = vpack.c.bf16 %v8219_v49, %v8217_v48 }
 0x630   :  { %v8223_v51 = vpop.eup %8222 }
 0x631   :  { %6434 = vst [vmem:[%s8784_s9 + $0x10] sm:$0xff] %v7244_v39  ;;  %v7248_v37 = vpack.c.bf16 %v8223_v51, %v8221_v50 }
 0x633   :  { %6438 = vst [vmem:[%s8784_s9 + $0x2c] sm:$0xff] %v7248_v37 }
 0x634   :  { %6444 = vsyncpa [#allocation3], 1 }
 0x635   :  { %6445 = vsyncpa [#allocation5], 1 }
 0x636   :  { %6446 = vsyncpa [#allocation8], 1 }
 0x637   :  { %6447 = vsyncpa [#allocation11], 1 }
 0x638   :  { %6448 = vsyncpa [#allocation14], 1 }

</bundles_post_ra>
